<compile_context>
chip_gen: v7x
topology: tpu7x:2x2x1
jax: 0.10.0
libtpu: 0.0.40
codegen_flags: <defaults>
</compile_context>

<pallas_src>
import functools

import jax
import jax.numpy as jnp
from jax import lax
from jax.experimental import pallas as pl
from jax.experimental.pallas import tpu as pltpu


# ----------------------- recurrent (sequential) kernel ----------------------

def _rnn_recurrent_kernel(xemb_ref, h0_ref, w_hhT_ref,
                          y_ref, h_last_ref,
                          h_scratch,
                          *, t_c):
    """One grid step == one chunk of `t_c` time steps (t_c divides T).

    xemb_ref   : (T_c, B, H) f32   gathered rows of W_ih^T with bias folded in
    h0_ref     : (1, B, H)   f32   initial hidden state (constant block)
    w_hhT_ref  : (H, H)      bf16  W_hh^T (pre-transposed in wrapper)
    y_ref      : (T_c, B, H) bf16  hidden outputs for this chunk
    h_last_ref : (1, B, H)   f32   final hidden state (written on last chunk)
    h_scratch  : (B, H)      f32   hidden-state carry, persists across chunks
    """
    g = pl.program_id(0)

    @pl.when(g == 0)
    def _():
        h_scratch[...] = h0_ref[0]

    def step(s, carry):
        h_prev = h_scratch[...]                                    # (B, H) f32
        # Elman cell: h_t = tanh((emb_t + b) + h_{t-1} W_hh^T)
        pre = xemb_ref[s] + jnp.dot(h_prev.astype(jnp.bfloat16), w_hhT_ref[...],
                                    preferred_element_type=jnp.float32)
        h_new = jnp.tanh(pre)                                      # f32 carry
        h_scratch[...] = h_new
        y_ref[s] = h_new.astype(y_ref.dtype)                       # bf16 store
        return carry

    lax.fori_loop(0, t_c, step, 0, unroll=True)

    @pl.when(g == pl.num_programs(0) - 1)
    def _():
        h_last_ref[0] = h_scratch[...].astype(h_last_ref.dtype)


# ------------------------- decoder (parallel) kernel ------------------------

def _decoder_kernel(y_ref, w_ref, b_ref, o_ref):
    """logits = Y @ W_dense^T + b_dense, one (tile_m, tile_n) block per step."""
    o_ref[...] = (jnp.dot(y_ref[...], w_ref[...],
                          preferred_element_type=jnp.float32)
                  + b_ref[...]).astype(o_ref.dtype)


def _pick_tile(dim, align, max_tile=512):
    """Largest `align`-aligned tile (<= max_tile) dividing `dim`; else full."""
    for t in range(max_tile, align - 1, -align):
        if dim % t == 0:
            return t
    return dim          # full-extent block is always legal


def _decode(y_flat, w_dT, b_d2):
    m, hidden = y_flat.shape
    v = w_dT.shape[1]
    # Pad the vocab axis to a multiple of 128 so weight/output blocks are
    # lane-dense and VMEM-sized even for awkward vocab sizes.
    v_pad = ((v + 127) // 128) * 128
    if v_pad != v:
        w_dT = jnp.pad(w_dT, ((0, 0), (0, v_pad - v)))
        b_d2 = jnp.pad(b_d2, ((0, 0), (0, v_pad - v)))
    tile_m = _pick_tile(m, 8)
    tile_n = _pick_tile(v_pad, 128)

    cost = pl.CostEstimate(
        flops=2 * m * hidden * v_pad,
        transcendentals=0,
        bytes_accessed=(m * hidden * 2            # Y (bf16)
                        + hidden * v_pad * 2      # W_d^T (bf16)
                        + m * v_pad * 4           # logits (f32)
                        + v_pad * 4),             # bias
    )

    out = pl.pallas_call(
        _decoder_kernel,
        out_shape=jax.ShapeDtypeStruct((m, v_pad), jnp.float32),
        grid_spec=pltpu.PrefetchScalarGridSpec(
            num_scalar_prefetch=0,
            grid=(m // tile_m, v_pad // tile_n),
            in_specs=[
                pl.BlockSpec((tile_m, hidden), lambda i, j: (i, 0)),   # Y
                pl.BlockSpec((hidden, tile_n), lambda i, j: (0, j)),   # W_d^T
                pl.BlockSpec((1, tile_n), lambda i, j: (0, j)),        # b_d
            ],
            out_specs=pl.BlockSpec((tile_m, tile_n), lambda i, j: (i, j)),
        ),
        compiler_params=pltpu.CompilerParams(
            dimension_semantics=("parallel", "parallel"),
            vmem_limit_bytes=32 * 1024 * 1024),
        cost_estimate=cost,
    )(y_flat, w_dT, b_d2)
    return out[:, :v] if v_pad != v else out


# ------------------------------ chunk selection ------------------------------

def _pick_chunk(num_steps, batch, hidden, budget_bytes=8 << 20, max_unroll=128):
    """Largest divisor of num_steps whose double-buffered chunk traffic
    (xemb f32 in + Y bf16 out) fits `budget_bytes`, capped for unrolling."""
    per_step = batch * hidden * (4 + 2) * 2     # (f32 in + bf16 out) x 2 bufs
    max_tc = min(max(1, budget_bytes // per_step), max_unroll)
    best = 1
    for d in range(1, num_steps + 1):
        if num_steps % d == 0 and d <= max_tc:
            best = d
    return best


# --------------------------------- wrapper ----------------------------------

@functools.partial(jax.jit, static_argnames=("vocab_size",))
def rnn_model_forward(inputs, state, params, *, vocab_size):
    """Equivalent of RNNModel.forward.

    inputs : (batch, num_steps) int32 token ids
    state  : (1, batch, hidden) float32 initial hidden state (h0)
    returns (output, new_state):
      output    : (num_steps * batch, vocab_size) float32 logits
      new_state : (1, batch, hidden) float32 final hidden state
    """
    w_ih, w_hh, b_ih, b_hh, w_d, b_d = params
    batch, num_steps = inputs.shape
    hidden = w_hh.shape[0]

    # Pre-transpose / pre-combine parameters once (outside the time loop).
    w_ihT = w_ih.T                                    # (V, H) f32 gather table
    w_hhT = w_hh.T.astype(jnp.bfloat16)               # (H, H) bf16
    w_dT = w_d.T.astype(jnp.bfloat16)                 # (H, V) bf16
    bias = (b_ih + b_hh).astype(jnp.float32)          # (H,)
    b_d2 = b_d.reshape(1, vocab_size).astype(jnp.float32)

    # one_hot(inputs.T) @ W_ih^T == row gather of W_ih^T; bias folded in once
    # here instead of T times on the serial per-step path.
    tokens = inputs.T                                 # (T, B)
    xemb = jnp.take(w_ihT, tokens, axis=0) + bias     # (T, B, H) f32

    # Chunk size divides T exactly: no padding, no per-step mask.
    t_c = _pick_chunk(num_steps, batch, hidden)
    n_chunks = num_steps // t_c

    kernel = functools.partial(_rnn_recurrent_kernel, t_c=t_c)
    y, h_last = pl.pallas_call(
        kernel,
        out_shape=(
            jax.ShapeDtypeStruct((num_steps, batch, hidden), jnp.bfloat16),  # Y
            jax.ShapeDtypeStruct((1, batch, hidden), jnp.float32),           # h_T
        ),
        grid_spec=pltpu.PrefetchScalarGridSpec(
            num_scalar_prefetch=0,
            grid=(n_chunks,),
            in_specs=[
                pl.BlockSpec((t_c, batch, hidden), lambda g: (g, 0, 0)),  # xemb
                pl.BlockSpec((1, batch, hidden), lambda g: (0, 0, 0)),    # h0
                pl.BlockSpec((hidden, hidden), lambda g: (0, 0)),         # W_hh^T
            ],
            out_specs=[
                pl.BlockSpec((t_c, batch, hidden), lambda g: (g, 0, 0)),  # Y
                pl.BlockSpec((1, batch, hidden), lambda g: (0, 0, 0)),    # h_T
            ],
            scratch_shapes=[pltpu.VMEM((batch, hidden), jnp.float32)],
        ),
        compiler_params=pltpu.CompilerParams(
            dimension_semantics=("arbitrary",),   # true recurrence: stay serial
            vmem_limit_bytes=32 * 1024 * 1024,
        ),
    )(xemb, state, w_hhT)

    # Decoder as one fully parallel lane-dense matmul over all time steps.
    y_flat = y.reshape(num_steps * batch, hidden)     # bf16
    logits = _decode(y_flat, w_dT, b_d2)              # (T*B, V) f32
    return logits, h_last


# --------------------------------- reference --------------------------------

def rnn_model_forward_ref(inputs, state, params, vocab_size):
    """Pure-JAX reference mimicking the kernel's mixed precision
    (bf16 weights/operands for the two matmuls, f32 accumulation/carry,
    bf16 Y intermediate)."""
    w_ih, w_hh, b_ih, b_hh, w_d, b_d = params
    hidden = w_hh.shape[0]
    w_ihT = w_ih.T                                    # (V, H) f32
    w_hhT = w_hh.T.astype(jnp.bfloat16)
    w_dT = w_d.T.astype(jnp.bfloat16)
    bias = (b_ih + b_hh).astype(jnp.float32)

    tokens = inputs.T                                 # (T, B)
    xemb = jnp.take(w_ihT, tokens, axis=0) + bias     # (T, B, H) f32
    h = state[0]
    ys = []
    for t in range(tokens.shape[0]):
        pre = xemb[t] + jnp.dot(h.astype(jnp.bfloat16), w_hhT,
                                preferred_element_type=jnp.float32)
        h = jnp.tanh(pre)
        ys.append(h.astype(jnp.bfloat16))
    y = jnp.stack(ys)                                 # (T, B, H) bf16
    y_flat = y.reshape(-1, hidden)
    out = (jnp.dot(y_flat, w_dT, preferred_element_type=jnp.float32)
           + b_d.astype(jnp.float32))
    return out, h[None]


# ----------------------------------- main ------------------------------------

if __name__ == "__main__":
    # Shapes consistent with the module: num_hiddens=256, batch=2, T=35.
    # vocab chosen as a multiple of 128 so decoder tiles are lane-dense.
    vocab_size = 128
    num_hiddens = 256
    batch_size = 2
    num_steps = 35

    key = jax.random.PRNGKey(0)
    k = jax.random.split(key, 8)

    # PyTorch-style uniform(-1/sqrt(H), 1/sqrt(H)) init for RNN/Linear params.
    bound = 1.0 / (num_hiddens ** 0.5)
    w_ih = jax.random.uniform(k[0], (num_hiddens, vocab_size), jnp.float32, -bound, bound)
    w_hh = jax.random.uniform(k[1], (num_hiddens, num_hiddens), jnp.float32, -bound, bound)
    b_ih = jax.random.uniform(k[2], (num_hiddens,), jnp.float32, -bound, bound)
    b_hh = jax.random.uniform(k[3], (num_hiddens,), jnp.float32, -bound, bound)
    w_d = jax.random.uniform(k[4], (vocab_size, num_hiddens), jnp.float32, -bound, bound)
    b_d = jax.random.uniform(k[5], (vocab_size,), jnp.float32, -bound, bound)
    params = (w_ih, w_hh, b_ih, b_hh, w_d, b_d)

    # inputs: (batch, num_steps) token ids; state=None in PyTorch -> zeros h0.
    inputs = jax.random.randint(k[6], (batch_size, num_steps), 0, vocab_size, jnp.int32)
    state0 = jnp.zeros((1, batch_size, num_hiddens), jnp.float32)

    out, new_state = rnn_model_forward(inputs, state0, params, vocab_size=vocab_size)
    out = jax.block_until_ready(out)
    new_state = jax.block_until_ready(new_state)

    out_ref, state_ref = rnn_model_forward_ref(inputs, state0, params, vocab_size)
    assert out.shape == (num_steps * batch_size, vocab_size)
    assert new_state.shape == (1, batch_size, num_hiddens)
    # bf16 matmul path -> compare against a matching mixed-precision reference.
    assert jnp.allclose(out, out_ref, atol=1e-2, rtol=1e-2), \
        float(jnp.max(jnp.abs(out - out_ref)))
    assert jnp.allclose(new_state, state_ref, atol=1e-2, rtol=1e-2), \
        float(jnp.max(jnp.abs(new_state - state_ref)))

    print("KERNEL_OK")
</pallas_src>

<mosaic_0001>
module attributes {stable_mosaic.version = 11 : i64} {
  func.func @_decoder_kernel(%arg0: i32, %arg1: i32, %arg2: memref<70x256xbf16, #tpu.memory_space<vmem>>, %arg3: memref<256x128xbf16, #tpu.memory_space<vmem>>, %arg4: memref<1x128xf32, #tpu.memory_space<vmem>>, %arg5: memref<70x128xf32, #tpu.memory_space<vmem>>) attributes {dimension_semantics = [#tpu.dimension_semantics<parallel>, #tpu.dimension_semantics<parallel>], iteration_bounds = array<i64: 1, 1>, scalar_prefetch = 0 : i64, scratch_operands = 0 : i64, tpu.core_type = #tpu.core_type<tc>, window_params = [{transform_indices = @transform_0, window_bounds = array<i64: 70, 256>}, {transform_indices = @transform_1, window_bounds = array<i64: 256, 128>}, {transform_indices = @transform_2, window_bounds = array<i64: 1, 128>}, {transform_indices = @transform_3, window_bounds = array<i64: 70, 128>}]} {
    %c0 = arith.constant 0 : index
    %c0_0 = arith.constant 0 : index
    %0 = vector.load %arg2[%c0, %c0_0] : memref<70x256xbf16, #tpu.memory_space<vmem>>, vector<70x256xbf16>
    %c0_1 = arith.constant 0 : index
    %c0_2 = arith.constant 0 : index
    %1 = vector.load %arg3[%c0_1, %c0_2] : memref<256x128xbf16, #tpu.memory_space<vmem>>, vector<256x128xbf16>
    %cst = arith.constant dense<0.000000e+00> : vector<70x128xf32>
    %2 = tpu.matmul %0, %1, %cst {dimension_numbers = #tpu.dot_dimension_numbers<[1], [0], [0], [1], [0, 0, 1, 1], [], []>} : vector<70x256xbf16>, vector<256x128xbf16>, vector<70x128xf32> -> vector<70x128xf32>
    %c0_3 = arith.constant 0 : index
    %c0_4 = arith.constant 0 : index
    %3 = vector.load %arg4[%c0_3, %c0_4] : memref<1x128xf32, #tpu.memory_space<vmem>>, vector<1x128xf32>
    %4 = vector.broadcast %3 : vector<1x128xf32> to vector<70x128xf32>
    %5 = arith.addf %2, %4 : vector<70x128xf32>
    %c0_5 = arith.constant 0 : index
    %c0_6 = arith.constant 0 : index
    %6 = vector.load %arg5[%c0_5, %c0_6] : memref<70x128xf32, #tpu.memory_space<vmem>>, vector<70x128xf32>
    tpu.vector_store %arg5[%c0_5, %c0_6], %5 {strides = array<i32>} : memref<70x128xf32, #tpu.memory_space<vmem>>, vector<70x128xf32>,
    return
  }
  func.func @transform_0(%arg0: i32, %arg1: i32) -> (i32, i32) {
    %c0_i32 = arith.constant 0 : i32
    %c0_i32_0 = arith.constant 0 : i32
    return %arg0, %c0_i32 : i32, i32
  }
  func.func @transform_1(%arg0: i32, %arg1: i32) -> (i32, i32) {
    %c0_i32 = arith.constant 0 : i32
    %c0_i32_0 = arith.constant 0 : i32
    return %c0_i32, %arg1 : i32, i32
  }
  func.func @transform_2(%arg0: i32, %arg1: i32) -> (i32, i32) {
    %c0_i32 = arith.constant 0 : i32
    %c0_i32_0 = arith.constant 0 : i32
    return %c0_i32, %arg1 : i32, i32
  }
  func.func @transform_3(%arg0: i32, %arg1: i32) -> (i32, i32) {
    %c0_i32 = arith.constant 0 : i32
    return %arg0, %arg1 : i32, i32
  }
}

module attributes {stable_mosaic.version = 11 : i64} {
  func.func @_rnn_recurrent_kernel(%arg0: i32, %arg1: memref<35x2x256xf32, #tpu.memory_space<vmem>>, %arg2: memref<1x2x256xf32, #tpu.memory_space<vmem>>, %arg3: memref<256x256xbf16, #tpu.memory_space<vmem>>, %arg4: memref<35x2x256xbf16, #tpu.memory_space<vmem>>, %arg5: memref<1x2x256xf32, #tpu.memory_space<vmem>>, %arg6: memref<2x256xf32, #tpu.memory_space<vmem>>) attributes {dimension_semantics = [#tpu.dimension_semantics<arbitrary>], iteration_bounds = array<i64: 1>, scalar_prefetch = 0 : i64, scratch_operands = 1 : i64, tpu.core_type = #tpu.core_type<tc>, window_params = [{transform_indices = @transform_0, window_bounds = array<i64: 35, 2, 256>}, {pipeline_mode = #tpu.pipeline_mode<synchronous>, transform_indices = @transform_1, window_bounds = array<i64: 1, 2, 256>}, {pipeline_mode = #tpu.pipeline_mode<synchronous>, transform_indices = @transform_2, window_bounds = array<i64: 256, 256>}, {transform_indices = @transform_3, window_bounds = array<i64: 35, 2, 256>}, {pipeline_mode = #tpu.pipeline_mode<synchronous>, transform_indices = @transform_4, window_bounds = array<i64: 1, 2, 256>}]} {
    %c0_i32 = arith.constant 0 : i32
    %0 = arith.cmpi eq, %arg0, %c0_i32 : i32
    %1 = arith.extui %0 : i1 to i32
    %c0_i32_0 = arith.constant 0 : i32
    %2 = arith.cmpi ne, %1, %c0_i32_0 : i32
    scf.if %2 {
      %c0_387 = arith.constant 0 : index
      %c0_388 = arith.constant 0 : index
      %c0_389 = arith.constant 0 : index
      %531 = vector.load %arg2[%c0_387, %c0_388, %c0_389] : memref<1x2x256xf32, #tpu.memory_space<vmem>>, vector<1x2x256xf32>
      %532 = vector.shape_cast %531 : vector<1x2x256xf32> to vector<2x256xf32>
      %c0_390 = arith.constant 0 : index
      %c0_391 = arith.constant 0 : index
      %533 = vector.load %arg6[%c0_390, %c0_391] : memref<2x256xf32, #tpu.memory_space<vmem>>, vector<2x256xf32>
      tpu.vector_store %arg6[%c0_390, %c0_391], %532 {strides = array<i32>} : memref<2x256xf32, #tpu.memory_space<vmem>>, vector<2x256xf32>,
    } else {
    }
    %c0_i32_1 = arith.constant 0 : i32
    %c0 = arith.constant 0 : index
    %c0_2 = arith.constant 0 : index
    %3 = vector.load %arg6[%c0, %c0_2] : memref<2x256xf32, #tpu.memory_space<vmem>>, vector<2x256xf32>
    %4 = arith.index_cast %c0_i32_1 : i32 to index
    %c0_3 = arith.constant 0 : index
    %c0_4 = arith.constant 0 : index
    %5 = vector.load %arg1[%4, %c0_3, %c0_4] : memref<35x2x256xf32, #tpu.memory_space<vmem>>, vector<1x2x256xf32>
    %6 = vector.shape_cast %5 : vector<1x2x256xf32> to vector<2x256xf32>
    %7 = arith.truncf %3 : vector<2x256xf32> to vector<2x256xbf16>
    %c0_5 = arith.constant 0 : index
    %c0_6 = arith.constant 0 : index
    %8 = vector.load %arg3[%c0_5, %c0_6] : memref<256x256xbf16, #tpu.memory_space<vmem>>, vector<256x256xbf16>
    %cst = arith.constant dense<0.000000e+00> : vector<2x256xf32>
    %9 = tpu.matmul %7, %8, %cst {dimension_numbers = #tpu.dot_dimension_numbers<[1], [0], [0], [1], [0, 0, 1, 1], [], []>} : vector<2x256xbf16>, vector<256x256xbf16>, vector<2x256xf32> -> vector<2x256xf32>
    %10 = arith.addf %6, %9 : vector<2x256xf32>
    %11 = math.tanh %10 : vector<2x256xf32>
    %c0_7 = arith.constant 0 : index
    %c0_8 = arith.constant 0 : index
    %12 = vector.load %arg6[%c0_7, %c0_8] : memref<2x256xf32, #tpu.memory_space<vmem>>, vector<2x256xf32>
    tpu.vector_store %arg6[%c0_7, %c0_8], %11 {strides = array<i32>} : memref<2x256xf32, #tpu.memory_space<vmem>>, vector<2x256xf32>,
    %13 = arith.truncf %11 : vector<2x256xf32> to vector<2x256xbf16>
    %14 = arith.index_cast %c0_i32_1 : i32 to index
    %c0_9 = arith.constant 0 : index
    %c0_10 = arith.constant 0 : index
    %15 = vector.load %arg4[%14, %c0_9, %c0_10] : memref<35x2x256xbf16, #tpu.memory_space<vmem>>, vector<1x2x256xbf16>
    %16 = vector.shape_cast %15 : vector<1x2x256xbf16> to vector<2x256xbf16>
    %17 = vector.shape_cast %13 : vector<2x256xbf16> to vector<1x2x256xbf16>
    tpu.vector_store %arg4[%14, %c0_9, %c0_10], %17 {strides = array<i32>} : memref<35x2x256xbf16, #tpu.memory_space<vmem>>, vector<1x2x256xbf16>,
    %c1_i32 = arith.constant 1 : i32
    %c0_11 = arith.constant 0 : index
    %c0_12 = arith.constant 0 : index
    %18 = vector.load %arg6[%c0_11, %c0_12] : memref<2x256xf32, #tpu.memory_space<vmem>>, vector<2x256xf32>
    %19 = arith.index_cast %c1_i32 : i32 to index
    %c0_13 = arith.constant 0 : index
    %c0_14 = arith.constant 0 : index
    %20 = vector.load %arg1[%19, %c0_13, %c0_14] : memref<35x2x256xf32, #tpu.memory_space<vmem>>, vector<1x2x256xf32>
    %21 = vector.shape_cast %20 : vector<1x2x256xf32> to vector<2x256xf32>
    %22 = arith.truncf %18 : vector<2x256xf32> to vector<2x256xbf16>
    %c0_15 = arith.constant 0 : index
    %c0_16 = arith.constant 0 : index
    %23 = vector.load %arg3[%c0_15, %c0_16] : memref<256x256xbf16, #tpu.memory_space<vmem>>, vector<256x256xbf16>
    %cst_17 = arith.constant dense<0.000000e+00> : vector<2x256xf32>
    %24 = tpu.matmul %22, %23, %cst_17 {dimension_numbers = #tpu.dot_dimension_numbers<[1], [0], [0], [1], [0, 0, 1, 1], [], []>} : vector<2x256xbf16>, vector<256x256xbf16>, vector<2x256xf32> -> vector<2x256xf32>
    %25 = arith.addf %21, %24 : vector<2x256xf32>
    %26 = math.tanh %25 : vector<2x256xf32>
    %c0_18 = arith.constant 0 : index
    %c0_19 = arith.constant 0 : index
    %27 = vector.load %arg6[%c0_18, %c0_19] : memref<2x256xf32, #tpu.memory_space<vmem>>, vector<2x256xf32>
    tpu.vector_store %arg6[%c0_18, %c0_19], %26 {strides = array<i32>} : memref<2x256xf32, #tpu.memory_space<vmem>>, vector<2x256xf32>,
    %28 = arith.truncf %26 : vector<2x256xf32> to vector<2x256xbf16>
    %29 = arith.index_cast %c1_i32 : i32 to index
    %c0_20 = arith.constant 0 : index
    %c0_21 = arith.constant 0 : index
    %30 = vector.load %arg4[%29, %c0_20, %c0_21] : memref<35x2x256xbf16, #tpu.memory_space<vmem>>, vector<1x2x256xbf16>
    %31 = vector.shape_cast %30 : vector<1x2x256xbf16> to vector<2x256xbf16>
    %32 = vector.shape_cast %28 : vector<2x256xbf16> to vector<1x2x256xbf16>
    tpu.vector_store %arg4[%29, %c0_20, %c0_21], %32 {strides = array<i32>} : memref<35x2x256xbf16, #tpu.memory_space<vmem>>, vector<1x2x256xbf16>,
    %c2_i32 = arith.constant 2 : i32
    %c0_22 = arith.constant 0 : index
    %c0_23 = arith.constant 0 : index
    %33 = vector.load %arg6[%c0_22, %c0_23] : memref<2x256xf32, #tpu.memory_space<vmem>>, vector<2x256xf32>
    %34 = arith.index_cast %c2_i32 : i32 to index
    %c0_24 = arith.constant 0 : index
    %c0_25 = arith.constant 0 : index
    %35 = vector.load %arg1[%34, %c0_24, %c0_25] : memref<35x2x256xf32, #tpu.memory_space<vmem>>, vector<1x2x256xf32>
    %36 = vector.shape_cast %35 : vector<1x2x256xf32> to vector<2x256xf32>
    %37 = arith.truncf %33 : vector<2x256xf32> to vector<2x256xbf16>
    %c0_26 = arith.constant 0 : index
    %c0_27 = arith.constant 0 : index
    %38 = vector.load %arg3[%c0_26, %c0_27] : memref<256x256xbf16, #tpu.memory_space<vmem>>, vector<256x256xbf16>
    %cst_28 = arith.constant dense<0.000000e+00> : vector<2x256xf32>
    %39 = tpu.matmul %37, %38, %cst_28 {dimension_numbers = #tpu.dot_dimension_numbers<[1], [0], [0], [1], [0, 0, 1, 1], [], []>} : vector<2x256xbf16>, vector<256x256xbf16>, vector<2x256xf32> -> vector<2x256xf32>
    %40 = arith.addf %36, %39 : vector<2x256xf32>
    %41 = math.tanh %40 : vector<2x256xf32>
    %c0_29 = arith.constant 0 : index
    %c0_30 = arith.constant 0 : index
    %42 = vector.load %arg6[%c0_29, %c0_30] : memref<2x256xf32, #tpu.memory_space<vmem>>, vector<2x256xf32>
    tpu.vector_store %arg6[%c0_29, %c0_30], %41 {strides = array<i32>} : memref<2x256xf32, #tpu.memory_space<vmem>>, vector<2x256xf32>,
    %43 = arith.truncf %41 : vector<2x256xf32> to vector<2x256xbf16>
    %44 = arith.index_cast %c2_i32 : i32 to index
    %c0_31 = arith.constant 0 : index
    %c0_32 = arith.constant 0 : index
    %45 = vector.load %arg4[%44, %c0_31, %c0_32] : memref<35x2x256xbf16, #tpu.memory_space<vmem>>, vector<1x2x256xbf16>
    %46 = vector.shape_cast %45 : vector<1x2x256xbf16> to vector<2x256xbf16>
    %47 = vector.shape_cast %43 : vector<2x256xbf16> to vector<1x2x256xbf16>
    tpu.vector_store %arg4[%44, %c0_31, %c0_32], %47 {strides = array<i32>} : memref<35x2x256xbf16, #tpu.memory_space<vmem>>, vector<1x2x256xbf16>,
    %c3_i32 = arith.constant 3 : i32
    %c0_33 = arith.constant 0 : index
    %c0_34 = arith.constant 0 : index
    %48 = vector.load %arg6[%c0_33, %c0_34] : memref<2x256xf32, #tpu.memory_space<vmem>>, vector<2x256xf32>
    %49 = arith.index_cast %c3_i32 : i32 to index
    %c0_35 = arith.constant 0 : index
    %c0_36 = arith.constant 0 : index
    %50 = vector.load %arg1[%49, %c0_35, %c0_36] : memref<35x2x256xf32, #tpu.memory_space<vmem>>, vector<1x2x256xf32>
    %51 = vector.shape_cast %50 : vector<1x2x256xf32> to vector<2x256xf32>
    %52 = arith.truncf %48 : vector<2x256xf32> to vector<2x256xbf16>
    %c0_37 = arith.constant 0 : index
    %c0_38 = arith.constant 0 : index
    %53 = vector.load %arg3[%c0_37, %c0_38] : memref<256x256xbf16, #tpu.memory_space<vmem>>, vector<256x256xbf16>
    %cst_39 = arith.constant dense<0.000000e+00> : vector<2x256xf32>
    %54 = tpu.matmul %52, %53, %cst_39 {dimension_numbers = #tpu.dot_dimension_numbers<[1], [0], [0], [1], [0, 0, 1, 1], [], []>} : vector<2x256xbf16>, vector<256x256xbf16>, vector<2x256xf32> -> vector<2x256xf32>
    %55 = arith.addf %51, %54 : vector<2x256xf32>
    %56 = math.tanh %55 : vector<2x256xf32>
    %c0_40 = arith.constant 0 : index
    %c0_41 = arith.constant 0 : index
    %57 = vector.load %arg6[%c0_40, %c0_41] : memref<2x256xf32, #tpu.memory_space<vmem>>, vector<2x256xf32>
    tpu.vector_store %arg6[%c0_40, %c0_41], %56 {strides = array<i32>} : memref<2x256xf32, #tpu.memory_space<vmem>>, vector<2x256xf32>,
    %58 = arith.truncf %56 : vector<2x256xf32> to vector<2x256xbf16>
    %59 = arith.index_cast %c3_i32 : i32 to index
    %c0_42 = arith.constant 0 : index
    %c0_43 = arith.constant 0 : index
    %60 = vector.load %arg4[%59, %c0_42, %c0_43] : memref<35x2x256xbf16, #tpu.memory_space<vmem>>, vector<1x2x256xbf16>
    %61 = vector.shape_cast %60 : vector<1x2x256xbf16> to vector<2x256xbf16>
    %62 = vector.shape_cast %58 : vector<2x256xbf16> to vector<1x2x256xbf16>
    tpu.vector_store %arg4[%59, %c0_42, %c0_43], %62 {strides = array<i32>} : memref<35x2x256xbf16, #tpu.memory_space<vmem>>, vector<1x2x256xbf16>,
    %c4_i32 = arith.constant 4 : i32
    %c0_44 = arith.constant 0 : index
    %c0_45 = arith.constant 0 : index
    %63 = vector.load %arg6[%c0_44, %c0_45] : memref<2x256xf32, #tpu.memory_space<vmem>>, vector<2x256xf32>
    %64 = arith.index_cast %c4_i32 : i32 to index
    %c0_46 = arith.constant 0 : index
    %c0_47 = arith.constant 0 : index
    %65 = vector.load %arg1[%64, %c0_46, %c0_47] : memref<35x2x256xf32, #tpu.memory_space<vmem>>, vector<1x2x256xf32>
    %66 = vector.shape_cast %65 : vector<1x2x256xf32> to vector<2x256xf32>
    %67 = arith.truncf %63 : vector<2x256xf32> to vector<2x256xbf16>
    %c0_48 = arith.constant 0 : index
    %c0_49 = arith.constant 0 : index
    %68 = vector.load %arg3[%c0_48, %c0_49] : memref<256x256xbf16, #tpu.memory_space<vmem>>, vector<256x256xbf16>
    %cst_50 = arith.constant dense<0.000000e+00> : vector<2x256xf32>
    %69 = tpu.matmul %67, %68, %cst_50 {dimension_numbers = #tpu.dot_dimension_numbers<[1], [0], [0], [1], [0, 0, 1, 1], [], []>} : vector<2x256xbf16>, vector<256x256xbf16>, vector<2x256xf32> -> vector<2x256xf32>
    %70 = arith.addf %66, %69 : vector<2x256xf32>
    %71 = math.tanh %70 : vector<2x256xf32>
    %c0_51 = arith.constant 0 : index
    %c0_52 = arith.constant 0 : index
    %72 = vector.load %arg6[%c0_51, %c0_52] : memref<2x256xf32, #tpu.memory_space<vmem>>, vector<2x256xf32>
    tpu.vector_store %arg6[%c0_51, %c0_52], %71 {strides = array<i32>} : memref<2x256xf32, #tpu.memory_space<vmem>>, vector<2x256xf32>,
    %73 = arith.truncf %71 : vector<2x256xf32> to vector<2x256xbf16>
    %74 = arith.index_cast %c4_i32 : i32 to index
    %c0_53 = arith.constant 0 : index
    %c0_54 = arith.constant 0 : index
    %75 = vector.load %arg4[%74, %c0_53, %c0_54] : memref<35x2x256xbf16, #tpu.memory_space<vmem>>, vector<1x2x256xbf16>
    %76 = vector.shape_cast %75 : vector<1x2x256xbf16> to vector<2x256xbf16>
    %77 = vector.shape_cast %73 : vector<2x256xbf16> to vector<1x2x256xbf16>
    tpu.vector_store %arg4[%74, %c0_53, %c0_54], %77 {strides = array<i32>} : memref<35x2x256xbf16, #tpu.memory_space<vmem>>, vector<1x2x256xbf16>,
    %c5_i32 = arith.constant 5 : i32
    %c0_55 = arith.constant 0 : index
    %c0_56 = arith.constant 0 : index
    %78 = vector.load %arg6[%c0_55, %c0_56] : memref<2x256xf32, #tpu.memory_space<vmem>>, vector<2x256xf32>
    %79 = arith.index_cast %c5_i32 : i32 to index
    %c0_57 = arith.constant 0 : index
    %c0_58 = arith.constant 0 : index
    %80 = vector.load %arg1[%79, %c0_57, %c0_58] : memref<35x2x256xf32, #tpu.memory_space<vmem>>, vector<1x2x256xf32>
    %81 = vector.shape_cast %80 : vector<1x2x256xf32> to vector<2x256xf32>
    %82 = arith.truncf %78 : vector<2x256xf32> to vector<2x256xbf16>
    %c0_59 = arith.constant 0 : index
    %c0_60 = arith.constant 0 : index
    %83 = vector.load %arg3[%c0_59, %c0_60] : memref<256x256xbf16, #tpu.memory_space<vmem>>, vector<256x256xbf16>
    %cst_61 = arith.constant dense<0.000000e+00> : vector<2x256xf32>
    %84 = tpu.matmul %82, %83, %cst_61 {dimension_numbers = #tpu.dot_dimension_numbers<[1], [0], [0], [1], [0, 0, 1, 1], [], []>} : vector<2x256xbf16>, vector<256x256xbf16>, vector<2x256xf32> -> vector<2x256xf32>
    %85 = arith.addf %81, %84 : vector<2x256xf32>
    %86 = math.tanh %85 : vector<2x256xf32>
    %c0_62 = arith.constant 0 : index
    %c0_63 = arith.constant 0 : index
    %87 = vector.load %arg6[%c0_62, %c0_63] : memref<2x256xf32, #tpu.memory_space<vmem>>, vector<2x256xf32>
    tpu.vector_store %arg6[%c0_62, %c0_63], %86 {strides = array<i32>} : memref<2x256xf32, #tpu.memory_space<vmem>>, vector<2x256xf32>,
    %88 = arith.truncf %86 : vector<2x256xf32> to vector<2x256xbf16>
    %89 = arith.index_cast %c5_i32 : i32 to index
    %c0_64 = arith.constant 0 : index
    %c0_65 = arith.constant 0 : index
    %90 = vector.load %arg4[%89, %c0_64, %c0_65] : memref<35x2x256xbf16, #tpu.memory_space<vmem>>, vector<1x2x256xbf16>
    %91 = vector.shape_cast %90 : vector<1x2x256xbf16> to vector<2x256xbf16>
    %92 = vector.shape_cast %88 : vector<2x256xbf16> to vector<1x2x256xbf16>
    tpu.vector_store %arg4[%89, %c0_64, %c0_65], %92 {strides = array<i32>} : memref<35x2x256xbf16, #tpu.memory_space<vmem>>, vector<1x2x256xbf16>,
    %c6_i32 = arith.constant 6 : i32
    %c0_66 = arith.constant 0 : index
    %c0_67 = arith.constant 0 : index
    %93 = vector.load %arg6[%c0_66, %c0_67] : memref<2x256xf32, #tpu.memory_space<vmem>>, vector<2x256xf32>
    %94 = arith.index_cast %c6_i32 : i32 to index
    %c0_68 = arith.constant 0 : index
    %c0_69 = arith.constant 0 : index
    %95 = vector.load %arg1[%94, %c0_68, %c0_69] : memref<35x2x256xf32, #tpu.memory_space<vmem>>, vector<1x2x256xf32>
    %96 = vector.shape_cast %95 : vector<1x2x256xf32> to vector<2x256xf32>
    %97 = arith.truncf %93 : vector<2x256xf32> to vector<2x256xbf16>
    %c0_70 = arith.constant 0 : index
    %c0_71 = arith.constant 0 : index
    %98 = vector.load %arg3[%c0_70, %c0_71] : memref<256x256xbf16, #tpu.memory_space<vmem>>, vector<256x256xbf16>
    %cst_72 = arith.constant dense<0.000000e+00> : vector<2x256xf32>
    %99 = tpu.matmul %97, %98, %cst_72 {dimension_numbers = #tpu.dot_dimension_numbers<[1], [0], [0], [1], [0, 0, 1, 1], [], []>} : vector<2x256xbf16>, vector<256x256xbf16>, vector<2x256xf32> -> vector<2x256xf32>
    %100 = arith.addf %96, %99 : vector<2x256xf32>
    %101 = math.tanh %100 : vector<2x256xf32>
    %c0_73 = arith.constant 0 : index
    %c0_74 = arith.constant 0 : index
    %102 = vector.load %arg6[%c0_73, %c0_74] : memref<2x256xf32, #tpu.memory_space<vmem>>, vector<2x256xf32>
    tpu.vector_store %arg6[%c0_73, %c0_74], %101 {strides = array<i32>} : memref<2x256xf32, #tpu.memory_space<vmem>>, vector<2x256xf32>,
    %103 = arith.truncf %101 : vector<2x256xf32> to vector<2x256xbf16>
    %104 = arith.index_cast %c6_i32 : i32 to index
    %c0_75 = arith.constant 0 : index
    %c0_76 = arith.constant 0 : index
    %105 = vector.load %arg4[%104, %c0_75, %c0_76] : memref<35x2x256xbf16, #tpu.memory_space<vmem>>, vector<1x2x256xbf16>
    %106 = vector.shape_cast %105 : vector<1x2x256xbf16> to vector<2x256xbf16>
    %107 = vector.shape_cast %103 : vector<2x256xbf16> to vector<1x2x256xbf16>
    tpu.vector_store %arg4[%104, %c0_75, %c0_76], %107 {strides = array<i32>} : memref<35x2x256xbf16, #tpu.memory_space<vmem>>, vector<1x2x256xbf16>,
    %c7_i32 = arith.constant 7 : i32
    %c0_77 = arith.constant 0 : index
    %c0_78 = arith.constant 0 : index
    %108 = vector.load %arg6[%c0_77, %c0_78] : memref<2x256xf32, #tpu.memory_space<vmem>>, vector<2x256xf32>
    %109 = arith.index_cast %c7_i32 : i32 to index
    %c0_79 = arith.constant 0 : index
    %c0_80 = arith.constant 0 : index
    %110 = vector.load %arg1[%109, %c0_79, %c0_80] : memref<35x2x256xf32, #tpu.memory_space<vmem>>, vector<1x2x256xf32>
    %111 = vector.shape_cast %110 : vector<1x2x256xf32> to vector<2x256xf32>
    %112 = arith.truncf %108 : vector<2x256xf32> to vector<2x256xbf16>
    %c0_81 = arith.constant 0 : index
    %c0_82 = arith.constant 0 : index
    %113 = vector.load %arg3[%c0_81, %c0_82] : memref<256x256xbf16, #tpu.memory_space<vmem>>, vector<256x256xbf16>
    %cst_83 = arith.constant dense<0.000000e+00> : vector<2x256xf32>
    %114 = tpu.matmul %112, %113, %cst_83 {dimension_numbers = #tpu.dot_dimension_numbers<[1], [0], [0], [1], [0, 0, 1, 1], [], []>} : vector<2x256xbf16>, vector<256x256xbf16>, vector<2x256xf32> -> vector<2x256xf32>
    %115 = arith.addf %111, %114 : vector<2x256xf32>
    %116 = math.tanh %115 : vector<2x256xf32>
    %c0_84 = arith.constant 0 : index
    %c0_85 = arith.constant 0 : index
    %117 = vector.load %arg6[%c0_84, %c0_85] : memref<2x256xf32, #tpu.memory_space<vmem>>, vector<2x256xf32>
    tpu.vector_store %arg6[%c0_84, %c0_85], %116 {strides = array<i32>} : memref<2x256xf32, #tpu.memory_space<vmem>>, vector<2x256xf32>,
    %118 = arith.truncf %116 : vector<2x256xf32> to vector<2x256xbf16>
    %119 = arith.index_cast %c7_i32 : i32 to index
    %c0_86 = arith.constant 0 : index
    %c0_87 = arith.constant 0 : index
    %120 = vector.load %arg4[%119, %c0_86, %c0_87] : memref<35x2x256xbf16, #tpu.memory_space<vmem>>, vector<1x2x256xbf16>
    %121 = vector.shape_cast %120 : vector<1x2x256xbf16> to vector<2x256xbf16>
    %122 = vector.shape_cast %118 : vector<2x256xbf16> to vector<1x2x256xbf16>
    tpu.vector_store %arg4[%119, %c0_86, %c0_87], %122 {strides = array<i32>} : memref<35x2x256xbf16, #tpu.memory_space<vmem>>, vector<1x2x256xbf16>,
    %c8_i32 = arith.constant 8 : i32
    %c0_88 = arith.constant 0 : index
    %c0_89 = arith.constant 0 : index
    %123 = vector.load %arg6[%c0_88, %c0_89] : memref<2x256xf32, #tpu.memory_space<vmem>>, vector<2x256xf32>
    %124 = arith.index_cast %c8_i32 : i32 to index
    %c0_90 = arith.constant 0 : index
    %c0_91 = arith.constant 0 : index
    %125 = vector.load %arg1[%124, %c0_90, %c0_91] : memref<35x2x256xf32, #tpu.memory_space<vmem>>, vector<1x2x256xf32>
    %126 = vector.shape_cast %125 : vector<1x2x256xf32> to vector<2x256xf32>
    %127 = arith.truncf %123 : vector<2x256xf32> to vector<2x256xbf16>
    %c0_92 = arith.constant 0 : index
    %c0_93 = arith.constant 0 : index
    %128 = vector.load %arg3[%c0_92, %c0_93] : memref<256x256xbf16, #tpu.memory_space<vmem>>, vector<256x256xbf16>
    %cst_94 = arith.constant dense<0.000000e+00> : vector<2x256xf32>
    %129 = tpu.matmul %127, %128, %cst_94 {dimension_numbers = #tpu.dot_dimension_numbers<[1], [0], [0], [1], [0, 0, 1, 1], [], []>} : vector<2x256xbf16>, vector<256x256xbf16>, vector<2x256xf32> -> vector<2x256xf32>
    %130 = arith.addf %126, %129 : vector<2x256xf32>
    %131 = math.tanh %130 : vector<2x256xf32>
    %c0_95 = arith.constant 0 : index
    %c0_96 = arith.constant 0 : index
    %132 = vector.load %arg6[%c0_95, %c0_96] : memref<2x256xf32, #tpu.memory_space<vmem>>, vector<2x256xf32>
    tpu.vector_store %arg6[%c0_95, %c0_96], %131 {strides = array<i32>} : memref<2x256xf32, #tpu.memory_space<vmem>>, vector<2x256xf32>,
    %133 = arith.truncf %131 : vector<2x256xf32> to vector<2x256xbf16>
    %134 = arith.index_cast %c8_i32 : i32 to index
    %c0_97 = arith.constant 0 : index
    %c0_98 = arith.constant 0 : index
    %135 = vector.load %arg4[%134, %c0_97, %c0_98] : memref<35x2x256xbf16, #tpu.memory_space<vmem>>, vector<1x2x256xbf16>
    %136 = vector.shape_cast %135 : vector<1x2x256xbf16> to vector<2x256xbf16>
    %137 = vector.shape_cast %133 : vector<2x256xbf16> to vector<1x2x256xbf16>
    tpu.vector_store %arg4[%134, %c0_97, %c0_98], %137 {strides = array<i32>} : memref<35x2x256xbf16, #tpu.memory_space<vmem>>, vector<1x2x256xbf16>,
    %c9_i32 = arith.constant 9 : i32
    %c0_99 = arith.constant 0 : index
    %c0_100 = arith.constant 0 : index
    %138 = vector.load %arg6[%c0_99, %c0_100] : memref<2x256xf32, #tpu.memory_space<vmem>>, vector<2x256xf32>
    %139 = arith.index_cast %c9_i32 : i32 to index
    %c0_101 = arith.constant 0 : index
    %c0_102 = arith.constant 0 : index
    %140 = vector.load %arg1[%139, %c0_101, %c0_102] : memref<35x2x256xf32, #tpu.memory_space<vmem>>, vector<1x2x256xf32>
    %141 = vector.shape_cast %140 : vector<1x2x256xf32> to vector<2x256xf32>
    %142 = arith.truncf %138 : vector<2x256xf32> to vector<2x256xbf16>
    %c0_103 = arith.constant 0 : index
    %c0_104 = arith.constant 0 : index
    %143 = vector.load %arg3[%c0_103, %c0_104] : memref<256x256xbf16, #tpu.memory_space<vmem>>, vector<256x256xbf16>
    %cst_105 = arith.constant dense<0.000000e+00> : vector<2x256xf32>
    %144 = tpu.matmul %142, %143, %cst_105 {dimension_numbers = #tpu.dot_dimension_numbers<[1], [0], [0], [1], [0, 0, 1, 1], [], []>} : vector<2x256xbf16>, vector<256x256xbf16>, vector<2x256xf32> -> vector<2x256xf32>
    %145 = arith.addf %141, %144 : vector<2x256xf32>
    %146 = math.tanh %145 : vector<2x256xf32>
    %c0_106 = arith.constant 0 : index
    %c0_107 = arith.constant 0 : index
    %147 = vector.load %arg6[%c0_106, %c0_107] : memref<2x256xf32, #tpu.memory_space<vmem>>, vector<2x256xf32>
    tpu.vector_store %arg6[%c0_106, %c0_107], %146 {strides = array<i32>} : memref<2x256xf32, #tpu.memory_space<vmem>>, vector<2x256xf32>,
    %148 = arith.truncf %146 : vector<2x256xf32> to vector<2x256xbf16>
    %149 = arith.index_cast %c9_i32 : i32 to index
    %c0_108 = arith.constant 0 : index
    %c0_109 = arith.constant 0 : index
    %150 = vector.load %arg4[%149, %c0_108, %c0_109] : memref<35x2x256xbf16, #tpu.memory_space<vmem>>, vector<1x2x256xbf16>
    %151 = vector.shape_cast %150 : vector<1x2x256xbf16> to vector<2x256xbf16>
    %152 = vector.shape_cast %148 : vector<2x256xbf16> to vector<1x2x256xbf16>
    tpu.vector_store %arg4[%149, %c0_108, %c0_109], %152 {strides = array<i32>} : memref<35x2x256xbf16, #tpu.memory_space<vmem>>, vector<1x2x256xbf16>,
    %c10_i32 = arith.constant 10 : i32
    %c0_110 = arith.constant 0 : index
    %c0_111 = arith.constant 0 : index
    %153 = vector.load %arg6[%c0_110, %c0_111] : memref<2x256xf32, #tpu.memory_space<vmem>>, vector<2x256xf32>
    %154 = arith.index_cast %c10_i32 : i32 to index
    %c0_112 = arith.constant 0 : index
    %c0_113 = arith.constant 0 : index
    %155 = vector.load %arg1[%154, %c0_112, %c0_113] : memref<35x2x256xf32, #tpu.memory_space<vmem>>, vector<1x2x256xf32>
    %156 = vector.shape_cast %155 : vector<1x2x256xf32> to vector<2x256xf32>
    %157 = arith.truncf %153 : vector<2x256xf32> to vector<2x256xbf16>
    %c0_114 = arith.constant 0 : index
    %c0_115 = arith.constant 0 : index
    %158 = vector.load %arg3[%c0_114, %c0_115] : memref<256x256xbf16, #tpu.memory_space<vmem>>, vector<256x256xbf16>
    %cst_116 = arith.constant dense<0.000000e+00> : vector<2x256xf32>
    %159 = tpu.matmul %157, %158, %cst_116 {dimension_numbers = #tpu.dot_dimension_numbers<[1], [0], [0], [1], [0, 0, 1, 1], [], []>} : vector<2x256xbf16>, vector<256x256xbf16>, vector<2x256xf32> -> vector<2x256xf32>
    %160 = arith.addf %156, %159 : vector<2x256xf32>
    %161 = math.tanh %160 : vector<2x256xf32>
    %c0_117 = arith.constant 0 : index
    %c0_118 = arith.constant 0 : index
    %162 = vector.load %arg6[%c0_117, %c0_118] : memref<2x256xf32, #tpu.memory_space<vmem>>, vector<2x256xf32>
    tpu.vector_store %arg6[%c0_117, %c0_118], %161 {strides = array<i32>} : memref<2x256xf32, #tpu.memory_space<vmem>>, vector<2x256xf32>,
    %163 = arith.truncf %161 : vector<2x256xf32> to vector<2x256xbf16>
    %164 = arith.index_cast %c10_i32 : i32 to index
    %c0_119 = arith.constant 0 : index
    %c0_120 = arith.constant 0 : index
    %165 = vector.load %arg4[%164, %c0_119, %c0_120] : memref<35x2x256xbf16, #tpu.memory_space<vmem>>, vector<1x2x256xbf16>
    %166 = vector.shape_cast %165 : vector<1x2x256xbf16> to vector<2x256xbf16>
    %167 = vector.shape_cast %163 : vector<2x256xbf16> to vector<1x2x256xbf16>
    tpu.vector_store %arg4[%164, %c0_119, %c0_120], %167 {strides = array<i32>} : memref<35x2x256xbf16, #tpu.memory_space<vmem>>, vector<1x2x256xbf16>,
    %c11_i32 = arith.constant 11 : i32
    %c0_121 = arith.constant 0 : index
    %c0_122 = arith.constant 0 : index
    %168 = vector.load %arg6[%c0_121, %c0_122] : memref<2x256xf32, #tpu.memory_space<vmem>>, vector<2x256xf32>
    %169 = arith.index_cast %c11_i32 : i32 to index
    %c0_123 = arith.constant 0 : index
    %c0_124 = arith.constant 0 : index
    %170 = vector.load %arg1[%169, %c0_123, %c0_124] : memref<35x2x256xf32, #tpu.memory_space<vmem>>, vector<1x2x256xf32>
    %171 = vector.shape_cast %170 : vector<1x2x256xf32> to vector<2x256xf32>
    %172 = arith.truncf %168 : vector<2x256xf32> to vector<2x256xbf16>
    %c0_125 = arith.constant 0 : index
    %c0_126 = arith.constant 0 : index
    %173 = vector.load %arg3[%c0_125, %c0_126] : memref<256x256xbf16, #tpu.memory_space<vmem>>, vector<256x256xbf16>
    %cst_127 = arith.constant dense<0.000000e+00> : vector<2x256xf32>
    %174 = tpu.matmul %172, %173, %cst_127 {dimension_numbers = #tpu.dot_dimension_numbers<[1], [0], [0], [1], [0, 0, 1, 1], [], []>} : vector<2x256xbf16>, vector<256x256xbf16>, vector<2x256xf32> -> vector<2x256xf32>
    %175 = arith.addf %171, %174 : vector<2x256xf32>
    %176 = math.tanh %175 : vector<2x256xf32>
    %c0_128 = arith.constant 0 : index
    %c0_129 = arith.constant 0 : index
    %177 = vector.load %arg6[%c0_128, %c0_129] : memref<2x256xf32, #tpu.memory_space<vmem>>, vector<2x256xf32>
    tpu.vector_store %arg6[%c0_128, %c0_129], %176 {strides = array<i32>} : memref<2x256xf32, #tpu.memory_space<vmem>>, vector<2x256xf32>,
    %178 = arith.truncf %176 : vector<2x256xf32> to vector<2x256xbf16>
    %179 = arith.index_cast %c11_i32 : i32 to index
    %c0_130 = arith.constant 0 : index
    %c0_131 = arith.constant 0 : index
    %180 = vector.load %arg4[%179, %c0_130, %c0_131] : memref<35x2x256xbf16, #tpu.memory_space<vmem>>, vector<1x2x256xbf16>
    %181 = vector.shape_cast %180 : vector<1x2x256xbf16> to vector<2x256xbf16>
    %182 = vector.shape_cast %178 : vector<2x256xbf16> to vector<1x2x256xbf16>
    tpu.vector_store %arg4[%179, %c0_130, %c0_131], %182 {strides = array<i32>} : memref<35x2x256xbf16, #tpu.memory_space<vmem>>, vector<1x2x256xbf16>,
    %c12_i32 = arith.constant 12 : i32
    %c0_132 = arith.constant 0 : index
    %c0_133 = arith.constant 0 : index
    %183 = vector.load %arg6[%c0_132, %c0_133] : memref<2x256xf32, #tpu.memory_space<vmem>>, vector<2x256xf32>
    %184 = arith.index_cast %c12_i32 : i32 to index
    %c0_134 = arith.constant 0 : index
    %c0_135 = arith.constant 0 : index
    %185 = vector.load %arg1[%184, %c0_134, %c0_135] : memref<35x2x256xf32, #tpu.memory_space<vmem>>, vector<1x2x256xf32>
    %186 = vector.shape_cast %185 : vector<1x2x256xf32> to vector<2x256xf32>
    %187 = arith.truncf %183 : vector<2x256xf32> to vector<2x256xbf16>
    %c0_136 = arith.constant 0 : index
    %c0_137 = arith.constant 0 : index
    %188 = vector.load %arg3[%c0_136, %c0_137] : memref<256x256xbf16, #tpu.memory_space<vmem>>, vector<256x256xbf16>
    %cst_138 = arith.constant dense<0.000000e+00> : vector<2x256xf32>
    %189 = tpu.matmul %187, %188, %cst_138 {dimension_numbers = #tpu.dot_dimension_numbers<[1], [0], [0], [1], [0, 0, 1, 1], [], []>} : vector<2x256xbf16>, vector<256x256xbf16>, vector<2x256xf32> -> vector<2x256xf32>
    %190 = arith.addf %186, %189 : vector<2x256xf32>
    %191 = math.tanh %190 : vector<2x256xf32>
    %c0_139 = arith.constant 0 : index
    %c0_140 = arith.constant 0 : index
    %192 = vector.load %arg6[%c0_139, %c0_140] : memref<2x256xf32, #tpu.memory_space<vmem>>, vector<2x256xf32>
    tpu.vector_store %arg6[%c0_139, %c0_140], %191 {strides = array<i32>} : memref<2x256xf32, #tpu.memory_space<vmem>>, vector<2x256xf32>,
    %193 = arith.truncf %191 : vector<2x256xf32> to vector<2x256xbf16>
    %194 = arith.index_cast %c12_i32 : i32 to index
    %c0_141 = arith.constant 0 : index
    %c0_142 = arith.constant 0 : index
    %195 = vector.load %arg4[%194, %c0_141, %c0_142] : memref<35x2x256xbf16, #tpu.memory_space<vmem>>, vector<1x2x256xbf16>
    %196 = vector.shape_cast %195 : vector<1x2x256xbf16> to vector<2x256xbf16>
    %197 = vector.shape_cast %193 : vector<2x256xbf16> to vector<1x2x256xbf16>
    tpu.vector_store %arg4[%194, %c0_141, %c0_142], %197 {strides = array<i32>} : memref<35x2x256xbf16, #tpu.memory_space<vmem>>, vector<1x2x256xbf16>,
    %c13_i32 = arith.constant 13 : i32
    %c0_143 = arith.constant 0 : index
    %c0_144 = arith.constant 0 : index
    %198 = vector.load %arg6[%c0_143, %c0_144] : memref<2x256xf32, #tpu.memory_space<vmem>>, vector<2x256xf32>
    %199 = arith.index_cast %c13_i32 : i32 to index
    %c0_145 = arith.constant 0 : index
    %c0_146 = arith.constant 0 : index
    %200 = vector.load %arg1[%199, %c0_145, %c0_146] : memref<35x2x256xf32, #tpu.memory_space<vmem>>, vector<1x2x256xf32>
    %201 = vector.shape_cast %200 : vector<1x2x256xf32> to vector<2x256xf32>
    %202 = arith.truncf %198 : vector<2x256xf32> to vector<2x256xbf16>
    %c0_147 = arith.constant 0 : index
    %c0_148 = arith.constant 0 : index
    %203 = vector.load %arg3[%c0_147, %c0_148] : memref<256x256xbf16, #tpu.memory_space<vmem>>, vector<256x256xbf16>
    %cst_149 = arith.constant dense<0.000000e+00> : vector<2x256xf32>
    %204 = tpu.matmul %202, %203, %cst_149 {dimension_numbers = #tpu.dot_dimension_numbers<[1], [0], [0], [1], [0, 0, 1, 1], [], []>} : vector<2x256xbf16>, vector<256x256xbf16>, vector<2x256xf32> -> vector<2x256xf32>
    %205 = arith.addf %201, %204 : vector<2x256xf32>
    %206 = math.tanh %205 : vector<2x256xf32>
    %c0_150 = arith.constant 0 : index
    %c0_151 = arith.constant 0 : index
    %207 = vector.load %arg6[%c0_150, %c0_151] : memref<2x256xf32, #tpu.memory_space<vmem>>, vector<2x256xf32>
    tpu.vector_store %arg6[%c0_150, %c0_151], %206 {strides = array<i32>} : memref<2x256xf32, #tpu.memory_space<vmem>>, vector<2x256xf32>,
    %208 = arith.truncf %206 : vector<2x256xf32> to vector<2x256xbf16>
    %209 = arith.index_cast %c13_i32 : i32 to index
    %c0_152 = arith.constant 0 : index
    %c0_153 = arith.constant 0 : index
    %210 = vector.load %arg4[%209, %c0_152, %c0_153] : memref<35x2x256xbf16, #tpu.memory_space<vmem>>, vector<1x2x256xbf16>
    %211 = vector.shape_cast %210 : vector<1x2x256xbf16> to vector<2x256xbf16>
    %212 = vector.shape_cast %208 : vector<2x256xbf16> to vector<1x2x256xbf16>
    tpu.vector_store %arg4[%209, %c0_152, %c0_153], %212 {strides = array<i32>} : memref<35x2x256xbf16, #tpu.memory_space<vmem>>, vector<1x2x256xbf16>,
    %c14_i32 = arith.constant 14 : i32
    %c0_154 = arith.constant 0 : index
    %c0_155 = arith.constant 0 : index
    %213 = vector.load %arg6[%c0_154, %c0_155] : memref<2x256xf32, #tpu.memory_space<vmem>>, vector<2x256xf32>
    %214 = arith.index_cast %c14_i32 : i32 to index
    %c0_156 = arith.constant 0 : index
    %c0_157 = arith.constant 0 : index
    %215 = vector.load %arg1[%214, %c0_156, %c0_157] : memref<35x2x256xf32, #tpu.memory_space<vmem>>, vector<1x2x256xf32>
    %216 = vector.shape_cast %215 : vector<1x2x256xf32> to vector<2x256xf32>
    %217 = arith.truncf %213 : vector<2x256xf32> to vector<2x256xbf16>
    %c0_158 = arith.constant 0 : index
    %c0_159 = arith.constant 0 : index
    %218 = vector.load %arg3[%c0_158, %c0_159] : memref<256x256xbf16, #tpu.memory_space<vmem>>, vector<256x256xbf16>
    %cst_160 = arith.constant dense<0.000000e+00> : vector<2x256xf32>
    %219 = tpu.matmul %217, %218, %cst_160 {dimension_numbers = #tpu.dot_dimension_numbers<[1], [0], [0], [1], [0, 0, 1, 1], [], []>} : vector<2x256xbf16>, vector<256x256xbf16>, vector<2x256xf32> -> vector<2x256xf32>
    %220 = arith.addf %216, %219 : vector<2x256xf32>
    %221 = math.tanh %220 : vector<2x256xf32>
    %c0_161 = arith.constant 0 : index
    %c0_162 = arith.constant 0 : index
    %222 = vector.load %arg6[%c0_161, %c0_162] : memref<2x256xf32, #tpu.memory_space<vmem>>, vector<2x256xf32>
    tpu.vector_store %arg6[%c0_161, %c0_162], %221 {strides = array<i32>} : memref<2x256xf32, #tpu.memory_space<vmem>>, vector<2x256xf32>,
    %223 = arith.truncf %221 : vector<2x256xf32> to vector<2x256xbf16>
    %224 = arith.index_cast %c14_i32 : i32 to index
    %c0_163 = arith.constant 0 : index
    %c0_164 = arith.constant 0 : index
    %225 = vector.load %arg4[%224, %c0_163, %c0_164] : memref<35x2x256xbf16, #tpu.memory_space<vmem>>, vector<1x2x256xbf16>
    %226 = vector.shape_cast %225 : vector<1x2x256xbf16> to vector<2x256xbf16>
    %227 = vector.shape_cast %223 : vector<2x256xbf16> to vector<1x2x256xbf16>
    tpu.vector_store %arg4[%224, %c0_163, %c0_164], %227 {strides = array<i32>} : memref<35x2x256xbf16, #tpu.memory_space<vmem>>, vector<1x2x256xbf16>,
    %c15_i32 = arith.constant 15 : i32
    %c0_165 = arith.constant 0 : index
    %c0_166 = arith.constant 0 : index
    %228 = vector.load %arg6[%c0_165, %c0_166] : memref<2x256xf32, #tpu.memory_space<vmem>>, vector<2x256xf32>
    %229 = arith.index_cast %c15_i32 : i32 to index
    %c0_167 = arith.constant 0 : index
    %c0_168 = arith.constant 0 : index
    %230 = vector.load %arg1[%229, %c0_167, %c0_168] : memref<35x2x256xf32, #tpu.memory_space<vmem>>, vector<1x2x256xf32>
    %231 = vector.shape_cast %230 : vector<1x2x256xf32> to vector<2x256xf32>
    %232 = arith.truncf %228 : vector<2x256xf32> to vector<2x256xbf16>
    %c0_169 = arith.constant 0 : index
    %c0_170 = arith.constant 0 : index
    %233 = vector.load %arg3[%c0_169, %c0_170] : memref<256x256xbf16, #tpu.memory_space<vmem>>, vector<256x256xbf16>
    %cst_171 = arith.constant dense<0.000000e+00> : vector<2x256xf32>
    %234 = tpu.matmul %232, %233, %cst_171 {dimension_numbers = #tpu.dot_dimension_numbers<[1], [0], [0], [1], [0, 0, 1, 1], [], []>} : vector<2x256xbf16>, vector<256x256xbf16>, vector<2x256xf32> -> vector<2x256xf32>
    %235 = arith.addf %231, %234 : vector<2x256xf32>
    %236 = math.tanh %235 : vector<2x256xf32>
    %c0_172 = arith.constant 0 : index
    %c0_173 = arith.constant 0 : index
    %237 = vector.load %arg6[%c0_172, %c0_173] : memref<2x256xf32, #tpu.memory_space<vmem>>, vector<2x256xf32>
    tpu.vector_store %arg6[%c0_172, %c0_173], %236 {strides = array<i32>} : memref<2x256xf32, #tpu.memory_space<vmem>>, vector<2x256xf32>,
    %238 = arith.truncf %236 : vector<2x256xf32> to vector<2x256xbf16>
    %239 = arith.index_cast %c15_i32 : i32 to index
    %c0_174 = arith.constant 0 : index
    %c0_175 = arith.constant 0 : index
    %240 = vector.load %arg4[%239, %c0_174, %c0_175] : memref<35x2x256xbf16, #tpu.memory_space<vmem>>, vector<1x2x256xbf16>
    %241 = vector.shape_cast %240 : vector<1x2x256xbf16> to vector<2x256xbf16>
    %242 = vector.shape_cast %238 : vector<2x256xbf16> to vector<1x2x256xbf16>
    tpu.vector_store %arg4[%239, %c0_174, %c0_175], %242 {strides = array<i32>} : memref<35x2x256xbf16, #tpu.memory_space<vmem>>, vector<1x2x256xbf16>,
    %c16_i32 = arith.constant 16 : i32
    %c0_176 = arith.constant 0 : index
    %c0_177 = arith.constant 0 : index
    %243 = vector.load %arg6[%c0_176, %c0_177] : memref<2x256xf32, #tpu.memory_space<vmem>>, vector<2x256xf32>
    %244 = arith.index_cast %c16_i32 : i32 to index
    %c0_178 = arith.constant 0 : index
    %c0_179 = arith.constant 0 : index
    %245 = vector.load %arg1[%244, %c0_178, %c0_179] : memref<35x2x256xf32, #tpu.memory_space<vmem>>, vector<1x2x256xf32>
    %246 = vector.shape_cast %245 : vector<1x2x256xf32> to vector<2x256xf32>
    %247 = arith.truncf %243 : vector<2x256xf32> to vector<2x256xbf16>
    %c0_180 = arith.constant 0 : index
    %c0_181 = arith.constant 0 : index
    %248 = vector.load %arg3[%c0_180, %c0_181] : memref<256x256xbf16, #tpu.memory_space<vmem>>, vector<256x256xbf16>
    %cst_182 = arith.constant dense<0.000000e+00> : vector<2x256xf32>
    %249 = tpu.matmul %247, %248, %cst_182 {dimension_numbers = #tpu.dot_dimension_numbers<[1], [0], [0], [1], [0, 0, 1, 1], [], []>} : vector<2x256xbf16>, vector<256x256xbf16>, vector<2x256xf32> -> vector<2x256xf32>
    %250 = arith.addf %246, %249 : vector<2x256xf32>
    %251 = math.tanh %250 : vector<2x256xf32>
    %c0_183 = arith.constant 0 : index
    %c0_184 = arith.constant 0 : index
    %252 = vector.load %arg6[%c0_183, %c0_184] : memref<2x256xf32, #tpu.memory_space<vmem>>, vector<2x256xf32>
    tpu.vector_store %arg6[%c0_183, %c0_184], %251 {strides = array<i32>} : memref<2x256xf32, #tpu.memory_space<vmem>>, vector<2x256xf32>,
    %253 = arith.truncf %251 : vector<2x256xf32> to vector<2x256xbf16>
    %254 = arith.index_cast %c16_i32 : i32 to index
    %c0_185 = arith.constant 0 : index
    %c0_186 = arith.constant 0 : index
    %255 = vector.load %arg4[%254, %c0_185, %c0_186] : memref<35x2x256xbf16, #tpu.memory_space<vmem>>, vector<1x2x256xbf16>
    %256 = vector.shape_cast %255 : vector<1x2x256xbf16> to vector<2x256xbf16>
    %257 = vector.shape_cast %253 : vector<2x256xbf16> to vector<1x2x256xbf16>
    tpu.vector_store %arg4[%254, %c0_185, %c0_186], %257 {strides = array<i32>} : memref<35x2x256xbf16, #tpu.memory_space<vmem>>, vector<1x2x256xbf16>,
    %c17_i32 = arith.constant 17 : i32
    %c0_187 = arith.constant 0 : index
    %c0_188 = arith.constant 0 : index
    %258 = vector.load %arg6[%c0_187, %c0_188] : memref<2x256xf32, #tpu.memory_space<vmem>>, vector<2x256xf32>
    %259 = arith.index_cast %c17_i32 : i32 to index
    %c0_189 = arith.constant 0 : index
    %c0_190 = arith.constant 0 : index
    %260 = vector.load %arg1[%259, %c0_189, %c0_190] : memref<35x2x256xf32, #tpu.memory_space<vmem>>, vector<1x2x256xf32>
    %261 = vector.shape_cast %260 : vector<1x2x256xf32> to vector<2x256xf32>
    %262 = arith.truncf %258 : vector<2x256xf32> to vector<2x256xbf16>
    %c0_191 = arith.constant 0 : index
    %c0_192 = arith.constant 0 : index
    %263 = vector.load %arg3[%c0_191, %c0_192] : memref<256x256xbf16, #tpu.memory_space<vmem>>, vector<256x256xbf16>
    %cst_193 = arith.constant dense<0.000000e+00> : vector<2x256xf32>
    %264 = tpu.matmul %262, %263, %cst_193 {dimension_numbers = #tpu.dot_dimension_numbers<[1], [0], [0], [1], [0, 0, 1, 1], [], []>} : vector<2x256xbf16>, vector<256x256xbf16>, vector<2x256xf32> -> vector<2x256xf32>
    %265 = arith.addf %261, %264 : vector<2x256xf32>
    %266 = math.tanh %265 : vector<2x256xf32>
    %c0_194 = arith.constant 0 : index
    %c0_195 = arith.constant 0 : index
    %267 = vector.load %arg6[%c0_194, %c0_195] : memref<2x256xf32, #tpu.memory_space<vmem>>, vector<2x256xf32>
    tpu.vector_store %arg6[%c0_194, %c0_195], %266 {strides = array<i32>} : memref<2x256xf32, #tpu.memory_space<vmem>>, vector<2x256xf32>,
    %268 = arith.truncf %266 : vector<2x256xf32> to vector<2x256xbf16>
    %269 = arith.index_cast %c17_i32 : i32 to index
    %c0_196 = arith.constant 0 : index
    %c0_197 = arith.constant 0 : index
    %270 = vector.load %arg4[%269, %c0_196, %c0_197] : memref<35x2x256xbf16, #tpu.memory_space<vmem>>, vector<1x2x256xbf16>
    %271 = vector.shape_cast %270 : vector<1x2x256xbf16> to vector<2x256xbf16>
    %272 = vector.shape_cast %268 : vector<2x256xbf16> to vector<1x2x256xbf16>
    tpu.vector_store %arg4[%269, %c0_196, %c0_197], %272 {strides = array<i32>} : memref<35x2x256xbf16, #tpu.memory_space<vmem>>, vector<1x2x256xbf16>,
    %c18_i32 = arith.constant 18 : i32
    %c0_198 = arith.constant 0 : index
    %c0_199 = arith.constant 0 : index
    %273 = vector.load %arg6[%c0_198, %c0_199] : memref<2x256xf32, #tpu.memory_space<vmem>>, vector<2x256xf32>
    %274 = arith.index_cast %c18_i32 : i32 to index
    %c0_200 = arith.constant 0 : index
    %c0_201 = arith.constant 0 : index
    %275 = vector.load %arg1[%274, %c0_200, %c0_201] : memref<35x2x256xf32, #tpu.memory_space<vmem>>, vector<1x2x256xf32>
    %276 = vector.shape_cast %275 : vector<1x2x256xf32> to vector<2x256xf32>
    %277 = arith.truncf %273 : vector<2x256xf32> to vector<2x256xbf16>
    %c0_202 = arith.constant 0 : index
    %c0_203 = arith.constant 0 : index
    %278 = vector.load %arg3[%c0_202, %c0_203] : memref<256x256xbf16, #tpu.memory_space<vmem>>, vector<256x256xbf16>
    %cst_204 = arith.constant dense<0.000000e+00> : vector<2x256xf32>
    %279 = tpu.matmul %277, %278, %cst_204 {dimension_numbers = #tpu.dot_dimension_numbers<[1], [0], [0], [1], [0, 0, 1, 1], [], []>} : vector<2x256xbf16>, vector<256x256xbf16>, vector<2x256xf32> -> vector<2x256xf32>
    %280 = arith.addf %276, %279 : vector<2x256xf32>
    %281 = math.tanh %280 : vector<2x256xf32>
    %c0_205 = arith.constant 0 : index
    %c0_206 = arith.constant 0 : index
    %282 = vector.load %arg6[%c0_205, %c0_206] : memref<2x256xf32, #tpu.memory_space<vmem>>, vector<2x256xf32>
    tpu.vector_store %arg6[%c0_205, %c0_206], %281 {strides = array<i32>} : memref<2x256xf32, #tpu.memory_space<vmem>>, vector<2x256xf32>,
    %283 = arith.truncf %281 : vector<2x256xf32> to vector<2x256xbf16>
    %284 = arith.index_cast %c18_i32 : i32 to index
    %c0_207 = arith.constant 0 : index
    %c0_208 = arith.constant 0 : index
    %285 = vector.load %arg4[%284, %c0_207, %c0_208] : memref<35x2x256xbf16, #tpu.memory_space<vmem>>, vector<1x2x256xbf16>
    %286 = vector.shape_cast %285 : vector<1x2x256xbf16> to vector<2x256xbf16>
    %287 = vector.shape_cast %283 : vector<2x256xbf16> to vector<1x2x256xbf16>
    tpu.vector_store %arg4[%284, %c0_207, %c0_208], %287 {strides = array<i32>} : memref<35x2x256xbf16, #tpu.memory_space<vmem>>, vector<1x2x256xbf16>,
    %c19_i32 = arith.constant 19 : i32
    %c0_209 = arith.constant 0 : index
    %c0_210 = arith.constant 0 : index
    %288 = vector.load %arg6[%c0_209, %c0_210] : memref<2x256xf32, #tpu.memory_space<vmem>>, vector<2x256xf32>
    %289 = arith.index_cast %c19_i32 : i32 to index
    %c0_211 = arith.constant 0 : index
    %c0_212 = arith.constant 0 : index
    %290 = vector.load %arg1[%289, %c0_211, %c0_212] : memref<35x2x256xf32, #tpu.memory_space<vmem>>, vector<1x2x256xf32>
    %291 = vector.shape_cast %290 : vector<1x2x256xf32> to vector<2x256xf32>
    %292 = arith.truncf %288 : vector<2x256xf32> to vector<2x256xbf16>
    %c0_213 = arith.constant 0 : index
    %c0_214 = arith.constant 0 : index
    %293 = vector.load %arg3[%c0_213, %c0_214] : memref<256x256xbf16, #tpu.memory_space<vmem>>, vector<256x256xbf16>
    %cst_215 = arith.constant dense<0.000000e+00> : vector<2x256xf32>
    %294 = tpu.matmul %292, %293, %cst_215 {dimension_numbers = #tpu.dot_dimension_numbers<[1], [0], [0], [1], [0, 0, 1, 1], [], []>} : vector<2x256xbf16>, vector<256x256xbf16>, vector<2x256xf32> -> vector<2x256xf32>
    %295 = arith.addf %291, %294 : vector<2x256xf32>
    %296 = math.tanh %295 : vector<2x256xf32>
    %c0_216 = arith.constant 0 : index
    %c0_217 = arith.constant 0 : index
    %297 = vector.load %arg6[%c0_216, %c0_217] : memref<2x256xf32, #tpu.memory_space<vmem>>, vector<2x256xf32>
    tpu.vector_store %arg6[%c0_216, %c0_217], %296 {strides = array<i32>} : memref<2x256xf32, #tpu.memory_space<vmem>>, vector<2x256xf32>,
    %298 = arith.truncf %296 : vector<2x256xf32> to vector<2x256xbf16>
    %299 = arith.index_cast %c19_i32 : i32 to index
    %c0_218 = arith.constant 0 : index
    %c0_219 = arith.constant 0 : index
    %300 = vector.load %arg4[%299, %c0_218, %c0_219] : memref<35x2x256xbf16, #tpu.memory_space<vmem>>, vector<1x2x256xbf16>
    %301 = vector.shape_cast %300 : vector<1x2x256xbf16> to vector<2x256xbf16>
    %302 = vector.shape_cast %298 : vector<2x256xbf16> to vector<1x2x256xbf16>
    tpu.vector_store %arg4[%299, %c0_218, %c0_219], %302 {strides = array<i32>} : memref<35x2x256xbf16, #tpu.memory_space<vmem>>, vector<1x2x256xbf16>,
    %c20_i32 = arith.constant 20 : i32
    %c0_220 = arith.constant 0 : index
    %c0_221 = arith.constant 0 : index
    %303 = vector.load %arg6[%c0_220, %c0_221] : memref<2x256xf32, #tpu.memory_space<vmem>>, vector<2x256xf32>
    %304 = arith.index_cast %c20_i32 : i32 to index
    %c0_222 = arith.constant 0 : index
    %c0_223 = arith.constant 0 : index
    %305 = vector.load %arg1[%304, %c0_222, %c0_223] : memref<35x2x256xf32, #tpu.memory_space<vmem>>, vector<1x2x256xf32>
    %306 = vector.shape_cast %305 : vector<1x2x256xf32> to vector<2x256xf32>
    %307 = arith.truncf %303 : vector<2x256xf32> to vector<2x256xbf16>
    %c0_224 = arith.constant 0 : index
    %c0_225 = arith.constant 0 : index
    %308 = vector.load %arg3[%c0_224, %c0_225] : memref<256x256xbf16, #tpu.memory_space<vmem>>, vector<256x256xbf16>
    %cst_226 = arith.constant dense<0.000000e+00> : vector<2x256xf32>
    %309 = tpu.matmul %307, %308, %cst_226 {dimension_numbers = #tpu.dot_dimension_numbers<[1], [0], [0], [1], [0, 0, 1, 1], [], []>} : vector<2x256xbf16>, vector<256x256xbf16>, vector<2x256xf32> -> vector<2x256xf32>
    %310 = arith.addf %306, %309 : vector<2x256xf32>
    %311 = math.tanh %310 : vector<2x256xf32>
    %c0_227 = arith.constant 0 : index
    %c0_228 = arith.constant 0 : index
    %312 = vector.load %arg6[%c0_227, %c0_228] : memref<2x256xf32, #tpu.memory_space<vmem>>, vector<2x256xf32>
    tpu.vector_store %arg6[%c0_227, %c0_228], %311 {strides = array<i32>} : memref<2x256xf32, #tpu.memory_space<vmem>>, vector<2x256xf32>,
    %313 = arith.truncf %311 : vector<2x256xf32> to vector<2x256xbf16>
    %314 = arith.index_cast %c20_i32 : i32 to index
    %c0_229 = arith.constant 0 : index
    %c0_230 = arith.constant 0 : index
    %315 = vector.load %arg4[%314, %c0_229, %c0_230] : memref<35x2x256xbf16, #tpu.memory_space<vmem>>, vector<1x2x256xbf16>
    %316 = vector.shape_cast %315 : vector<1x2x256xbf16> to vector<2x256xbf16>
    %317 = vector.shape_cast %313 : vector<2x256xbf16> to vector<1x2x256xbf16>
    tpu.vector_store %arg4[%314, %c0_229, %c0_230], %317 {strides = array<i32>} : memref<35x2x256xbf16, #tpu.memory_space<vmem>>, vector<1x2x256xbf16>,
    %c21_i32 = arith.constant 21 : i32
    %c0_231 = arith.constant 0 : index
    %c0_232 = arith.constant 0 : index
    %318 = vector.load %arg6[%c0_231, %c0_232] : memref<2x256xf32, #tpu.memory_space<vmem>>, vector<2x256xf32>
    %319 = arith.index_cast %c21_i32 : i32 to index
    %c0_233 = arith.constant 0 : index
    %c0_234 = arith.constant 0 : index
    %320 = vector.load %arg1[%319, %c0_233, %c0_234] : memref<35x2x256xf32, #tpu.memory_space<vmem>>, vector<1x2x256xf32>
    %321 = vector.shape_cast %320 : vector<1x2x256xf32> to vector<2x256xf32>
    %322 = arith.truncf %318 : vector<2x256xf32> to vector<2x256xbf16>
    %c0_235 = arith.constant 0 : index
    %c0_236 = arith.constant 0 : index
    %323 = vector.load %arg3[%c0_235, %c0_236] : memref<256x256xbf16, #tpu.memory_space<vmem>>, vector<256x256xbf16>
    %cst_237 = arith.constant dense<0.000000e+00> : vector<2x256xf32>
    %324 = tpu.matmul %322, %323, %cst_237 {dimension_numbers = #tpu.dot_dimension_numbers<[1], [0], [0], [1], [0, 0, 1, 1], [], []>} : vector<2x256xbf16>, vector<256x256xbf16>, vector<2x256xf32> -> vector<2x256xf32>
    %325 = arith.addf %321, %324 : vector<2x256xf32>
    %326 = math.tanh %325 : vector<2x256xf32>
    %c0_238 = arith.constant 0 : index
    %c0_239 = arith.constant 0 : index
    %327 = vector.load %arg6[%c0_238, %c0_239] : memref<2x256xf32, #tpu.memory_space<vmem>>, vector<2x256xf32>
    tpu.vector_store %arg6[%c0_238, %c0_239], %326 {strides = array<i32>} : memref<2x256xf32, #tpu.memory_space<vmem>>, vector<2x256xf32>,
    %328 = arith.truncf %326 : vector<2x256xf32> to vector<2x256xbf16>
    %329 = arith.index_cast %c21_i32 : i32 to index
    %c0_240 = arith.constant 0 : index
    %c0_241 = arith.constant 0 : index
    %330 = vector.load %arg4[%329, %c0_240, %c0_241] : memref<35x2x256xbf16, #tpu.memory_space<vmem>>, vector<1x2x256xbf16>
    %331 = vector.shape_cast %330 : vector<1x2x256xbf16> to vector<2x256xbf16>
    %332 = vector.shape_cast %328 : vector<2x256xbf16> to vector<1x2x256xbf16>
    tpu.vector_store %arg4[%329, %c0_240, %c0_241], %332 {strides = array<i32>} : memref<35x2x256xbf16, #tpu.memory_space<vmem>>, vector<1x2x256xbf16>,
    %c22_i32 = arith.constant 22 : i32
    %c0_242 = arith.constant 0 : index
    %c0_243 = arith.constant 0 : index
    %333 = vector.load %arg6[%c0_242, %c0_243] : memref<2x256xf32, #tpu.memory_space<vmem>>, vector<2x256xf32>
    %334 = arith.index_cast %c22_i32 : i32 to index
    %c0_244 = arith.constant 0 : index
    %c0_245 = arith.constant 0 : index
    %335 = vector.load %arg1[%334, %c0_244, %c0_245] : memref<35x2x256xf32, #tpu.memory_space<vmem>>, vector<1x2x256xf32>
    %336 = vector.shape_cast %335 : vector<1x2x256xf32> to vector<2x256xf32>
    %337 = arith.truncf %333 : vector<2x256xf32> to vector<2x256xbf16>
    %c0_246 = arith.constant 0 : index
    %c0_247 = arith.constant 0 : index
    %338 = vector.load %arg3[%c0_246, %c0_247] : memref<256x256xbf16, #tpu.memory_space<vmem>>, vector<256x256xbf16>
    %cst_248 = arith.constant dense<0.000000e+00> : vector<2x256xf32>
    %339 = tpu.matmul %337, %338, %cst_248 {dimension_numbers = #tpu.dot_dimension_numbers<[1], [0], [0], [1], [0, 0, 1, 1], [], []>} : vector<2x256xbf16>, vector<256x256xbf16>, vector<2x256xf32> -> vector<2x256xf32>
    %340 = arith.addf %336, %339 : vector<2x256xf32>
    %341 = math.tanh %340 : vector<2x256xf32>
    %c0_249 = arith.constant 0 : index
    %c0_250 = arith.constant 0 : index
    %342 = vector.load %arg6[%c0_249, %c0_250] : memref<2x256xf32, #tpu.memory_space<vmem>>, vector<2x256xf32>
    tpu.vector_store %arg6[%c0_249, %c0_250], %341 {strides = array<i32>} : memref<2x256xf32, #tpu.memory_space<vmem>>, vector<2x256xf32>,
    %343 = arith.truncf %341 : vector<2x256xf32> to vector<2x256xbf16>
    %344 = arith.index_cast %c22_i32 : i32 to index
    %c0_251 = arith.constant 0 : index
    %c0_252 = arith.constant 0 : index
    %345 = vector.load %arg4[%344, %c0_251, %c0_252] : memref<35x2x256xbf16, #tpu.memory_space<vmem>>, vector<1x2x256xbf16>
    %346 = vector.shape_cast %345 : vector<1x2x256xbf16> to vector<2x256xbf16>
    %347 = vector.shape_cast %343 : vector<2x256xbf16> to vector<1x2x256xbf16>
    tpu.vector_store %arg4[%344, %c0_251, %c0_252], %347 {strides = array<i32>} : memref<35x2x256xbf16, #tpu.memory_space<vmem>>, vector<1x2x256xbf16>,
    %c23_i32 = arith.constant 23 : i32
    %c0_253 = arith.constant 0 : index
    %c0_254 = arith.constant 0 : index
    %348 = vector.load %arg6[%c0_253, %c0_254] : memref<2x256xf32, #tpu.memory_space<vmem>>, vector<2x256xf32>
    %349 = arith.index_cast %c23_i32 : i32 to index
    %c0_255 = arith.constant 0 : index
    %c0_256 = arith.constant 0 : index
    %350 = vector.load %arg1[%349, %c0_255, %c0_256] : memref<35x2x256xf32, #tpu.memory_space<vmem>>, vector<1x2x256xf32>
    %351 = vector.shape_cast %350 : vector<1x2x256xf32> to vector<2x256xf32>
    %352 = arith.truncf %348 : vector<2x256xf32> to vector<2x256xbf16>
    %c0_257 = arith.constant 0 : index
    %c0_258 = arith.constant 0 : index
    %353 = vector.load %arg3[%c0_257, %c0_258] : memref<256x256xbf16, #tpu.memory_space<vmem>>, vector<256x256xbf16>
    %cst_259 = arith.constant dense<0.000000e+00> : vector<2x256xf32>
    %354 = tpu.matmul %352, %353, %cst_259 {dimension_numbers = #tpu.dot_dimension_numbers<[1], [0], [0], [1], [0, 0, 1, 1], [], []>} : vector<2x256xbf16>, vector<256x256xbf16>, vector<2x256xf32> -> vector<2x256xf32>
    %355 = arith.addf %351, %354 : vector<2x256xf32>
    %356 = math.tanh %355 : vector<2x256xf32>
    %c0_260 = arith.constant 0 : index
    %c0_261 = arith.constant 0 : index
    %357 = vector.load %arg6[%c0_260, %c0_261] : memref<2x256xf32, #tpu.memory_space<vmem>>, vector<2x256xf32>
    tpu.vector_store %arg6[%c0_260, %c0_261], %356 {strides = array<i32>} : memref<2x256xf32, #tpu.memory_space<vmem>>, vector<2x256xf32>,
    %358 = arith.truncf %356 : vector<2x256xf32> to vector<2x256xbf16>
    %359 = arith.index_cast %c23_i32 : i32 to index
    %c0_262 = arith.constant 0 : index
    %c0_263 = arith.constant 0 : index
    %360 = vector.load %arg4[%359, %c0_262, %c0_263] : memref<35x2x256xbf16, #tpu.memory_space<vmem>>, vector<1x2x256xbf16>
    %361 = vector.shape_cast %360 : vector<1x2x256xbf16> to vector<2x256xbf16>
    %362 = vector.shape_cast %358 : vector<2x256xbf16> to vector<1x2x256xbf16>
    tpu.vector_store %arg4[%359, %c0_262, %c0_263], %362 {strides = array<i32>} : memref<35x2x256xbf16, #tpu.memory_space<vmem>>, vector<1x2x256xbf16>,
    %c24_i32 = arith.constant 24 : i32
    %c0_264 = arith.constant 0 : index
    %c0_265 = arith.constant 0 : index
    %363 = vector.load %arg6[%c0_264, %c0_265] : memref<2x256xf32, #tpu.memory_space<vmem>>, vector<2x256xf32>
    %364 = arith.index_cast %c24_i32 : i32 to index
    %c0_266 = arith.constant 0 : index
    %c0_267 = arith.constant 0 : index
    %365 = vector.load %arg1[%364, %c0_266, %c0_267] : memref<35x2x256xf32, #tpu.memory_space<vmem>>, vector<1x2x256xf32>
    %366 = vector.shape_cast %365 : vector<1x2x256xf32> to vector<2x256xf32>
    %367 = arith.truncf %363 : vector<2x256xf32> to vector<2x256xbf16>
    %c0_268 = arith.constant 0 : index
    %c0_269 = arith.constant 0 : index
    %368 = vector.load %arg3[%c0_268, %c0_269] : memref<256x256xbf16, #tpu.memory_space<vmem>>, vector<256x256xbf16>
    %cst_270 = arith.constant dense<0.000000e+00> : vector<2x256xf32>
    %369 = tpu.matmul %367, %368, %cst_270 {dimension_numbers = #tpu.dot_dimension_numbers<[1], [0], [0], [1], [0, 0, 1, 1], [], []>} : vector<2x256xbf16>, vector<256x256xbf16>, vector<2x256xf32> -> vector<2x256xf32>
    %370 = arith.addf %366, %369 : vector<2x256xf32>
    %371 = math.tanh %370 : vector<2x256xf32>
    %c0_271 = arith.constant 0 : index
    %c0_272 = arith.constant 0 : index
    %372 = vector.load %arg6[%c0_271, %c0_272] : memref<2x256xf32, #tpu.memory_space<vmem>>, vector<2x256xf32>
    tpu.vector_store %arg6[%c0_271, %c0_272], %371 {strides = array<i32>} : memref<2x256xf32, #tpu.memory_space<vmem>>, vector<2x256xf32>,
    %373 = arith.truncf %371 : vector<2x256xf32> to vector<2x256xbf16>
    %374 = arith.index_cast %c24_i32 : i32 to index
    %c0_273 = arith.constant 0 : index
    %c0_274 = arith.constant 0 : index
    %375 = vector.load %arg4[%374, %c0_273, %c0_274] : memref<35x2x256xbf16, #tpu.memory_space<vmem>>, vector<1x2x256xbf16>
    %376 = vector.shape_cast %375 : vector<1x2x256xbf16> to vector<2x256xbf16>
    %377 = vector.shape_cast %373 : vector<2x256xbf16> to vector<1x2x256xbf16>
    tpu.vector_store %arg4[%374, %c0_273, %c0_274], %377 {strides = array<i32>} : memref<35x2x256xbf16, #tpu.memory_space<vmem>>, vector<1x2x256xbf16>,
    %c25_i32 = arith.constant 25 : i32
    %c0_275 = arith.constant 0 : index
    %c0_276 = arith.constant 0 : index
    %378 = vector.load %arg6[%c0_275, %c0_276] : memref<2x256xf32, #tpu.memory_space<vmem>>, vector<2x256xf32>
    %379 = arith.index_cast %c25_i32 : i32 to index
    %c0_277 = arith.constant 0 : index
    %c0_278 = arith.constant 0 : index
    %380 = vector.load %arg1[%379, %c0_277, %c0_278] : memref<35x2x256xf32, #tpu.memory_space<vmem>>, vector<1x2x256xf32>
    %381 = vector.shape_cast %380 : vector<1x2x256xf32> to vector<2x256xf32>
    %382 = arith.truncf %378 : vector<2x256xf32> to vector<2x256xbf16>
    %c0_279 = arith.constant 0 : index
    %c0_280 = arith.constant 0 : index
    %383 = vector.load %arg3[%c0_279, %c0_280] : memref<256x256xbf16, #tpu.memory_space<vmem>>, vector<256x256xbf16>
    %cst_281 = arith.constant dense<0.000000e+00> : vector<2x256xf32>
    %384 = tpu.matmul %382, %383, %cst_281 {dimension_numbers = #tpu.dot_dimension_numbers<[1], [0], [0], [1], [0, 0, 1, 1], [], []>} : vector<2x256xbf16>, vector<256x256xbf16>, vector<2x256xf32> -> vector<2x256xf32>
    %385 = arith.addf %381, %384 : vector<2x256xf32>
    %386 = math.tanh %385 : vector<2x256xf32>
    %c0_282 = arith.constant 0 : index
    %c0_283 = arith.constant 0 : index
    %387 = vector.load %arg6[%c0_282, %c0_283] : memref<2x256xf32, #tpu.memory_space<vmem>>, vector<2x256xf32>
    tpu.vector_store %arg6[%c0_282, %c0_283], %386 {strides = array<i32>} : memref<2x256xf32, #tpu.memory_space<vmem>>, vector<2x256xf32>,
    %388 = arith.truncf %386 : vector<2x256xf32> to vector<2x256xbf16>
    %389 = arith.index_cast %c25_i32 : i32 to index
    %c0_284 = arith.constant 0 : index
    %c0_285 = arith.constant 0 : index
    %390 = vector.load %arg4[%389, %c0_284, %c0_285] : memref<35x2x256xbf16, #tpu.memory_space<vmem>>, vector<1x2x256xbf16>
    %391 = vector.shape_cast %390 : vector<1x2x256xbf16> to vector<2x256xbf16>
    %392 = vector.shape_cast %388 : vector<2x256xbf16> to vector<1x2x256xbf16>
    tpu.vector_store %arg4[%389, %c0_284, %c0_285], %392 {strides = array<i32>} : memref<35x2x256xbf16, #tpu.memory_space<vmem>>, vector<1x2x256xbf16>,
    %c26_i32 = arith.constant 26 : i32
    %c0_286 = arith.constant 0 : index
    %c0_287 = arith.constant 0 : index
    %393 = vector.load %arg6[%c0_286, %c0_287] : memref<2x256xf32, #tpu.memory_space<vmem>>, vector<2x256xf32>
    %394 = arith.index_cast %c26_i32 : i32 to index
    %c0_288 = arith.constant 0 : index
    %c0_289 = arith.constant 0 : index
    %395 = vector.load %arg1[%394, %c0_288, %c0_289] : memref<35x2x256xf32, #tpu.memory_space<vmem>>, vector<1x2x256xf32>
    %396 = vector.shape_cast %395 : vector<1x2x256xf32> to vector<2x256xf32>
    %397 = arith.truncf %393 : vector<2x256xf32> to vector<2x256xbf16>
    %c0_290 = arith.constant 0 : index
    %c0_291 = arith.constant 0 : index
    %398 = vector.load %arg3[%c0_290, %c0_291] : memref<256x256xbf16, #tpu.memory_space<vmem>>, vector<256x256xbf16>
    %cst_292 = arith.constant dense<0.000000e+00> : vector<2x256xf32>
    %399 = tpu.matmul %397, %398, %cst_292 {dimension_numbers = #tpu.dot_dimension_numbers<[1], [0], [0], [1], [0, 0, 1, 1], [], []>} : vector<2x256xbf16>, vector<256x256xbf16>, vector<2x256xf32> -> vector<2x256xf32>
    %400 = arith.addf %396, %399 : vector<2x256xf32>
    %401 = math.tanh %400 : vector<2x256xf32>
    %c0_293 = arith.constant 0 : index
    %c0_294 = arith.constant 0 : index
    %402 = vector.load %arg6[%c0_293, %c0_294] : memref<2x256xf32, #tpu.memory_space<vmem>>, vector<2x256xf32>
    tpu.vector_store %arg6[%c0_293, %c0_294], %401 {strides = array<i32>} : memref<2x256xf32, #tpu.memory_space<vmem>>, vector<2x256xf32>,
    %403 = arith.truncf %401 : vector<2x256xf32> to vector<2x256xbf16>
    %404 = arith.index_cast %c26_i32 : i32 to index
    %c0_295 = arith.constant 0 : index
    %c0_296 = arith.constant 0 : index
    %405 = vector.load %arg4[%404, %c0_295, %c0_296] : memref<35x2x256xbf16, #tpu.memory_space<vmem>>, vector<1x2x256xbf16>
    %406 = vector.shape_cast %405 : vector<1x2x256xbf16> to vector<2x256xbf16>
    %407 = vector.shape_cast %403 : vector<2x256xbf16> to vector<1x2x256xbf16>
    tpu.vector_store %arg4[%404, %c0_295, %c0_296], %407 {strides = array<i32>} : memref<35x2x256xbf16, #tpu.memory_space<vmem>>, vector<1x2x256xbf16>,
    %c27_i32 = arith.constant 27 : i32
    %c0_297 = arith.constant 0 : index
    %c0_298 = arith.constant 0 : index
    %408 = vector.load %arg6[%c0_297, %c0_298] : memref<2x256xf32, #tpu.memory_space<vmem>>, vector<2x256xf32>
    %409 = arith.index_cast %c27_i32 : i32 to index
    %c0_299 = arith.constant 0 : index
    %c0_300 = arith.constant 0 : index
    %410 = vector.load %arg1[%409, %c0_299, %c0_300] : memref<35x2x256xf32, #tpu.memory_space<vmem>>, vector<1x2x256xf32>
    %411 = vector.shape_cast %410 : vector<1x2x256xf32> to vector<2x256xf32>
    %412 = arith.truncf %408 : vector<2x256xf32> to vector<2x256xbf16>
    %c0_301 = arith.constant 0 : index
    %c0_302 = arith.constant 0 : index
    %413 = vector.load %arg3[%c0_301, %c0_302] : memref<256x256xbf16, #tpu.memory_space<vmem>>, vector<256x256xbf16>
    %cst_303 = arith.constant dense<0.000000e+00> : vector<2x256xf32>
    %414 = tpu.matmul %412, %413, %cst_303 {dimension_numbers = #tpu.dot_dimension_numbers<[1], [0], [0], [1], [0, 0, 1, 1], [], []>} : vector<2x256xbf16>, vector<256x256xbf16>, vector<2x256xf32> -> vector<2x256xf32>
    %415 = arith.addf %411, %414 : vector<2x256xf32>
    %416 = math.tanh %415 : vector<2x256xf32>
    %c0_304 = arith.constant 0 : index
    %c0_305 = arith.constant 0 : index
    %417 = vector.load %arg6[%c0_304, %c0_305] : memref<2x256xf32, #tpu.memory_space<vmem>>, vector<2x256xf32>
    tpu.vector_store %arg6[%c0_304, %c0_305], %416 {strides = array<i32>} : memref<2x256xf32, #tpu.memory_space<vmem>>, vector<2x256xf32>,
    %418 = arith.truncf %416 : vector<2x256xf32> to vector<2x256xbf16>
    %419 = arith.index_cast %c27_i32 : i32 to index
    %c0_306 = arith.constant 0 : index
    %c0_307 = arith.constant 0 : index
    %420 = vector.load %arg4[%419, %c0_306, %c0_307] : memref<35x2x256xbf16, #tpu.memory_space<vmem>>, vector<1x2x256xbf16>
    %421 = vector.shape_cast %420 : vector<1x2x256xbf16> to vector<2x256xbf16>
    %422 = vector.shape_cast %418 : vector<2x256xbf16> to vector<1x2x256xbf16>
    tpu.vector_store %arg4[%419, %c0_306, %c0_307], %422 {strides = array<i32>} : memref<35x2x256xbf16, #tpu.memory_space<vmem>>, vector<1x2x256xbf16>,
    %c28_i32 = arith.constant 28 : i32
    %c0_308 = arith.constant 0 : index
    %c0_309 = arith.constant 0 : index
    %423 = vector.load %arg6[%c0_308, %c0_309] : memref<2x256xf32, #tpu.memory_space<vmem>>, vector<2x256xf32>
    %424 = arith.index_cast %c28_i32 : i32 to index
    %c0_310 = arith.constant 0 : index
    %c0_311 = arith.constant 0 : index
    %425 = vector.load %arg1[%424, %c0_310, %c0_311] : memref<35x2x256xf32, #tpu.memory_space<vmem>>, vector<1x2x256xf32>
    %426 = vector.shape_cast %425 : vector<1x2x256xf32> to vector<2x256xf32>
    %427 = arith.truncf %423 : vector<2x256xf32> to vector<2x256xbf16>
    %c0_312 = arith.constant 0 : index
    %c0_313 = arith.constant 0 : index
    %428 = vector.load %arg3[%c0_312, %c0_313] : memref<256x256xbf16, #tpu.memory_space<vmem>>, vector<256x256xbf16>
    %cst_314 = arith.constant dense<0.000000e+00> : vector<2x256xf32>
    %429 = tpu.matmul %427, %428, %cst_314 {dimension_numbers = #tpu.dot_dimension_numbers<[1], [0], [0], [1], [0, 0, 1, 1], [], []>} : vector<2x256xbf16>, vector<256x256xbf16>, vector<2x256xf32> -> vector<2x256xf32>
    %430 = arith.addf %426, %429 : vector<2x256xf32>
    %431 = math.tanh %430 : vector<2x256xf32>
    %c0_315 = arith.constant 0 : index
    %c0_316 = arith.constant 0 : index
    %432 = vector.load %arg6[%c0_315, %c0_316] : memref<2x256xf32, #tpu.memory_space<vmem>>, vector<2x256xf32>
    tpu.vector_store %arg6[%c0_315, %c0_316], %431 {strides = array<i32>} : memref<2x256xf32, #tpu.memory_space<vmem>>, vector<2x256xf32>,
    %433 = arith.truncf %431 : vector<2x256xf32> to vector<2x256xbf16>
    %434 = arith.index_cast %c28_i32 : i32 to index
    %c0_317 = arith.constant 0 : index
    %c0_318 = arith.constant 0 : index
    %435 = vector.load %arg4[%434, %c0_317, %c0_318] : memref<35x2x256xbf16, #tpu.memory_space<vmem>>, vector<1x2x256xbf16>
    %436 = vector.shape_cast %435 : vector<1x2x256xbf16> to vector<2x256xbf16>
    %437 = vector.shape_cast %433 : vector<2x256xbf16> to vector<1x2x256xbf16>
    tpu.vector_store %arg4[%434, %c0_317, %c0_318], %437 {strides = array<i32>} : memref<35x2x256xbf16, #tpu.memory_space<vmem>>, vector<1x2x256xbf16>,
    %c29_i32 = arith.constant 29 : i32
    %c0_319 = arith.constant 0 : index
    %c0_320 = arith.constant 0 : index
    %438 = vector.load %arg6[%c0_319, %c0_320] : memref<2x256xf32, #tpu.memory_space<vmem>>, vector<2x256xf32>
    %439 = arith.index_cast %c29_i32 : i32 to index
    %c0_321 = arith.constant 0 : index
    %c0_322 = arith.constant 0 : index
    %440 = vector.load %arg1[%439, %c0_321, %c0_322] : memref<35x2x256xf32, #tpu.memory_space<vmem>>, vector<1x2x256xf32>
    %441 = vector.shape_cast %440 : vector<1x2x256xf32> to vector<2x256xf32>
    %442 = arith.truncf %438 : vector<2x256xf32> to vector<2x256xbf16>
    %c0_323 = arith.constant 0 : index
    %c0_324 = arith.constant 0 : index
    %443 = vector.load %arg3[%c0_323, %c0_324] : memref<256x256xbf16, #tpu.memory_space<vmem>>, vector<256x256xbf16>
    %cst_325 = arith.constant dense<0.000000e+00> : vector<2x256xf32>
    %444 = tpu.matmul %442, %443, %cst_325 {dimension_numbers = #tpu.dot_dimension_numbers<[1], [0], [0], [1], [0, 0, 1, 1], [], []>} : vector<2x256xbf16>, vector<256x256xbf16>, vector<2x256xf32> -> vector<2x256xf32>
    %445 = arith.addf %441, %444 : vector<2x256xf32>
    %446 = math.tanh %445 : vector<2x256xf32>
    %c0_326 = arith.constant 0 : index
    %c0_327 = arith.constant 0 : index
    %447 = vector.load %arg6[%c0_326, %c0_327] : memref<2x256xf32, #tpu.memory_space<vmem>>, vector<2x256xf32>
    tpu.vector_store %arg6[%c0_326, %c0_327], %446 {strides = array<i32>} : memref<2x256xf32, #tpu.memory_space<vmem>>, vector<2x256xf32>,
    %448 = arith.truncf %446 : vector<2x256xf32> to vector<2x256xbf16>
    %449 = arith.index_cast %c29_i32 : i32 to index
    %c0_328 = arith.constant 0 : index
    %c0_329 = arith.constant 0 : index
    %450 = vector.load %arg4[%449, %c0_328, %c0_329] : memref<35x2x256xbf16, #tpu.memory_space<vmem>>, vector<1x2x256xbf16>
    %451 = vector.shape_cast %450 : vector<1x2x256xbf16> to vector<2x256xbf16>
    %452 = vector.shape_cast %448 : vector<2x256xbf16> to vector<1x2x256xbf16>
    tpu.vector_store %arg4[%449, %c0_328, %c0_329], %452 {strides = array<i32>} : memref<35x2x256xbf16, #tpu.memory_space<vmem>>, vector<1x2x256xbf16>,
    %c30_i32 = arith.constant 30 : i32
    %c0_330 = arith.constant 0 : index
    %c0_331 = arith.constant 0 : index
    %453 = vector.load %arg6[%c0_330, %c0_331] : memref<2x256xf32, #tpu.memory_space<vmem>>, vector<2x256xf32>
    %454 = arith.index_cast %c30_i32 : i32 to index
    %c0_332 = arith.constant 0 : index
    %c0_333 = arith.constant 0 : index
    %455 = vector.load %arg1[%454, %c0_332, %c0_333] : memref<35x2x256xf32, #tpu.memory_space<vmem>>, vector<1x2x256xf32>
    %456 = vector.shape_cast %455 : vector<1x2x256xf32> to vector<2x256xf32>
    %457 = arith.truncf %453 : vector<2x256xf32> to vector<2x256xbf16>
    %c0_334 = arith.constant 0 : index
    %c0_335 = arith.constant 0 : index
    %458 = vector.load %arg3[%c0_334, %c0_335] : memref<256x256xbf16, #tpu.memory_space<vmem>>, vector<256x256xbf16>
    %cst_336 = arith.constant dense<0.000000e+00> : vector<2x256xf32>
    %459 = tpu.matmul %457, %458, %cst_336 {dimension_numbers = #tpu.dot_dimension_numbers<[1], [0], [0], [1], [0, 0, 1, 1], [], []>} : vector<2x256xbf16>, vector<256x256xbf16>, vector<2x256xf32> -> vector<2x256xf32>
    %460 = arith.addf %456, %459 : vector<2x256xf32>
    %461 = math.tanh %460 : vector<2x256xf32>
    %c0_337 = arith.constant 0 : index
    %c0_338 = arith.constant 0 : index
    %462 = vector.load %arg6[%c0_337, %c0_338] : memref<2x256xf32, #tpu.memory_space<vmem>>, vector<2x256xf32>
    tpu.vector_store %arg6[%c0_337, %c0_338], %461 {strides = array<i32>} : memref<2x256xf32, #tpu.memory_space<vmem>>, vector<2x256xf32>,
    %463 = arith.truncf %461 : vector<2x256xf32> to vector<2x256xbf16>
    %464 = arith.index_cast %c30_i32 : i32 to index
    %c0_339 = arith.constant 0 : index
    %c0_340 = arith.constant 0 : index
    %465 = vector.load %arg4[%464, %c0_339, %c0_340] : memref<35x2x256xbf16, #tpu.memory_space<vmem>>, vector<1x2x256xbf16>
    %466 = vector.shape_cast %465 : vector<1x2x256xbf16> to vector<2x256xbf16>
    %467 = vector.shape_cast %463 : vector<2x256xbf16> to vector<1x2x256xbf16>
    tpu.vector_store %arg4[%464, %c0_339, %c0_340], %467 {strides = array<i32>} : memref<35x2x256xbf16, #tpu.memory_space<vmem>>, vector<1x2x256xbf16>,
    %c31_i32 = arith.constant 31 : i32
    %c0_341 = arith.constant 0 : index
    %c0_342 = arith.constant 0 : index
    %468 = vector.load %arg6[%c0_341, %c0_342] : memref<2x256xf32, #tpu.memory_space<vmem>>, vector<2x256xf32>
    %469 = arith.index_cast %c31_i32 : i32 to index
    %c0_343 = arith.constant 0 : index
    %c0_344 = arith.constant 0 : index
    %470 = vector.load %arg1[%469, %c0_343, %c0_344] : memref<35x2x256xf32, #tpu.memory_space<vmem>>, vector<1x2x256xf32>
    %471 = vector.shape_cast %470 : vector<1x2x256xf32> to vector<2x256xf32>
    %472 = arith.truncf %468 : vector<2x256xf32> to vector<2x256xbf16>
    %c0_345 = arith.constant 0 : index
    %c0_346 = arith.constant 0 : index
    %473 = vector.load %arg3[%c0_345, %c0_346] : memref<256x256xbf16, #tpu.memory_space<vmem>>, vector<256x256xbf16>
    %cst_347 = arith.constant dense<0.000000e+00> : vector<2x256xf32>
    %474 = tpu.matmul %472, %473, %cst_347 {dimension_numbers = #tpu.dot_dimension_numbers<[1], [0], [0], [1], [0, 0, 1, 1], [], []>} : vector<2x256xbf16>, vector<256x256xbf16>, vector<2x256xf32> -> vector<2x256xf32>
    %475 = arith.addf %471, %474 : vector<2x256xf32>
    %476 = math.tanh %475 : vector<2x256xf32>
    %c0_348 = arith.constant 0 : index
    %c0_349 = arith.constant 0 : index
    %477 = vector.load %arg6[%c0_348, %c0_349] : memref<2x256xf32, #tpu.memory_space<vmem>>, vector<2x256xf32>
    tpu.vector_store %arg6[%c0_348, %c0_349], %476 {strides = array<i32>} : memref<2x256xf32, #tpu.memory_space<vmem>>, vector<2x256xf32>,
    %478 = arith.truncf %476 : vector<2x256xf32> to vector<2x256xbf16>
    %479 = arith.index_cast %c31_i32 : i32 to index
    %c0_350 = arith.constant 0 : index
    %c0_351 = arith.constant 0 : index
    %480 = vector.load %arg4[%479, %c0_350, %c0_351] : memref<35x2x256xbf16, #tpu.memory_space<vmem>>, vector<1x2x256xbf16>
    %481 = vector.shape_cast %480 : vector<1x2x256xbf16> to vector<2x256xbf16>
    %482 = vector.shape_cast %478 : vector<2x256xbf16> to vector<1x2x256xbf16>
    tpu.vector_store %arg4[%479, %c0_350, %c0_351], %482 {strides = array<i32>} : memref<35x2x256xbf16, #tpu.memory_space<vmem>>, vector<1x2x256xbf16>,
    %c32_i32 = arith.constant 32 : i32
    %c0_352 = arith.constant 0 : index
    %c0_353 = arith.constant 0 : index
    %483 = vector.load %arg6[%c0_352, %c0_353] : memref<2x256xf32, #tpu.memory_space<vmem>>, vector<2x256xf32>
    %484 = arith.index_cast %c32_i32 : i32 to index
    %c0_354 = arith.constant 0 : index
    %c0_355 = arith.constant 0 : index
    %485 = vector.load %arg1[%484, %c0_354, %c0_355] : memref<35x2x256xf32, #tpu.memory_space<vmem>>, vector<1x2x256xf32>
    %486 = vector.shape_cast %485 : vector<1x2x256xf32> to vector<2x256xf32>
    %487 = arith.truncf %483 : vector<2x256xf32> to vector<2x256xbf16>
    %c0_356 = arith.constant 0 : index
    %c0_357 = arith.constant 0 : index
    %488 = vector.load %arg3[%c0_356, %c0_357] : memref<256x256xbf16, #tpu.memory_space<vmem>>, vector<256x256xbf16>
    %cst_358 = arith.constant dense<0.000000e+00> : vector<2x256xf32>
    %489 = tpu.matmul %487, %488, %cst_358 {dimension_numbers = #tpu.dot_dimension_numbers<[1], [0], [0], [1], [0, 0, 1, 1], [], []>} : vector<2x256xbf16>, vector<256x256xbf16>, vector<2x256xf32> -> vector<2x256xf32>
    %490 = arith.addf %486, %489 : vector<2x256xf32>
    %491 = math.tanh %490 : vector<2x256xf32>
    %c0_359 = arith.constant 0 : index
    %c0_360 = arith.constant 0 : index
    %492 = vector.load %arg6[%c0_359, %c0_360] : memref<2x256xf32, #tpu.memory_space<vmem>>, vector<2x256xf32>
    tpu.vector_store %arg6[%c0_359, %c0_360], %491 {strides = array<i32>} : memref<2x256xf32, #tpu.memory_space<vmem>>, vector<2x256xf32>,
    %493 = arith.truncf %491 : vector<2x256xf32> to vector<2x256xbf16>
    %494 = arith.index_cast %c32_i32 : i32 to index
    %c0_361 = arith.constant 0 : index
    %c0_362 = arith.constant 0 : index
    %495 = vector.load %arg4[%494, %c0_361, %c0_362] : memref<35x2x256xbf16, #tpu.memory_space<vmem>>, vector<1x2x256xbf16>
    %496 = vector.shape_cast %495 : vector<1x2x256xbf16> to vector<2x256xbf16>
    %497 = vector.shape_cast %493 : vector<2x256xbf16> to vector<1x2x256xbf16>
    tpu.vector_store %arg4[%494, %c0_361, %c0_362], %497 {strides = array<i32>} : memref<35x2x256xbf16, #tpu.memory_space<vmem>>, vector<1x2x256xbf16>,
    %c33_i32 = arith.constant 33 : i32
    %c0_363 = arith.constant 0 : index
    %c0_364 = arith.constant 0 : index
    %498 = vector.load %arg6[%c0_363, %c0_364] : memref<2x256xf32, #tpu.memory_space<vmem>>, vector<2x256xf32>
    %499 = arith.index_cast %c33_i32 : i32 to index
    %c0_365 = arith.constant 0 : index
    %c0_366 = arith.constant 0 : index
    %500 = vector.load %arg1[%499, %c0_365, %c0_366] : memref<35x2x256xf32, #tpu.memory_space<vmem>>, vector<1x2x256xf32>
    %501 = vector.shape_cast %500 : vector<1x2x256xf32> to vector<2x256xf32>
    %502 = arith.truncf %498 : vector<2x256xf32> to vector<2x256xbf16>
    %c0_367 = arith.constant 0 : index
    %c0_368 = arith.constant 0 : index
    %503 = vector.load %arg3[%c0_367, %c0_368] : memref<256x256xbf16, #tpu.memory_space<vmem>>, vector<256x256xbf16>
    %cst_369 = arith.constant dense<0.000000e+00> : vector<2x256xf32>
    %504 = tpu.matmul %502, %503, %cst_369 {dimension_numbers = #tpu.dot_dimension_numbers<[1], [0], [0], [1], [0, 0, 1, 1], [], []>} : vector<2x256xbf16>, vector<256x256xbf16>, vector<2x256xf32> -> vector<2x256xf32>
    %505 = arith.addf %501, %504 : vector<2x256xf32>
    %506 = math.tanh %505 : vector<2x256xf32>
    %c0_370 = arith.constant 0 : index
    %c0_371 = arith.constant 0 : index
    %507 = vector.load %arg6[%c0_370, %c0_371] : memref<2x256xf32, #tpu.memory_space<vmem>>, vector<2x256xf32>
    tpu.vector_store %arg6[%c0_370, %c0_371], %506 {strides = array<i32>} : memref<2x256xf32, #tpu.memory_space<vmem>>, vector<2x256xf32>,
    %508 = arith.truncf %506 : vector<2x256xf32> to vector<2x256xbf16>
    %509 = arith.index_cast %c33_i32 : i32 to index
    %c0_372 = arith.constant 0 : index
    %c0_373 = arith.constant 0 : index
    %510 = vector.load %arg4[%509, %c0_372, %c0_373] : memref<35x2x256xbf16, #tpu.memory_space<vmem>>, vector<1x2x256xbf16>
    %511 = vector.shape_cast %510 : vector<1x2x256xbf16> to vector<2x256xbf16>
    %512 = vector.shape_cast %508 : vector<2x256xbf16> to vector<1x2x256xbf16>
    tpu.vector_store %arg4[%509, %c0_372, %c0_373], %512 {strides = array<i32>} : memref<35x2x256xbf16, #tpu.memory_space<vmem>>, vector<1x2x256xbf16>,
    %c34_i32 = arith.constant 34 : i32
    %c0_374 = arith.constant 0 : index
    %c0_375 = arith.constant 0 : index
    %513 = vector.load %arg6[%c0_374, %c0_375] : memref<2x256xf32, #tpu.memory_space<vmem>>, vector<2x256xf32>
    %514 = arith.index_cast %c34_i32 : i32 to index
    %c0_376 = arith.constant 0 : index
    %c0_377 = arith.constant 0 : index
    %515 = vector.load %arg1[%514, %c0_376, %c0_377] : memref<35x2x256xf32, #tpu.memory_space<vmem>>, vector<1x2x256xf32>
    %516 = vector.shape_cast %515 : vector<1x2x256xf32> to vector<2x256xf32>
    %517 = arith.truncf %513 : vector<2x256xf32> to vector<2x256xbf16>
    %c0_378 = arith.constant 0 : index
    %c0_379 = arith.constant 0 : index
    %518 = vector.load %arg3[%c0_378, %c0_379] : memref<256x256xbf16, #tpu.memory_space<vmem>>, vector<256x256xbf16>
    %cst_380 = arith.constant dense<0.000000e+00> : vector<2x256xf32>
    %519 = tpu.matmul %517, %518, %cst_380 {dimension_numbers = #tpu.dot_dimension_numbers<[1], [0], [0], [1], [0, 0, 1, 1], [], []>} : vector<2x256xbf16>, vector<256x256xbf16>, vector<2x256xf32> -> vector<2x256xf32>
    %520 = arith.addf %516, %519 : vector<2x256xf32>
    %521 = math.tanh %520 : vector<2x256xf32>
    %c0_381 = arith.constant 0 : index
    %c0_382 = arith.constant 0 : index
    %522 = vector.load %arg6[%c0_381, %c0_382] : memref<2x256xf32, #tpu.memory_space<vmem>>, vector<2x256xf32>
    tpu.vector_store %arg6[%c0_381, %c0_382], %521 {strides = array<i32>} : memref<2x256xf32, #tpu.memory_space<vmem>>, vector<2x256xf32>,
    %523 = arith.truncf %521 : vector<2x256xf32> to vector<2x256xbf16>
    %524 = arith.index_cast %c34_i32 : i32 to index
    %c0_383 = arith.constant 0 : index
    %c0_384 = arith.constant 0 : index
    %525 = vector.load %arg4[%524, %c0_383, %c0_384] : memref<35x2x256xbf16, #tpu.memory_space<vmem>>, vector<1x2x256xbf16>
    %526 = vector.shape_cast %525 : vector<1x2x256xbf16> to vector<2x256xbf16>
    %527 = vector.shape_cast %523 : vector<2x256xbf16> to vector<1x2x256xbf16>
    tpu.vector_store %arg4[%524, %c0_383, %c0_384], %527 {strides = array<i32>} : memref<35x2x256xbf16, #tpu.memory_space<vmem>>, vector<1x2x256xbf16>,
    %c35_i32 = arith.constant 35 : i32
    %c0_i32_385 = arith.constant 0 : i32
    %528 = arith.cmpi eq, %arg0, %c0_i32_385 : i32
    %529 = arith.extui %528 : i1 to i32
    %c0_i32_386 = arith.constant 0 : i32
    %530 = arith.cmpi ne, %529, %c0_i32_386 : i32
    scf.if %530 {
      %c0_387 = arith.constant 0 : index
      %c0_388 = arith.constant 0 : index
      %531 = vector.load %arg6[%c0_387, %c0_388] : memref<2x256xf32, #tpu.memory_space<vmem>>, vector<2x256xf32>
      %c0_389 = arith.constant 0 : index
      %c0_390 = arith.constant 0 : index
      %c0_391 = arith.constant 0 : index
      %532 = vector.load %arg5[%c0_389, %c0_390, %c0_391] : memref<1x2x256xf32, #tpu.memory_space<vmem>>, vector<1x2x256xf32>
      %533 = vector.shape_cast %532 : vector<1x2x256xf32> to vector<2x256xf32>
      %534 = vector.shape_cast %531 : vector<2x256xf32> to vector<1x2x256xf32>
      tpu.vector_store %arg5[%c0_389, %c0_390, %c0_391], %534 {strides = array<i32>} : memref<1x2x256xf32, #tpu.memory_space<vmem>>, vector<1x2x256xf32>,
    } else {
    }
    return
  }
  func.func @transform_0(%arg0: i32) -> (i32, i32, i32) {
    %c0_i32 = arith.constant 0 : i32
    %c0_i32_0 = arith.constant 0 : i32
    %c0_i32_1 = arith.constant 0 : i32
    return %arg0, %c0_i32, %c0_i32_0 : i32, i32, i32
  }
  func.func @transform_1(%arg0: i32) -> (i32, i32, i32) {
    %c0_i32 = arith.constant 0 : i32
    %c0_i32_0 = arith.constant 0 : i32
    %c0_i32_1 = arith.constant 0 : i32
    %c0_i32_2 = arith.constant 0 : i32
    return %c0_i32, %c0_i32_0, %c0_i32_1 : i32, i32, i32
  }
  func.func @transform_2(%arg0: i32) -> (i32, i32) {
    %c0_i32 = arith.constant 0 : i32
    %c0_i32_0 = arith.constant 0 : i32
    %c0_i32_1 = arith.constant 0 : i32
    return %c0_i32, %c0_i32_0 : i32, i32
  }
  func.func @transform_3(%arg0: i32) -> (i32, i32, i32) {
    %c0_i32 = arith.constant 0 : i32
    %c0_i32_0 = arith.constant 0 : i32
    %c0_i32_1 = arith.constant 0 : i32
    return %arg0, %c0_i32, %c0_i32_0 : i32, i32, i32
  }
  func.func @transform_4(%arg0: i32) -> (i32, i32, i32) {
    %c0_i32 = arith.constant 0 : i32
    %c0_i32_0 = arith.constant 0 : i32
    %c0_i32_1 = arith.constant 0 : i32
    %c0_i32_2 = arith.constant 0 : i32
    return %c0_i32, %c0_i32_0, %c0_i32_1 : i32, i32, i32
  }
}

</mosaic_0001>

<bundles_post_ra>
// kernel: rnn_model_forward.3
= control target key start
LH: loop header
LB: loop body
LE: loop exit
PB: predicated region body
PF: predicated region fallthrough
CT: control target
= control target key end

     0   :  { %s563_s0 = inlined_call_operand.vmem [shape: bf16[70,256], index: 0, kind: input, shape index: {}]   ;;  %s564_s1 = inlined_call_operand.vmem [shape: bf16[256,128], index: 1, kind: input, shape index: {}]   ;;  %s565_s2 = inlined_call_operand.vmem [shape: f32[1,128], index: 2, kind: input, shape index: {}]   ;;  %s566_s3 = inlined_call_operand.hbm [shape: f32[70,128], index: 3, kind: output, shape index: {}]  }
   0x1   :  { %v396_v0 = vld [vmem:[%s564_s1 + $0x40] sm:$0xff]   ;;  %v398_v2 = vld [vmem:[%s564_s1 + $0x48] sm:$0xff]   ;;  %v400_v4 = vld [vmem:[%s564_s1 + $0x50] sm:$0xff]  }
   0x2   :  { %v397_v1 = vld [vmem:[%s564_s1] sm:$0xff]   ;;  %331 = vmatprep.subr.bf16.mxu0 %v396_v0  ;;  %377 = vmatprep.subr.bf16.mxu1 %v396_v0  ;;  %v399_v3 = vld [vmem:[%s564_s1 + $0x8] sm:$0xff]   ;;  %v401_v5 = vld [vmem:[%s564_s1 + $0x10] sm:$0xff]  }
   0x3   :  { %332 = vmatpush3.bf16.msra.mxu0 %v397_v1  ;;  %385 = vmatpush3.bf16.msra.mxu1 %v397_v1  ;;  %v402_v6 = vld [vmem:[%s564_s1 + $0x58] sm:$0xff]   ;;  %v404_v8 = vld [vmem:[%s564_s1 + $0x60] sm:$0xff]   ;;  %v406_v10 = vld [vmem:[%s564_s1 + $0x68] sm:$0xff]  }
   0x4   :  { %333 = vmatprep.subr.bf16.mxu0 %v398_v2  ;;  %378 = vmatprep.subr.bf16.mxu1 %v398_v2  ;;  %v403_v7 = vld [vmem:[%s564_s1 + $0x18] sm:$0xff]   ;;  %v405_v9 = vld [vmem:[%s564_s1 + $0x20] sm:$0xff]   ;;  %v407_v13 = vld [vmem:[%s564_s1 + $0x28] sm:$0xff]  }
   0x5   :  { %v414_v11 = vld [vmem:[%s563_s0 + $0x4] ss:$8 sps:$4 sm:$0xff]   ;;  %v417_v12 = vld [vmem:[%s563_s0 + $0x34] ss:$8 sps:$4 sm:$0xff]  }
   0x6   :  { %v408_v14 = vld [vmem:[%s564_s1 + $0x70] sm:$0xff]   ;;  %239 = vmatprep.mubr.bf16.mxu0 %v414_v11  ;;  %263 = vmatprep.mubr.bf16.mxu1 %v417_v12 }
   0x7   :  { %334 = vmatpush3.bf16.msra.mxu0 %v399_v3  ;;  %386 = vmatpush3.bf16.msra.mxu1 %v399_v3 }
   0x8   :  { %335 = vmatprep.subr.bf16.mxu0 %v400_v4  ;;  %379 = vmatprep.subr.bf16.mxu1 %v400_v4 }
   0xb   :  { %336 = vmatpush3.bf16.msra.mxu0 %v401_v5  ;;  %387 = vmatpush3.bf16.msra.mxu1 %v401_v5 }
   0xc   :  { %337 = vmatprep.subr.bf16.mxu0 %v402_v6  ;;  %380 = vmatprep.subr.bf16.mxu1 %v402_v6 }
   0xf   :  { %338 = vmatpush3.bf16.msra.mxu0 %v403_v7  ;;  %388 = vmatpush3.bf16.msra.mxu1 %v403_v7 }
  0x10   :  { %339 = vmatprep.subr.bf16.mxu0 %v404_v8  ;;  %381 = vmatprep.subr.bf16.mxu1 %v404_v8 }
  0x13   :  { %340 = vmatpush3.bf16.msra.mxu0 %v405_v9  ;;  %389 = vmatpush3.bf16.msra.mxu1 %v405_v9 }
  0x14   :  { %341 = vmatprep.subr.bf16.mxu0 %v406_v10  ;;  %382 = vmatprep.subr.bf16.mxu1 %v406_v10 }
  0x15   :  { %8 = vsyncpa [#allocation3], 0  ;;  %v409_v15 = vld [vmem:[%s564_s1 + $0x30] sm:$0xff]   ;;  %v410_v16 = vld [vmem:[%s564_s1 + $0x78] sm:$0xff]  }
  0x16   :  { %v411_v17 = vld [vmem:[%s564_s1 + $0x38] sm:$0xff]   ;;  %v24_v18 = vld [vmem:[%s563_s0 + $0x40] sm:$0x77] }
  0x17   :  { %342 = vmatpush3.bf16.msra.mxu0 %v407_v13  ;;  %390 = vmatpush3.bf16.msra.mxu1 %v407_v13  ;;  %v412_v19 = vld [vmem:[%s563_s0] ss:$8 sps:$4 sm:$0xff]   ;;  %v415_v20 = vld [vmem:[%s563_s0 + $0x30] ss:$8 sps:$4 sm:$0xff]   ;;  %v418_v21 = vld [vmem:[%s563_s0 + $0x14] ss:$8 sps:$4 sm:$0xff]   ;;  %v314_v22 = vcombine.high %v24_v18, %v24_v18  ;;  %v313_v24 = vcombine.low %v24_v18, %v24_v18 }
  0x18   :  { %343 = vmatprep.subr.bf16.mxu0 %v408_v14  ;;  %383 = vmatprep.subr.bf16.mxu1 %v408_v14  ;;  %v420_v23 = vld [vmem:[%s563_s0 + $0x10] ss:$8 sps:$4 sm:$0xff]   ;;  %v422_v25 = vld [vmem:[%s563_s0 + $0x24] ss:$8 sps:$4 sm:$0xff]   ;;  %v425_v26 = vld [vmem:[%s563_s0 + $0x20] ss:$8 sps:$4 sm:$0xff]  }
  0x19   :  { %v304_v29 = vld [vmem:[%s565_s2] ss:$0 sm:$0xff]  ;;  %s450_s0 = smov [#allocation2]  }
  0x1a   :  { %s293_s2 = sshll.u32 %s450_s0, 4  ;;  %s294_s2 = int_to_ptr.vmem [resolvable:$true] %s293_s2 }
  0x1b   :  { %344 = vmatpush3.bf16.msra.mxu0 %v409_v15  ;;  %391 = vmatpush3.bf16.msra.mxu1 %v409_v15  ;;  %s426_s9 = scalar_lea.vmem %s294_s2, 1152  ;;  %p431_p1 = scmp.lt.s32.totalorder %s294_s2, %s294_s2 }
  0x1c   :  { %345 = vmatprep.subr.bf16.mxu0 %v410_v16  ;;  %384 = vmatprep.subr.bf16.mxu1 %v410_v16  ;;  %p427_p0 = scmp.ne.s32.totalorder %s294_s2, %s426_s9  ;;  %p432_p2 = scmp.lt.s32.totalorder %s426_s9, %s426_s9 }
  0x1e   :  { %p433_p3 = por %p432_p2, %p431_p1 }
  0x1f   :  { %346 = vmatpush3.bf16.msra.mxu0 %v411_v17  ;;  %392 = vmatpush3.bf16.msra.mxu1 %v411_v17 }
  0x20   :  { %p434_p4 = pnand %p433_p3, %p427_p0 }
  0x22   :  { %240 = vmatmul.mubr.bf16.vlgmr.msra.gmra.mrb[0].mxu0 %v412_v19  ;;  %264 = vmatmul.mubr.bf16.vlgmr.msra.gmra.mrb[0].mxu1 %v415_v20 }
  0x23   :  { %247 = vmatprep.mubr.bf16.mxu0 %v418_v21  ;;  %271 = vmatprep.mubr.bf16.mxu1 %v314_v22 }
  0x2a   :  { %248 = vmatmul.mubr.bf16.gmra.mrb[4].mxu0 %v420_v23  ;;  %272 = vmatmul.mubr.bf16.gmra.mrb[4].mxu1 %v313_v24 }
  0x2b   :  { %255 = vmatprep.mubr.bf16.mxu0 %v422_v25 }
  0x32   :  { %256 = vmatmul.mubr.bf16.gmra.mrb[8].mxu0 %v425_v26 }
  0xf5   :  { %v347_v27 = vpop.f32.mrb[0].mxu0  ;;  %v365_v28 = vpop.f32.mrb[0].mxu1 }
  0xf6   :  { %v348_v30 = vpop.f32.mrb[1].mxu0  ;;  %v366_v31 = vpop.f32.mrb[1].mxu1 }
  0xf7   :  { %v349_v32 = vadd.f32 %v348_v30, %v347_v27  ;;  %v350_v33 = vpop.f32.mrb[2].mxu0  ;;  %v367_v34 = vadd.f32 %v366_v31, %v365_v28  ;;  %v368_v35 = vpop.f32.mrb[2].mxu1 }
  0xf8   :  { %v351_v36 = vpop.f32.mrb[3].mxu0  ;;  %v369_v37 = vpop.f32.mrb[3].mxu1 }
  0xf9   :  { %v242_v38 = vadd.f32 %v349_v32, %v304_v29  ;;  %v352_v39 = vadd.f32 %v351_v36, %v350_v33  ;;  %v266_v40 = vadd.f32 %v367_v34, %v304_v29  ;;  %v370_v41 = vadd.f32 %v369_v37, %v368_v35 }
  0xfb   :  { %279 = vst [vmem:[#allocation2] sm:$0xff] %v242_v38  ;;  %v245_v42 = vadd.f32 %v352_v39, %v304_v29  ;;  %285 = vst [vmem:[#allocation2 + $0x30] sm:$0xff] %v266_v40  ;;  %v269_v43 = vadd.f32 %v370_v41, %v304_v29 }
  0xfd   :  { %280 = vst [vmem:[#allocation2 + $0x8] sm:$0xff] %v245_v42  ;;  %v353_v44 = vpop.f32.mrb[4].mxu0  ;;  %286 = vst [vmem:[#allocation2 + $0x38] sm:$0xff] %v269_v43  ;;  %v371_v45 = vpop.f32.mrb[4].mxu1 }
  0xfe   :  { %v354_v46 = vpop.f32.mrb[5].mxu0  ;;  %v372_v47 = vpop.f32.mrb[5].mxu1 }
  0xff   :  { %v355_v48 = vadd.f32 %v354_v46, %v353_v44  ;;  %v356_v49 = vpop.f32.mrb[6].mxu0  ;;  %v373_v50 = vadd.f32 %v372_v47, %v371_v45  ;;  %v374_v51 = vpop.f32.mrb[6].mxu1 }
 0x100   :  { %v357_v52 = vpop.f32.mrb[7].mxu0  ;;  %v375_v53 = vpop.f32.mrb[7].mxu1 }
 0x101   :  { %v250_v54 = vadd.f32 %v355_v48, %v304_v29  ;;  %v358_v55 = vadd.f32 %v357_v52, %v356_v49  ;;  %v274_v56 = vadd.f32 %v373_v50, %v304_v29 }
 0x103   :  { %281 = vst [vmem:[#allocation2 + $0x10] sm:$0xff] %v250_v54  ;;  %v253_v57 = vadd.f32 %v358_v55, %v304_v29  ;;  %287 = vst [vmem:[#allocation2 + $0x40] sm:$0x3f] %v274_v56 }
 0x105   :  { %282 = vst [vmem:[#allocation2 + $0x18] sm:$0xff] %v253_v57  ;;  %v359_v58 = vpop.f32.mrb[8].mxu0 }
 0x106   :  { %v360_v59 = vpop.f32.mrb[9].mxu0 }
 0x107   :  { %v361_v60 = vadd.f32 %v360_v59, %v359_v58  ;;  %v362_v61 = vpop.f32.mrb[10].mxu0 }
 0x108   :  { %v363_v62 = vpop.f32.mrb[11].mxu0 }
 0x109   :  { %v258_v63 = vadd.f32 %v361_v60, %v304_v29  ;;  %v364_v0 = vadd.f32 %v363_v62, %v362_v61 }
 0x10b   :  { %283 = vst [vmem:[#allocation2 + $0x20] sm:$0xff] %v258_v63  ;;  %v261_v1 = vadd.f32 %v364_v0, %v304_v29 }
 0x10d   :  { %284 = vst [vmem:[#allocation2 + $0x28] sm:$0xff] %v261_v1 }
 0x10e   :  { %437 = shalt.err (!%p434_p4)
}
 0x10f   :  { %s438_s12 = scalar_lea.hbm %s566_s3, 1152 }
 0x110   :  { %p439_p5 = scmp.ne.s32.totalorder %s566_s3, %s438_s12  ;;  %p442_p6 = scmp.lt.u32.totalorder %s438_s12, %s566_s3 }
 0x112   :  { %p444_p7 = pnand %p442_p6, %p439_p5 }
 0x114   :  { %447 = shalt.err (!%p444_p7)
}
 0x115   :  { %s451_s17 = smov 128   ;;  %s452_s18 = smov 8  }
 0x116   :  { %299 = dma.vmem_to_hbm [thread:$0]  %s294_s2, 1152, %s566_s3, [#allocation3], %s451_s17, %s451_s17, %s452_s18  }
 0x117   :  { %448 = dma.done.wait [#allocation3], 1152  }
 0x118   :  { %449 = vsyncadd [#allocation3], 4294966144 }
 0x119   :  { %303 = vsyncpa [#allocation3], 1 }

// kernel: rnn_model_forward.2
= control target key start
LH: loop header
LB: loop body
LE: loop exit
PB: predicated region body
PF: predicated region fallthrough
CT: control target
= control target key end

     0   :  { %s14732_s0 = inlined_call_operand.vmem [shape: f32[35,2,256], index: 0, kind: input, shape index: {}]   ;;  %s14733_s1 = inlined_call_operand.vmem [shape: f32[1,2,256], index: 1, kind: input, shape index: {}]   ;;  %s14734_s2 = inlined_call_operand.vmem [shape: bf16[256,256], index: 2, kind: input, shape index: {}]   ;;  %s14735_s3 = inlined_call_operand.vmem [shape: bf16[35,2,256], index: 3, kind: output, shape index: {0}]   ;;  %s14736_s4 = inlined_call_operand.hbm [shape: f32[1,2,256], index: 4, kind: output, shape index: {1}]  }
   0x1   :  { %v12161_v0 = vld [vmem:[%s14734_s2 + $0x4] ss:$8 sps:$4 sm:$0xff]   ;;  %v12166_v1 = vld [vmem:[%s14734_s2] ss:$8 sps:$4 sm:$0xff]   ;;  %v12172_v2 = vld [vmem:[%s14734_s2 + $0x14] ss:$8 sps:$4 sm:$0xff]  }
   0x2   :  { %230 = vmatprep.subr.bf16.mxu0 %v12161_v0  ;;  %525 = vmatprep.subr.bf16.mxu1 %v12161_v0  ;;  %v12179_v3 = vld [vmem:[%s14734_s2 + $0x10] ss:$8 sps:$4 sm:$0xff]   ;;  %v12186_v4 = vld [vmem:[%s14734_s2 + $0x24] ss:$8 sps:$4 sm:$0xff]   ;;  %v12193_v5 = vld [vmem:[%s14734_s2 + $0x20] ss:$8 sps:$4 sm:$0xff]  }
   0x3   :  { %231 = vmatpush1.bf16.msra.mxu0 %v12166_v1  ;;  %526 = vmatpush1.bf16.msra.mxu1 %v12166_v1  ;;  %v12200_v6 = vld [vmem:[%s14734_s2 + $0x34] ss:$8 sps:$4 sm:$0xff]   ;;  %v12207_v7 = vld [vmem:[%s14734_s2 + $0x30] ss:$8 sps:$4 sm:$0xff]   ;;  %v12214_v8 = vld [vmem:[%s14734_s2 + $0x44] ss:$8 sps:$4 sm:$0xff]  }
   0x4   :  { %232 = vmatprep.subr.bf16.mxu0 %v12172_v2  ;;  %527 = vmatprep.subr.bf16.mxu1 %v12172_v2  ;;  %v12221_v9 = vld [vmem:[%s14734_s2 + $0x40] ss:$8 sps:$4 sm:$0xff]   ;;  %v12228_v10 = vld [vmem:[%s14734_s2 + $0x54] ss:$8 sps:$4 sm:$0xff]   ;;  %v12235_v11 = vld [vmem:[%s14734_s2 + $0x50] ss:$8 sps:$4 sm:$0xff]  }
   0x5   :  { %v12242_v12 = vld [vmem:[%s14734_s2 + $0x64] ss:$8 sps:$4 sm:$0xff]   ;;  %v12248_v13 = vld [vmem:[%s14734_s2 + $0x60] ss:$8 sps:$4 sm:$0xff]   ;;  %v12256_v15 = vld [vmem:[%s14734_s2 + $0x74] ss:$8 sps:$4 sm:$0xff]  }
   0x6   :  { %v21_v14 = vld [vmem:[%s14733_s1] sm:$0xf]  ;;  %v12265_v16 = vld [vmem:[%s14734_s2 + $0x70] ss:$8 sps:$4 sm:$0xff]   ;;  %v12270_v17 = vld [vmem:[%s14734_s2 + $0x84] ss:$8 sps:$4 sm:$0xff]  }
   0x7   :  { %233 = vmatpush1.bf16.msra.mxu0 %v12179_v3  ;;  %528 = vmatpush1.bf16.msra.mxu1 %v12179_v3  ;;  %22 = vst [vmem:[#allocation2] sm:$0xf] %v21_v14  ;;  %v12279_v18 = vld [vmem:[%s14734_s2 + $0x80] ss:$8 sps:$4 sm:$0xff]   ;;  %v12284_v20 = vld [vmem:[%s14734_s2 + $0x94] ss:$8 sps:$4 sm:$0xff]  }
   0x8   :  { %234 = vmatprep.subr.bf16.mxu0 %v12186_v4  ;;  %529 = vmatprep.subr.bf16.mxu1 %v12186_v4  ;;  %v12293_v23 = vld [vmem:[%s14734_s2 + $0x90] ss:$8 sps:$4 sm:$0xff]   ;;  %v12298_v24 = vld [vmem:[%s14734_s2 + $0xa4] ss:$8 sps:$4 sm:$0xff]   ;;  %v12307_v25 = vld [vmem:[%s14734_s2 + $0xa0] ss:$8 sps:$4 sm:$0xff]  }
   0x9   :  { %v12312_v26 = vld [vmem:[%s14734_s2 + $0xb4] ss:$8 sps:$4 sm:$0xff]   ;;  %v12321_v27 = vld [vmem:[%s14734_s2 + $0xb0] ss:$8 sps:$4 sm:$0xff]   ;;  %v12326_v28 = vld [vmem:[%s14734_s2 + $0xc4] ss:$8 sps:$4 sm:$0xff]  }
   0xa   :  { %v12335_v29 = vld [vmem:[%s14734_s2 + $0xc0] ss:$8 sps:$4 sm:$0xff]   ;;  %v12340_v30 = vld [vmem:[%s14734_s2 + $0xd4] ss:$8 sps:$4 sm:$0xff]   ;;  %v12349_v31 = vld [vmem:[%s14734_s2 + $0xd0] ss:$8 sps:$4 sm:$0xff]  }
   0xb   :  { %235 = vmatpush1.bf16.msra.mxu0 %v12193_v5  ;;  %530 = vmatpush1.bf16.msra.mxu1 %v12193_v5  ;;  %v12354_v32 = vld [vmem:[%s14734_s2 + $0xe4] ss:$8 sps:$4 sm:$0xff]   ;;  %v12363_v33 = vld [vmem:[%s14734_s2 + $0xe0] ss:$8 sps:$4 sm:$0xff]   ;;  %v12368_v34 = vld [vmem:[%s14734_s2 + $0xf4] ss:$8 sps:$4 sm:$0xff]  }
   0xc   :  { %236 = vmatprep.subr.bf16.mxu0 %v12200_v6  ;;  %531 = vmatprep.subr.bf16.mxu1 %v12200_v6  ;;  %v12377_v35 = vld [vmem:[%s14734_s2 + $0xf0] ss:$8 sps:$4 sm:$0xff]  }
   0xe   :  { %v10404_v19 = vld.sshfl [vmem:[#allocation2] sm:$0x33 pattern:$0x76325410] }
   0xf   :  { %237 = vmatpush1.bf16.msra.mxu0 %v12207_v7  ;;  %532 = vmatpush1.bf16.msra.mxu1 %v12207_v7  ;;  %v33_v21 = vcombine.high %v10404_v19, %v10404_v19  ;;  %v36_v36 = vpack.c.bf16 %v10404_v19, %v10404_v19 }
  0x10   :  { %238 = vmatprep.subr.bf16.mxu0 %v12214_v8  ;;  %533 = vmatprep.subr.bf16.mxu1 %v12214_v8 }
  0x11   :  { %v37_v22 = vpack.c.bf16 %v33_v21, %v33_v21 }
  0x13   :  { %239 = vmatpush1.bf16.msra.mxu0 %v12221_v9  ;;  %534 = vmatpush1.bf16.msra.mxu1 %v12221_v9 }
  0x14   :  { %240 = vmatprep.subr.bf16.mxu0 %v12228_v10  ;;  %535 = vmatprep.subr.bf16.mxu1 %v12228_v10 }
  0x15   :  { %262 = vmatprep.mubr.bf16.mxu0 %v37_v22 }
  0x17   :  { %241 = vmatpush1.bf16.msra.mxu0 %v12235_v11  ;;  %536 = vmatpush1.bf16.msra.mxu1 %v12235_v11 }
  0x18   :  { %242 = vmatprep.subr.bf16.mxu0 %v12242_v12  ;;  %537 = vmatprep.subr.bf16.mxu1 %v12242_v12 }
  0x1b   :  { %243 = vmatpush1.bf16.msra.mxu0 %v12248_v13  ;;  %538 = vmatpush1.bf16.msra.mxu1 %v12248_v13 }
  0x1c   :  { %244 = vmatprep.subr.bf16.mxu0 %v12256_v15  ;;  %539 = vmatprep.subr.bf16.mxu1 %v12256_v15 }
  0x1f   :  { %245 = vmatpush1.bf16.msra.mxu0 %v12265_v16  ;;  %540 = vmatpush1.bf16.msra.mxu1 %v12265_v16 }
  0x20   :  { %246 = vmatprep.subr.bf16.mxu0 %v12270_v17  ;;  %541 = vmatprep.subr.bf16.mxu1 %v12270_v17 }
  0x23   :  { %247 = vmatpush1.bf16.msra.mxu0 %v12279_v18  ;;  %542 = vmatpush1.bf16.msra.mxu1 %v12279_v18 }
  0x24   :  { %248 = vmatprep.subr.bf16.mxu0 %v12284_v20  ;;  %543 = vmatprep.subr.bf16.mxu1 %v12284_v20 }
  0x27   :  { %249 = vmatpush1.bf16.msra.mxu0 %v12293_v23  ;;  %544 = vmatpush1.bf16.msra.mxu1 %v12293_v23 }
  0x28   :  { %250 = vmatprep.subr.bf16.mxu0 %v12298_v24  ;;  %545 = vmatprep.subr.bf16.mxu1 %v12298_v24 }
  0x2b   :  { %251 = vmatpush1.bf16.msra.mxu0 %v12307_v25  ;;  %546 = vmatpush1.bf16.msra.mxu1 %v12307_v25 }
  0x2c   :  { %252 = vmatprep.subr.bf16.mxu0 %v12312_v26  ;;  %547 = vmatprep.subr.bf16.mxu1 %v12312_v26 }
  0x2f   :  { %253 = vmatpush1.bf16.msra.mxu0 %v12321_v27  ;;  %548 = vmatpush1.bf16.msra.mxu1 %v12321_v27 }
  0x30   :  { %254 = vmatprep.subr.bf16.mxu0 %v12326_v28  ;;  %549 = vmatprep.subr.bf16.mxu1 %v12326_v28 }
  0x33   :  { %255 = vmatpush1.bf16.msra.mxu0 %v12335_v29  ;;  %550 = vmatpush1.bf16.msra.mxu1 %v12335_v29 }
  0x34   :  { %256 = vmatprep.subr.bf16.mxu0 %v12340_v30  ;;  %551 = vmatprep.subr.bf16.mxu1 %v12340_v30 }
  0x37   :  { %257 = vmatpush1.bf16.msra.mxu0 %v12349_v31  ;;  %552 = vmatpush1.bf16.msra.mxu1 %v12349_v31 }
  0x38   :  { %258 = vmatprep.subr.bf16.mxu0 %v12354_v32  ;;  %553 = vmatprep.subr.bf16.mxu1 %v12354_v32 }
  0x3b   :  { %259 = vmatpush1.bf16.msra.mxu0 %v12363_v33  ;;  %554 = vmatpush1.bf16.msra.mxu1 %v12363_v33 }
  0x3c   :  { %260 = vmatprep.subr.bf16.mxu0 %v12368_v34  ;;  %555 = vmatprep.subr.bf16.mxu1 %v12368_v34 }
  0x3f   :  { %261 = vmatpush1.bf16.msra.mxu0 %v12377_v35  ;;  %556 = vmatpush1.bf16.msra.mxu1 %v12377_v35 }
  0x40   :  { %821 = vmatprep.subr.bf16.mxu0 %v12161_v0  ;;  %1117 = vmatprep.subr.bf16.mxu1 %v12161_v0 }
  0x42   :  { %263 = vmatmul.mubr.bf16.vlgmr.msra.gmra.mrb[0].mxu0 %v36_v36 }
  0x43   :  { %822 = vmatpush1.bf16.msra.mxu0 %v12166_v1 }
  0x44   :  { %823 = vmatprep.subr.bf16.mxu0 %v12172_v2 }
  0x47   :  { %824 = vmatpush1.bf16.msra.mxu0 %v12179_v3 }
  0x48   :  { %825 = vmatprep.subr.bf16.mxu0 %v12186_v4 }
  0x4b   :  { %826 = vmatpush1.bf16.msra.mxu0 %v12193_v5 }
  0x4c   :  { %827 = vmatprep.subr.bf16.mxu0 %v12200_v6 }
  0x4f   :  { %828 = vmatpush1.bf16.msra.mxu0 %v12207_v7 }
  0x50   :  { %829 = vmatprep.subr.bf16.mxu0 %v12214_v8 }
  0x53   :  { %830 = vmatpush1.bf16.msra.mxu0 %v12221_v9 }
  0x54   :  { %831 = vmatprep.subr.bf16.mxu0 %v12228_v10 }
  0x55   :  { %10 = vsyncpa [#allocation4], 0  ;;  %v12130_v37 = vmov 1983009808   ;;  %v277_v39 = vlaneseq  ;;  %v24_v47 = vld [vmem:[%s14732_s0] sm:$0xf] }
  0x56   :  { %v275_v38 = vunpack.c.l.s4 %v12130_v37  ;;  %v12131_v51 = vmov 1966171168   ;;  %v10439_v22 = vld [vmem:[%s14732_s0 + $0x4] sm:$0xf]  ;;  %s12132_s9 = smov [#allocation3]  }
  0x57   :  { %832 = vmatpush1.bf16.msra.mxu0 %v12235_v11  ;;  %v278_v41 = vshrl.u32 %v277_v39, 7  ;;  %v302_v52 = vunpack.c.l.s4 %v12131_v51  ;;  %s10394_s10 = sshll.u32 %s12132_s9, 4  ;;  %s10395_s10 = int_to_ptr.vmem [resolvable:$true] %s10394_s10 }
  0x58   :  { %833 = vmatprep.subr.bf16.mxu0 %v12242_v12  ;;  %v276_v40 = vunpack.c.0.s8 %v275_v38  ;;  %p12111_p1 = scmp.lt.s32.totalorder %s10395_s10, %s10395_s10 }
  0x59   :  { %v303_v53 = vunpack.c.0.s8 %v302_v52 }
  0x5a   :  { %v12419_v43 = vsub.s32 %v276_v40, %v278_v41 }
  0x5b   :  { %834 = vmatpush1.bf16.msra.mxu0 %v12248_v13  ;;  %v12426_v57 = vsub.s32 %v303_v53, %v278_v41 }
  0x5c   :  { %835 = vmatprep.subr.bf16.mxu0 %v12256_v15 }
  0x5f   :  { %836 = vmatpush1.bf16.msra.mxu0 %v12265_v16 }
  0x60   :  { %837 = vmatprep.subr.bf16.mxu0 %v12270_v17 }
  0x63   :  { %838 = vmatpush1.bf16.msra.mxu0 %v12279_v18 }
  0x64   :  { %839 = vmatprep.subr.bf16.mxu0 %v12284_v20 }
  0x67   :  { %840 = vmatpush1.bf16.msra.mxu0 %v12293_v23 }
  0x68   :  { %841 = vmatprep.subr.bf16.mxu0 %v12298_v24 }
  0x6b   :  { %842 = vmatpush1.bf16.msra.mxu0 %v12307_v25 }
  0x6c   :  { %843 = vmatprep.subr.bf16.mxu0 %v12312_v26 }
  0x6f   :  { %844 = vmatpush1.bf16.msra.mxu0 %v12321_v27 }
  0x70   :  { %845 = vmatprep.subr.bf16.mxu0 %v12326_v28 }
  0x73   :  { %846 = vmatpush1.bf16.msra.mxu0 %v12335_v29 }
  0x74   :  { %847 = vmatprep.subr.bf16.mxu0 %v12340_v30 }
  0x77   :  { %848 = vmatpush1.bf16.msra.mxu0 %v12349_v31 }
  0x78   :  { %849 = vmatprep.subr.bf16.mxu0 %v12354_v32 }
  0x7b   :  { %850 = vmatpush1.bf16.msra.mxu0 %v12363_v33 }
  0x7c   :  { %851 = vmatprep.subr.bf16.mxu0 %v12368_v34 }
  0x7f   :  { %852 = vmatpush1.bf16.msra.mxu0 %v12377_v35 }
  0x80   :  { %1413 = vmatprep.subr.bf16.mxu0 %v12161_v0 }
 0x115   :  { %v264_v42 = vpop.f32.mrb[0].mxu0 }
 0x116   :  { %v266_v44 = vpop.f32.mrb[1].mxu0 }
 0x117   :  { %v273_v45 = vcombine.low %v264_v42, %v266_v44  ;;  %v268_v46 = vpop.f32.mrb[2].mxu0 }
 0x118   :  { %v269_v48 = vpop.f32.mrb[3].mxu0 }
 0x119   :  { %v280_v49 = vrot.slane %v273_v45, %v12419_v43 }
 0x11b   :  { %v282_v50 = vadd.f32 %v280_v49, %v24_v47  ;;  %v12599_v49 = vld [vmem:[%s14734_s2 + $0x74] ss:$8 sps:$4 sm:$0xff]  }
 0x11d   :  { %12036 = vtanh.f32 %v282_v50  ;;  %v12605_v50 = vld [vmem:[%s14734_s2 + $0x70] ss:$8 sps:$4 sm:$0xff]  }
 0x127   :  { %v12037_v54 = vpop.eup %12036 }
 0x128   :  { %284 = vst [vmem:[#allocation2] sm:$0xf] %v12037_v54  ;;  %v292_v55 = vrot.slane %v12037_v54, %v12419_v43 }
 0x12a   :  { %v293_v56 = vcombine.high %v292_v55, %v292_v55 }
 0x12c   :  { %v10437_v58 = vpack.c.bf16 %v293_v56, %v292_v55  ;;  %v10511_v55 = vld [vmem:[%s14732_s0 + $0xc] sm:$0xf] }
 0x12e   :  { %v307_v59 = vrot.slane %v10437_v58, %v12426_v57 }
 0x12f   :  { %v10440_v60 = vld.sshfl [vmem:[#allocation2] sm:$0x33 pattern:$0x76325410] }
 0x130   :  { %10438 = vst.sshfl [vmem:[%s14735_s3] sm:$0x5 pattern:$0x73625140] %v307_v59  ;;  %v328_v61 = vcombine.high %v10440_v60, %v10440_v60  ;;  %v331_v63 = vpack.c.bf16 %v10440_v60, %v10440_v60 }
 0x132   :  { %v332_v62 = vpack.c.bf16 %v328_v61, %v328_v61 }
 0x134   :  { %557 = vmatprep.mubr.bf16.mxu1 %v332_v62 }
 0x135   :  { %558 = vmatmul.mubr.bf16.vlgmr.msra.gmra.mrb[0].mxu1 %v331_v63 }
 0x136   :  { %1118 = vmatpush1.bf16.msra.mxu1 %v12166_v1 }
 0x137   :  { %1119 = vmatprep.subr.bf16.mxu1 %v12172_v2 }
 0x13a   :  { %1120 = vmatpush1.bf16.msra.mxu1 %v12179_v3 }
 0x13b   :  { %1121 = vmatprep.subr.bf16.mxu1 %v12186_v4 }
 0x13e   :  { %1122 = vmatpush1.bf16.msra.mxu1 %v12193_v5 }
 0x13f   :  { %1123 = vmatprep.subr.bf16.mxu1 %v12200_v6 }
 0x142   :  { %1124 = vmatpush1.bf16.msra.mxu1 %v12207_v7 }
 0x143   :  { %1125 = vmatprep.subr.bf16.mxu1 %v12214_v8 }
 0x146   :  { %1126 = vmatpush1.bf16.msra.mxu1 %v12221_v9 }
 0x147   :  { %1127 = vmatprep.subr.bf16.mxu1 %v12228_v10 }
 0x14a   :  { %1128 = vmatpush1.bf16.msra.mxu1 %v12235_v11 }
 0x14b   :  { %1129 = vmatprep.subr.bf16.mxu1 %v12242_v12 }
 0x14e   :  { %1130 = vmatpush1.bf16.msra.mxu1 %v12248_v13 }
 0x14f   :  { %1131 = vmatprep.subr.bf16.mxu1 %v12256_v15 }
 0x152   :  { %1132 = vmatpush1.bf16.msra.mxu1 %v12265_v16 }
 0x153   :  { %1133 = vmatprep.subr.bf16.mxu1 %v12270_v17 }
 0x156   :  { %1134 = vmatpush1.bf16.msra.mxu1 %v12279_v18 }
 0x157   :  { %1135 = vmatprep.subr.bf16.mxu1 %v12284_v20 }
 0x15a   :  { %1136 = vmatpush1.bf16.msra.mxu1 %v12293_v23 }
 0x15b   :  { %1137 = vmatprep.subr.bf16.mxu1 %v12298_v24 }
 0x15e   :  { %1138 = vmatpush1.bf16.msra.mxu1 %v12307_v25 }
 0x15f   :  { %1139 = vmatprep.subr.bf16.mxu1 %v12312_v26 }
 0x162   :  { %1140 = vmatpush1.bf16.msra.mxu1 %v12321_v27 }
 0x163   :  { %1141 = vmatprep.subr.bf16.mxu1 %v12326_v28 }
 0x166   :  { %1142 = vmatpush1.bf16.msra.mxu1 %v12335_v29 }
 0x167   :  { %1143 = vmatprep.subr.bf16.mxu1 %v12340_v30 }
 0x16a   :  { %1144 = vmatpush1.bf16.msra.mxu1 %v12349_v31 }
 0x16b   :  { %1145 = vmatprep.subr.bf16.mxu1 %v12354_v32 }
 0x16e   :  { %1146 = vmatpush1.bf16.msra.mxu1 %v12363_v33 }
 0x16f   :  { %1147 = vmatprep.subr.bf16.mxu1 %v12368_v34 }
 0x172   :  { %1148 = vmatpush1.bf16.msra.mxu1 %v12377_v35 }
 0x208   :  { %v559_v0 = vpop.f32.mrb[0].mxu1 }
 0x209   :  { %v561_v14 = vpop.f32.mrb[1].mxu1 }
 0x20a   :  { %v568_v19 = vcombine.low %v559_v0, %v561_v14  ;;  %v563_v21 = vpop.f32.mrb[2].mxu1 }
 0x20b   :  { %v564_v36 = vpop.f32.mrb[3].mxu1 }
 0x20c   :  { %v575_v37 = vrot.slane %v568_v19, %v12419_v43  ;;  %v12636_v36 = vld [vmem:[%s14734_s2 + $0x84] ss:$8 sps:$4 sm:$0xff]  }
 0x20e   :  { %v577_v38 = vadd.f32 %v10439_v22, %v575_v37  ;;  %v12641_v37 = vld [vmem:[%s14734_s2 + $0x80] ss:$8 sps:$4 sm:$0xff]  }
 0x210   :  { %12038 = vtanh.f32 %v577_v38  ;;  %v12650_v38 = vld [vmem:[%s14734_s2 + $0x94] ss:$8 sps:$4 sm:$0xff]  }
 0x21a   :  { %v12039_v39 = vpop.eup %12038 }
 0x21b   :  { %579 = vst [vmem:[#allocation2] sm:$0xf] %v12039_v39  ;;  %v587_v40 = vrot.slane %v12039_v39, %v12419_v43  ;;  %v12655_v39 = vld [vmem:[%s14734_s2 + $0x90] ss:$8 sps:$4 sm:$0xff]  }
 0x21d   :  { %v588_v41 = vcombine.high %v587_v40, %v587_v40 }
 0x21f   :  { %v10473_v42 = vpack.c.bf16 %v588_v41, %v587_v40  ;;  %v12664_v40 = vld [vmem:[%s14734_s2 + $0xa4] ss:$8 sps:$4 sm:$0xff]   ;;  %v12669_v41 = vld [vmem:[%s14734_s2 + $0xa0] ss:$8 sps:$4 sm:$0xff]  }
 0x221   :  { %v602_v44 = vrot.slane %v10473_v42, %v12426_v57  ;;  %v12678_v42 = vld [vmem:[%s14734_s2 + $0xb4] ss:$8 sps:$4 sm:$0xff]  }
 0x222   :  { %v10476_v45 = vld.sshfl [vmem:[#allocation2] sm:$0x33 pattern:$0x76325410] }
 0x223   :  { %11663 = vst.sshfl [vmem:[%s14735_s3 + $0x2] sm:$0x5 pattern:$0x73625140] %v602_v44  ;;  %v624_v46 = vcombine.high %v10476_v45, %v10476_v45  ;;  %v627_v48 = vpack.c.bf16 %v10476_v45, %v10476_v45  ;;  %v12683_v44 = vld [vmem:[%s14734_s2 + $0xb0] ss:$8 sps:$4 sm:$0xff]  }
 0x224   :  { %v12692_v45 = vld [vmem:[%s14734_s2 + $0xc4] ss:$8 sps:$4 sm:$0xff]  }
 0x225   :  { %v628_v47 = vpack.c.bf16 %v624_v46, %v624_v46  ;;  %v12697_v46 = vld [vmem:[%s14734_s2 + $0xc0] ss:$8 sps:$4 sm:$0xff]  }
 0x227   :  { %853 = vmatprep.mubr.bf16.mxu0 %v628_v47  ;;  %v12706_v47 = vld [vmem:[%s14734_s2 + $0xd4] ss:$8 sps:$4 sm:$0xff]  }
 0x228   :  { %854 = vmatmul.mubr.bf16.vlgmr.msra.gmra.mrb[4].mxu0 %v627_v48  ;;  %v12711_v48 = vld [vmem:[%s14734_s2 + $0xd0] ss:$8 sps:$4 sm:$0xff]  }
 0x229   :  { %1414 = vmatpush1.bf16.msra.mxu0 %v12166_v1 }
 0x22a   :  { %1415 = vmatprep.subr.bf16.mxu0 %v12172_v2 }
 0x22d   :  { %1416 = vmatpush1.bf16.msra.mxu0 %v12179_v3 }
 0x22e   :  { %1417 = vmatprep.subr.bf16.mxu0 %v12186_v4 }
 0x231   :  { %1418 = vmatpush1.bf16.msra.mxu0 %v12193_v5  ;;  %v10475_v5 = vld [vmem:[%s14732_s0 + $0x8] sm:$0xf] }
 0x232   :  { %1419 = vmatprep.subr.bf16.mxu0 %v12200_v6 }
 0x235   :  { %1420 = vmatpush1.bf16.msra.mxu0 %v12207_v7 }
 0x236   :  { %1421 = vmatprep.subr.bf16.mxu0 %v12214_v8 }
 0x239   :  { %1422 = vmatpush1.bf16.msra.mxu0 %v12221_v9 }
 0x23a   :  { %1423 = vmatprep.subr.bf16.mxu0 %v12228_v10 }
 0x23d   :  { %1424 = vmatpush1.bf16.msra.mxu0 %v12235_v11 }
 0x23e   :  { %1425 = vmatprep.subr.bf16.mxu0 %v12242_v12 }
 0x241   :  { %1426 = vmatpush1.bf16.msra.mxu0 %v12248_v13 }
 0x242   :  { %1427 = vmatprep.subr.bf16.mxu0 %v12256_v15 }
 0x245   :  { %1428 = vmatpush1.bf16.msra.mxu0 %v12265_v16 }
 0x246   :  { %1429 = vmatprep.subr.bf16.mxu0 %v12270_v17 }
 0x249   :  { %1430 = vmatpush1.bf16.msra.mxu0 %v12279_v18 }
 0x24a   :  { %1431 = vmatprep.subr.bf16.mxu0 %v12284_v20  ;;  %v12515_v20 = vld [vmem:[%s14734_s2] ss:$8 sps:$4 sm:$0xff]  }
 0x24d   :  { %1432 = vmatpush1.bf16.msra.mxu0 %v12293_v23  ;;  %v12520_v23 = vld [vmem:[%s14734_s2 + $0x4] ss:$8 sps:$4 sm:$0xff]  }
 0x24e   :  { %1433 = vmatprep.subr.bf16.mxu0 %v12298_v24  ;;  %v12525_v24 = vld [vmem:[%s14734_s2 + $0x14] ss:$8 sps:$4 sm:$0xff]   ;;  %1709 = vmatprep.subr.bf16.mxu1 %v12520_v23 }
 0x251   :  { %1434 = vmatpush1.bf16.msra.mxu0 %v12307_v25  ;;  %v12533_v25 = vld [vmem:[%s14734_s2 + $0x10] ss:$8 sps:$4 sm:$0xff]  }
 0x252   :  { %1435 = vmatprep.subr.bf16.mxu0 %v12312_v26  ;;  %v12539_v26 = vld [vmem:[%s14734_s2 + $0x24] ss:$8 sps:$4 sm:$0xff]  }
 0x255   :  { %1436 = vmatpush1.bf16.msra.mxu0 %v12321_v27  ;;  %v12545_v27 = vld [vmem:[%s14734_s2 + $0x20] ss:$8 sps:$4 sm:$0xff]  }
 0x256   :  { %1437 = vmatprep.subr.bf16.mxu0 %v12326_v28  ;;  %v12551_v28 = vld [vmem:[%s14734_s2 + $0x34] ss:$8 sps:$4 sm:$0xff]  }
 0x259   :  { %1438 = vmatpush1.bf16.msra.mxu0 %v12335_v29  ;;  %v12557_v29 = vld [vmem:[%s14734_s2 + $0x30] ss:$8 sps:$4 sm:$0xff]  }
 0x25a   :  { %1439 = vmatprep.subr.bf16.mxu0 %v12340_v30  ;;  %v12563_v30 = vld [vmem:[%s14734_s2 + $0x44] ss:$8 sps:$4 sm:$0xff]  }
 0x25d   :  { %1440 = vmatpush1.bf16.msra.mxu0 %v12349_v31  ;;  %v12569_v31 = vld [vmem:[%s14734_s2 + $0x40] ss:$8 sps:$4 sm:$0xff]  }
 0x25e   :  { %1441 = vmatprep.subr.bf16.mxu0 %v12354_v32  ;;  %v12575_v32 = vld [vmem:[%s14734_s2 + $0x54] ss:$8 sps:$4 sm:$0xff]  }
 0x261   :  { %1442 = vmatpush1.bf16.msra.mxu0 %v12363_v33  ;;  %v12581_v33 = vld [vmem:[%s14734_s2 + $0x50] ss:$8 sps:$4 sm:$0xff]  }
 0x262   :  { %1443 = vmatprep.subr.bf16.mxu0 %v12368_v34  ;;  %v12587_v34 = vld [vmem:[%s14734_s2 + $0x64] ss:$8 sps:$4 sm:$0xff]  }
 0x265   :  { %1444 = vmatpush1.bf16.msra.mxu0 %v12377_v35  ;;  %v12593_v35 = vld [vmem:[%s14734_s2 + $0x60] ss:$8 sps:$4 sm:$0xff]  }
 0x266   :  { %2005 = vmatprep.subr.bf16.mxu0 %v12520_v23 }
 0x2fb   :  { %v855_v1 = vpop.f32.mrb[4].mxu0 }
 0x2fc   :  { %v857_v2 = vpop.f32.mrb[5].mxu0 }
 0x2fd   :  { %v864_v3 = vcombine.low %v855_v1, %v857_v2  ;;  %v859_v4 = vpop.f32.mrb[6].mxu0  ;;  %v12720_v1 = vld [vmem:[%s14734_s2 + $0xe4] ss:$8 sps:$4 sm:$0xff]   ;;  %v12725_v2 = vld [vmem:[%s14734_s2 + $0xe0] ss:$8 sps:$4 sm:$0xff]  }
 0x2fe   :  { %v860_v6 = vpop.f32.mrb[7].mxu0  ;;  %v12739_v4 = vld [vmem:[%s14734_s2 + $0xf0] ss:$8 sps:$4 sm:$0xff]  }
 0x2ff   :  { %v871_v7 = vrot.slane %v864_v3, %v12419_v43  ;;  %v12734_v3 = vld [vmem:[%s14734_s2 + $0xf4] ss:$8 sps:$4 sm:$0xff]  }
 0x301   :  { %v873_v8 = vadd.f32 %v10475_v5, %v871_v7 }
 0x303   :  { %12040 = vtanh.f32 %v873_v8 }
 0x30d   :  { %v12041_v9 = vpop.eup %12040 }
 0x30e   :  { %875 = vst [vmem:[#allocation2] sm:$0xf] %v12041_v9  ;;  %v883_v10 = vrot.slane %v12041_v9, %v12419_v43  ;;  %v10547_v9 = vld [vmem:[%s14732_s0 + $0x10] sm:$0xf] }
 0x310   :  { %v884_v11 = vcombine.high %v883_v10, %v883_v10 }
 0x312   :  { %v10509_v12 = vpack.c.bf16 %v884_v11, %v883_v10 }
 0x314   :  { %v898_v13 = vrot.slane %v10509_v12, %v12426_v57 }
 0x315   :  { %v10512_v15 = vld.sshfl [vmem:[#allocation2] sm:$0x33 pattern:$0x76325410] }
 0x316   :  { %11664 = vst.sshfl [vmem:[%s14735_s3 + $0x4] sm:$0x5 pattern:$0x73625140] %v898_v13  ;;  %v920_v16 = vcombine.high %v10512_v15, %v10512_v15  ;;  %v923_v18 = vpack.c.bf16 %v10512_v15, %v10512_v15 }
 0x318   :  { %v924_v17 = vpack.c.bf16 %v920_v16, %v920_v16 }
 0x31a   :  { %1149 = vmatprep.mubr.bf16.mxu1 %v924_v17 }
 0x31b   :  { %1150 = vmatmul.mubr.bf16.vlgmr.msra.gmra.mrb[4].mxu1 %v923_v18 }
 0x31c   :  { %1710 = vmatpush1.bf16.msra.mxu1 %v12515_v20 }
 0x31d   :  { %1711 = vmatprep.subr.bf16.mxu1 %v12525_v24 }
 0x320   :  { %1712 = vmatpush1.bf16.msra.mxu1 %v12533_v25 }
 0x321   :  { %1713 = vmatprep.subr.bf16.mxu1 %v12539_v26 }
 0x324   :  { %1714 = vmatpush1.bf16.msra.mxu1 %v12545_v27 }
 0x325   :  { %1715 = vmatprep.subr.bf16.mxu1 %v12551_v28 }
 0x328   :  { %1716 = vmatpush1.bf16.msra.mxu1 %v12557_v29 }
 0x329   :  { %1717 = vmatprep.subr.bf16.mxu1 %v12563_v30 }
 0x32c   :  { %1718 = vmatpush1.bf16.msra.mxu1 %v12569_v31 }
 0x32d   :  { %1719 = vmatprep.subr.bf16.mxu1 %v12575_v32 }
 0x330   :  { %1720 = vmatpush1.bf16.msra.mxu1 %v12581_v33 }
 0x331   :  { %1721 = vmatprep.subr.bf16.mxu1 %v12587_v34 }
 0x334   :  { %1722 = vmatpush1.bf16.msra.mxu1 %v12593_v35 }
 0x335   :  { %1723 = vmatprep.subr.bf16.mxu1 %v12599_v49 }
 0x338   :  { %1724 = vmatpush1.bf16.msra.mxu1 %v12605_v50 }
 0x339   :  { %1725 = vmatprep.subr.bf16.mxu1 %v12636_v36 }
 0x33c   :  { %1726 = vmatpush1.bf16.msra.mxu1 %v12641_v37 }
 0x33d   :  { %1727 = vmatprep.subr.bf16.mxu1 %v12650_v38 }
 0x340   :  { %1728 = vmatpush1.bf16.msra.mxu1 %v12655_v39 }
 0x341   :  { %1729 = vmatprep.subr.bf16.mxu1 %v12664_v40 }
 0x344   :  { %1730 = vmatpush1.bf16.msra.mxu1 %v12669_v41 }
 0x345   :  { %1731 = vmatprep.subr.bf16.mxu1 %v12678_v42 }
 0x348   :  { %1732 = vmatpush1.bf16.msra.mxu1 %v12683_v44 }
 0x349   :  { %1733 = vmatprep.subr.bf16.mxu1 %v12692_v45 }
 0x34c   :  { %1734 = vmatpush1.bf16.msra.mxu1 %v12697_v46 }
 0x34d   :  { %1735 = vmatprep.subr.bf16.mxu1 %v12706_v47 }
 0x350   :  { %1736 = vmatpush1.bf16.msra.mxu1 %v12711_v48 }
 0x351   :  { %1737 = vmatprep.subr.bf16.mxu1 %v12720_v1 }
 0x354   :  { %1738 = vmatpush1.bf16.msra.mxu1 %v12725_v2 }
 0x355   :  { %1739 = vmatprep.subr.bf16.mxu1 %v12734_v3 }
 0x358   :  { %1740 = vmatpush1.bf16.msra.mxu1 %v12739_v4 }
 0x359   :  { %2301 = vmatprep.subr.bf16.mxu1 %v12520_v23 }
 0x3ee   :  { %v1151_v51 = vpop.f32.mrb[4].mxu1 }
 0x3ef   :  { %v1153_v52 = vpop.f32.mrb[5].mxu1 }
 0x3f0   :  { %v1160_v53 = vcombine.low %v1151_v51, %v1153_v52  ;;  %v1155_v54 = vpop.f32.mrb[6].mxu1 }
 0x3f1   :  { %v1156_v56 = vpop.f32.mrb[7].mxu1 }
 0x3f2   :  { %v1167_v58 = vrot.slane %v1160_v53, %v12419_v43 }
 0x3f4   :  { %v1169_v59 = vadd.f32 %v10511_v55, %v1167_v58 }
 0x3f6   :  { %12042 = vtanh.f32 %v1169_v59 }
 0x400   :  { %v12043_v60 = vpop.eup %12042 }
 0x401   :  { %1171 = vst [vmem:[#allocation2] sm:$0xf] %v12043_v60  ;;  %v1179_v61 = vrot.slane %v12043_v60, %v12419_v43  ;;  %v10583_v60 = vld [vmem:[%s14732_s0 + $0x14] sm:$0xf] }
 0x403   :  { %v1180_v62 = vcombine.high %v1179_v61, %v1179_v61 }
 0x405   :  { %v10545_v63 = vpack.c.bf16 %v1180_v62, %v1179_v61 }
 0x407   :  { %v1194_v0 = vrot.slane %v10545_v63, %v12426_v57 }
 0x408   :  { %v10548_v14 = vld.sshfl [vmem:[#allocation2] sm:$0x33 pattern:$0x76325410] }
 0x409   :  { %11665 = vst.sshfl [vmem:[%s14735_s3 + $0x6] sm:$0x5 pattern:$0x73625140] %v1194_v0  ;;  %v1216_v19 = vcombine.high %v10548_v14, %v10548_v14  ;;  %v1219_v22 = vpack.c.bf16 %v10548_v14, %v10548_v14 }
 0x40b   :  { %v1220_v21 = vpack.c.bf16 %v1216_v19, %v1216_v19 }
 0x40d   :  { %1445 = vmatprep.mubr.bf16.mxu0 %v1220_v21 }
 0x40e   :  { %1446 = vmatmul.mubr.bf16.vlgmr.msra.gmra.mrb[8].mxu0 %v1219_v22 }
 0x40f   :  { %2006 = vmatpush1.bf16.msra.mxu0 %v12515_v20 }
 0x410   :  { %2007 = vmatprep.subr.bf16.mxu0 %v12525_v24 }
 0x413   :  { %2008 = vmatpush1.bf16.msra.mxu0 %v12533_v25 }
 0x414   :  { %2009 = vmatprep.subr.bf16.mxu0 %v12539_v26 }
 0x417   :  { %2010 = vmatpush1.bf16.msra.mxu0 %v12545_v27 }
 0x418   :  { %2011 = vmatprep.subr.bf16.mxu0 %v12551_v28 }
 0x41b   :  { %2012 = vmatpush1.bf16.msra.mxu0 %v12557_v29 }
 0x41c   :  { %2013 = vmatprep.subr.bf16.mxu0 %v12563_v30 }
 0x41f   :  { %2014 = vmatpush1.bf16.msra.mxu0 %v12569_v31 }
 0x420   :  { %2015 = vmatprep.subr.bf16.mxu0 %v12575_v32 }
 0x423   :  { %2016 = vmatpush1.bf16.msra.mxu0 %v12581_v33 }
 0x424   :  { %2017 = vmatprep.subr.bf16.mxu0 %v12587_v34 }
 0x427   :  { %2018 = vmatpush1.bf16.msra.mxu0 %v12593_v35 }
 0x428   :  { %2019 = vmatprep.subr.bf16.mxu0 %v12599_v49 }
 0x42b   :  { %2020 = vmatpush1.bf16.msra.mxu0 %v12605_v50 }
 0x42c   :  { %2021 = vmatprep.subr.bf16.mxu0 %v12636_v36 }
 0x42f   :  { %2022 = vmatpush1.bf16.msra.mxu0 %v12641_v37 }
 0x430   :  { %2023 = vmatprep.subr.bf16.mxu0 %v12650_v38 }
 0x433   :  { %2024 = vmatpush1.bf16.msra.mxu0 %v12655_v39 }
 0x434   :  { %2025 = vmatprep.subr.bf16.mxu0 %v12664_v40 }
 0x437   :  { %2026 = vmatpush1.bf16.msra.mxu0 %v12669_v41 }
 0x438   :  { %2027 = vmatprep.subr.bf16.mxu0 %v12678_v42 }
 0x43b   :  { %2028 = vmatpush1.bf16.msra.mxu0 %v12683_v44 }
 0x43c   :  { %2029 = vmatprep.subr.bf16.mxu0 %v12692_v45 }
 0x43f   :  { %2030 = vmatpush1.bf16.msra.mxu0 %v12697_v46 }
 0x440   :  { %2031 = vmatprep.subr.bf16.mxu0 %v12706_v47 }
 0x443   :  { %2032 = vmatpush1.bf16.msra.mxu0 %v12711_v48 }
 0x444   :  { %2033 = vmatprep.subr.bf16.mxu0 %v12720_v1 }
 0x447   :  { %2034 = vmatpush1.bf16.msra.mxu0 %v12725_v2 }
 0x448   :  { %2035 = vmatprep.subr.bf16.mxu0 %v12734_v3 }
 0x44b   :  { %2036 = vmatpush1.bf16.msra.mxu0 %v12739_v4 }
 0x44c   :  { %2597 = vmatprep.subr.bf16.mxu0 %v12520_v23 }
 0x4e1   :  { %v1447_v5 = vpop.f32.mrb[8].mxu0 }
 0x4e2   :  { %v1449_v6 = vpop.f32.mrb[9].mxu0 }
 0x4e3   :  { %v1456_v7 = vcombine.low %v1447_v5, %v1449_v6  ;;  %v1451_v8 = vpop.f32.mrb[10].mxu0 }
 0x4e4   :  { %v1452_v10 = vpop.f32.mrb[11].mxu0 }
 0x4e5   :  { %v1463_v11 = vrot.slane %v1456_v7, %v12419_v43 }
 0x4e7   :  { %v1465_v12 = vadd.f32 %v10547_v9, %v1463_v11 }
 0x4e9   :  { %12044 = vtanh.f32 %v1465_v12  ;;  %v10619_v12 = vld [vmem:[%s14732_s0 + $0x18] sm:$0xf] }
 0x4f3   :  { %v12045_v13 = vpop.eup %12044 }
 0x4f4   :  { %1467 = vst [vmem:[#allocation2] sm:$0xf] %v12045_v13  ;;  %v1475_v15 = vrot.slane %v12045_v13, %v12419_v43 }
 0x4f6   :  { %v1476_v16 = vcombine.high %v1475_v15, %v1475_v15 }
 0x4f8   :  { %v10581_v17 = vpack.c.bf16 %v1476_v16, %v1475_v15 }
 0x4fa   :  { %v1490_v18 = vrot.slane %v10581_v17, %v12426_v57 }
 0x4fb   :  { %v10584_v51 = vld.sshfl [vmem:[#allocation2] sm:$0x33 pattern:$0x76325410] }
 0x4fc   :  { %11666 = vst.sshfl [vmem:[%s14735_s3 + $0x8] sm:$0x5 pattern:$0x73625140] %v1490_v18  ;;  %v1512_v52 = vcombine.high %v10584_v51, %v10584_v51  ;;  %v1515_v54 = vpack.c.bf16 %v10584_v51, %v10584_v51 }
 0x4fe   :  { %v1516_v53 = vpack.c.bf16 %v1512_v52, %v1512_v52 }
 0x500   :  { %1741 = vmatprep.mubr.bf16.mxu1 %v1516_v53 }
 0x501   :  { %1742 = vmatmul.mubr.bf16.vlgmr.msra.gmra.mrb[8].mxu1 %v1515_v54 }
 0x502   :  { %2302 = vmatpush1.bf16.msra.mxu1 %v12515_v20 }
 0x503   :  { %2303 = vmatprep.subr.bf16.mxu1 %v12525_v24 }
 0x506   :  { %2304 = vmatpush1.bf16.msra.mxu1 %v12533_v25 }
 0x507   :  { %2305 = vmatprep.subr.bf16.mxu1 %v12539_v26 }
 0x50a   :  { %2306 = vmatpush1.bf16.msra.mxu1 %v12545_v27 }
 0x50b   :  { %2307 = vmatprep.subr.bf16.mxu1 %v12551_v28 }
 0x50e   :  { %2308 = vmatpush1.bf16.msra.mxu1 %v12557_v29 }
 0x50f   :  { %2309 = vmatprep.subr.bf16.mxu1 %v12563_v30 }
 0x512   :  { %2310 = vmatpush1.bf16.msra.mxu1 %v12569_v31 }
 0x513   :  { %2311 = vmatprep.subr.bf16.mxu1 %v12575_v32 }
 0x516   :  { %2312 = vmatpush1.bf16.msra.mxu1 %v12581_v33 }
 0x517   :  { %2313 = vmatprep.subr.bf16.mxu1 %v12587_v34 }
 0x51a   :  { %2314 = vmatpush1.bf16.msra.mxu1 %v12593_v35 }
 0x51b   :  { %2315 = vmatprep.subr.bf16.mxu1 %v12599_v49 }
 0x51e   :  { %2316 = vmatpush1.bf16.msra.mxu1 %v12605_v50 }
 0x51f   :  { %2317 = vmatprep.subr.bf16.mxu1 %v12636_v36 }
 0x522   :  { %2318 = vmatpush1.bf16.msra.mxu1 %v12641_v37 }
 0x523   :  { %2319 = vmatprep.subr.bf16.mxu1 %v12650_v38 }
 0x526   :  { %2320 = vmatpush1.bf16.msra.mxu1 %v12655_v39 }
 0x527   :  { %2321 = vmatprep.subr.bf16.mxu1 %v12664_v40 }
 0x52a   :  { %2322 = vmatpush1.bf16.msra.mxu1 %v12669_v41 }
 0x52b   :  { %2323 = vmatprep.subr.bf16.mxu1 %v12678_v42 }
 0x52e   :  { %2324 = vmatpush1.bf16.msra.mxu1 %v12683_v44 }
 0x52f   :  { %2325 = vmatprep.subr.bf16.mxu1 %v12692_v45 }
 0x532   :  { %2326 = vmatpush1.bf16.msra.mxu1 %v12697_v46 }
 0x533   :  { %2327 = vmatprep.subr.bf16.mxu1 %v12706_v47 }
 0x536   :  { %2328 = vmatpush1.bf16.msra.mxu1 %v12711_v48 }
 0x537   :  { %2329 = vmatprep.subr.bf16.mxu1 %v12720_v1 }
 0x53a   :  { %2330 = vmatpush1.bf16.msra.mxu1 %v12725_v2 }
 0x53b   :  { %2331 = vmatprep.subr.bf16.mxu1 %v12734_v3 }
 0x53e   :  { %2332 = vmatpush1.bf16.msra.mxu1 %v12739_v4 }
 0x53f   :  { %2893 = vmatprep.subr.bf16.mxu1 %v12520_v23 }
 0x5d4   :  { %v1743_v55 = vpop.f32.mrb[8].mxu1 }
 0x5d5   :  { %v1745_v56 = vpop.f32.mrb[9].mxu1 }
 0x5d6   :  { %v1752_v58 = vcombine.low %v1743_v55, %v1745_v56  ;;  %v1747_v59 = vpop.f32.mrb[10].mxu1 }
 0x5d7   :  { %v1748_v61 = vpop.f32.mrb[11].mxu1  ;;  %v12964_v59 = vld [vmem:[%s14734_s2 + $0x74] ss:$8 sps:$4 sm:$0xff]  }
 0x5d8   :  { %v1759_v62 = vrot.slane %v1752_v58, %v12419_v43 }
 0x5da   :  { %v1761_v63 = vadd.f32 %v10583_v60, %v1759_v62  ;;  %v12970_v60 = vld [vmem:[%s14734_s2 + $0x70] ss:$8 sps:$4 sm:$0xff]  }
 0x5dc   :  { %12046 = vtanh.f32 %v1761_v63 }
 0x5e6   :  { %v12047_v0 = vpop.eup %12046 }
 0x5e7   :  { %1763 = vst [vmem:[#allocation2] sm:$0xf] %v12047_v0  ;;  %v1771_v14 = vrot.slane %v12047_v0, %v12419_v43 }
 0x5e9   :  { %v1772_v19 = vcombine.high %v1771_v14, %v1771_v14 }
 0x5eb   :  { %v10617_v21 = vpack.c.bf16 %v1772_v19, %v1771_v14  ;;  %v10691_v14 = vld [vmem:[%s14732_s0 + $0x20] sm:$0xf] }
 0x5ed   :  { %v1786_v23 = vrot.slane %v10617_v21, %v12426_v57 }
 0x5ee   :  { %v10620_v22 = vld.sshfl [vmem:[#allocation2] sm:$0x33 pattern:$0x76325410] }
 0x5ef   :  { %11667 = vst.sshfl [vmem:[%s14735_s3 + $0xa] sm:$0x5 pattern:$0x73625140] %v1786_v23  ;;  %v1808_v5 = vcombine.high %v10620_v22, %v10620_v22  ;;  %v1811_v7 = vpack.c.bf16 %v10620_v22, %v10620_v22 }
 0x5f1   :  { %v1812_v6 = vpack.c.bf16 %v1808_v5, %v1808_v5 }
 0x5f3   :  { %2037 = vmatprep.mubr.bf16.mxu0 %v1812_v6 }
 0x5f4   :  { %2038 = vmatmul.mubr.bf16.vlgmr.msra.gmra.mrb[12].mxu0 %v1811_v7 }
 0x5f5   :  { %2598 = vmatpush1.bf16.msra.mxu0 %v12515_v20 }
 0x5f6   :  { %2599 = vmatprep.subr.bf16.mxu0 %v12525_v24 }
 0x5f9   :  { %2600 = vmatpush1.bf16.msra.mxu0 %v12533_v25 }
 0x5fa   :  { %2601 = vmatprep.subr.bf16.mxu0 %v12539_v26 }
 0x5fd   :  { %2602 = vmatpush1.bf16.msra.mxu0 %v12545_v27 }
 0x5fe   :  { %2603 = vmatprep.subr.bf16.mxu0 %v12551_v28 }
 0x601   :  { %2604 = vmatpush1.bf16.msra.mxu0 %v12557_v29 }
 0x602   :  { %2605 = vmatprep.subr.bf16.mxu0 %v12563_v30 }
 0x605   :  { %2606 = vmatpush1.bf16.msra.mxu0 %v12569_v31 }
 0x606   :  { %2607 = vmatprep.subr.bf16.mxu0 %v12575_v32 }
 0x609   :  { %2608 = vmatpush1.bf16.msra.mxu0 %v12581_v33 }
 0x60a   :  { %2609 = vmatprep.subr.bf16.mxu0 %v12587_v34 }
 0x60d   :  { %2610 = vmatpush1.bf16.msra.mxu0 %v12593_v35 }
 0x60e   :  { %2611 = vmatprep.subr.bf16.mxu0 %v12599_v49 }
 0x611   :  { %2612 = vmatpush1.bf16.msra.mxu0 %v12605_v50 }
 0x612   :  { %2613 = vmatprep.subr.bf16.mxu0 %v12636_v36 }
 0x615   :  { %2614 = vmatpush1.bf16.msra.mxu0 %v12641_v37 }
 0x616   :  { %2615 = vmatprep.subr.bf16.mxu0 %v12650_v38 }
 0x619   :  { %2616 = vmatpush1.bf16.msra.mxu0 %v12655_v39 }
 0x61a   :  { %2617 = vmatprep.subr.bf16.mxu0 %v12664_v40 }
 0x61d   :  { %2618 = vmatpush1.bf16.msra.mxu0 %v12669_v41 }
 0x61e   :  { %2619 = vmatprep.subr.bf16.mxu0 %v12678_v42 }
 0x621   :  { %2620 = vmatpush1.bf16.msra.mxu0 %v12683_v44 }
 0x622   :  { %2621 = vmatprep.subr.bf16.mxu0 %v12692_v45 }
 0x625   :  { %2622 = vmatpush1.bf16.msra.mxu0 %v12697_v46 }
 0x626   :  { %2623 = vmatprep.subr.bf16.mxu0 %v12706_v47 }
 0x629   :  { %2624 = vmatpush1.bf16.msra.mxu0 %v12711_v48 }
 0x62a   :  { %2625 = vmatprep.subr.bf16.mxu0 %v12720_v1 }
 0x62d   :  { %2626 = vmatpush1.bf16.msra.mxu0 %v12725_v2 }
 0x62e   :  { %2627 = vmatprep.subr.bf16.mxu0 %v12734_v3 }
 0x631   :  { %2628 = vmatpush1.bf16.msra.mxu0 %v12739_v4 }
 0x6c7   :  { %v2039_v8 = vpop.f32.mrb[12].mxu0 }
 0x6c8   :  { %v2041_v9 = vpop.f32.mrb[13].mxu0 }
 0x6c9   :  { %v2048_v10 = vcombine.low %v2039_v8, %v2041_v9  ;;  %v2043_v11 = vpop.f32.mrb[14].mxu0 }
 0x6ca   :  { %v2044_v13 = vpop.f32.mrb[15].mxu0 }
 0x6cb   :  { %v2055_v15 = vrot.slane %v2048_v10, %v12419_v43  ;;  %v13001_v13 = vld [vmem:[%s14734_s2 + $0x84] ss:$8 sps:$4 sm:$0xff]  }
 0x6cd   :  { %v2057_v16 = vadd.f32 %v10619_v12, %v2055_v15  ;;  %v13006_v15 = vld [vmem:[%s14734_s2 + $0x80] ss:$8 sps:$4 sm:$0xff]  }
 0x6cf   :  { %12048 = vtanh.f32 %v2057_v16  ;;  %v13015_v16 = vld [vmem:[%s14734_s2 + $0x94] ss:$8 sps:$4 sm:$0xff]  }
 0x6d9   :  { %v12049_v17 = vpop.eup %12048 }
 0x6da   :  { %2059 = vst [vmem:[#allocation2] sm:$0xf] %v12049_v17  ;;  %v2067_v18 = vrot.slane %v12049_v17, %v12419_v43  ;;  %v13020_v17 = vld [vmem:[%s14734_s2 + $0x90] ss:$8 sps:$4 sm:$0xff]  }
 0x6dc   :  { %v2068_v51 = vcombine.high %v2067_v18, %v2067_v18 }
 0x6de   :  { %v10653_v52 = vpack.c.bf16 %v2068_v51, %v2067_v18  ;;  %v13029_v18 = vld [vmem:[%s14734_s2 + $0xa4] ss:$8 sps:$4 sm:$0xff]   ;;  %v13034_v51 = vld [vmem:[%s14734_s2 + $0xa0] ss:$8 sps:$4 sm:$0xff]  }
 0x6e0   :  { %v2082_v53 = vrot.slane %v10653_v52, %v12426_v57  ;;  %v13043_v52 = vld [vmem:[%s14734_s2 + $0xb4] ss:$8 sps:$4 sm:$0xff]  }
 0x6e1   :  { %v10656_v54 = vld.sshfl [vmem:[#allocation2] sm:$0x33 pattern:$0x76325410] }
 0x6e2   :  { %11668 = vst.sshfl [vmem:[%s14735_s3 + $0xc] sm:$0x5 pattern:$0x73625140] %v2082_v53  ;;  %v2104_v55 = vcombine.high %v10656_v54, %v10656_v54  ;;  %v2107_v58 = vpack.c.bf16 %v10656_v54, %v10656_v54  ;;  %v13048_v53 = vld [vmem:[%s14734_s2 + $0xb0] ss:$8 sps:$4 sm:$0xff]  }
 0x6e3   :  { %v13057_v54 = vld [vmem:[%s14734_s2 + $0xc4] ss:$8 sps:$4 sm:$0xff]  }
 0x6e4   :  { %v2108_v56 = vpack.c.bf16 %v2104_v55, %v2104_v55  ;;  %v13062_v55 = vld [vmem:[%s14734_s2 + $0xc0] ss:$8 sps:$4 sm:$0xff]  }
 0x6e6   :  { %2333 = vmatprep.mubr.bf16.mxu1 %v2108_v56  ;;  %v13071_v56 = vld [vmem:[%s14734_s2 + $0xd4] ss:$8 sps:$4 sm:$0xff]  }
 0x6e7   :  { %2334 = vmatmul.mubr.bf16.vlgmr.msra.gmra.mrb[12].mxu1 %v2107_v58  ;;  %v13076_v58 = vld [vmem:[%s14734_s2 + $0xd0] ss:$8 sps:$4 sm:$0xff]  }
 0x6e8   :  { %2894 = vmatpush1.bf16.msra.mxu1 %v12515_v20 }
 0x6e9   :  { %2895 = vmatprep.subr.bf16.mxu1 %v12525_v24 }
 0x6ec   :  { %2896 = vmatpush1.bf16.msra.mxu1 %v12533_v25 }
 0x6ed   :  { %2897 = vmatprep.subr.bf16.mxu1 %v12539_v26 }
 0x6f0   :  { %2898 = vmatpush1.bf16.msra.mxu1 %v12545_v27  ;;  %v10655_v27 = vld [vmem:[%s14732_s0 + $0x1c] sm:$0xf] }
 0x6f1   :  { %2899 = vmatprep.subr.bf16.mxu1 %v12551_v28 }
 0x6f4   :  { %2900 = vmatpush1.bf16.msra.mxu1 %v12557_v29 }
 0x6f5   :  { %2901 = vmatprep.subr.bf16.mxu1 %v12563_v30 }
 0x6f8   :  { %2902 = vmatpush1.bf16.msra.mxu1 %v12569_v31 }
 0x6f9   :  { %2903 = vmatprep.subr.bf16.mxu1 %v12575_v32 }
 0x6fc   :  { %2904 = vmatpush1.bf16.msra.mxu1 %v12581_v33 }
 0x6fd   :  { %2905 = vmatprep.subr.bf16.mxu1 %v12587_v34 }
 0x700   :  { %2906 = vmatpush1.bf16.msra.mxu1 %v12593_v35 }
 0x701   :  { %2907 = vmatprep.subr.bf16.mxu1 %v12599_v49 }
 0x704   :  { %2908 = vmatpush1.bf16.msra.mxu1 %v12605_v50 }
 0x705   :  { %2909 = vmatprep.subr.bf16.mxu1 %v12636_v36 }
 0x708   :  { %2910 = vmatpush1.bf16.msra.mxu1 %v12641_v37 }
 0x709   :  { %2911 = vmatprep.subr.bf16.mxu1 %v12650_v38  ;;  %v12880_v38 = vld [vmem:[%s14734_s2] ss:$8 sps:$4 sm:$0xff]  }
 0x70c   :  { %2912 = vmatpush1.bf16.msra.mxu1 %v12655_v39  ;;  %v12885_v39 = vld [vmem:[%s14734_s2 + $0x4] ss:$8 sps:$4 sm:$0xff]  }
 0x70d   :  { %2913 = vmatprep.subr.bf16.mxu1 %v12664_v40  ;;  %v12890_v40 = vld [vmem:[%s14734_s2 + $0x14] ss:$8 sps:$4 sm:$0xff]   ;;  %3189 = vmatprep.subr.bf16.mxu0 %v12885_v39 }
 0x710   :  { %2914 = vmatpush1.bf16.msra.mxu1 %v12669_v41  ;;  %v12898_v41 = vld [vmem:[%s14734_s2 + $0x10] ss:$8 sps:$4 sm:$0xff]  }
 0x711   :  { %2915 = vmatprep.subr.bf16.mxu1 %v12678_v42  ;;  %v12904_v42 = vld [vmem:[%s14734_s2 + $0x24] ss:$8 sps:$4 sm:$0xff]  }
 0x714   :  { %2916 = vmatpush1.bf16.msra.mxu1 %v12683_v44  ;;  %v12910_v44 = vld [vmem:[%s14734_s2 + $0x20] ss:$8 sps:$4 sm:$0xff]  }
 0x715   :  { %2917 = vmatprep.subr.bf16.mxu1 %v12692_v45  ;;  %v12916_v45 = vld [vmem:[%s14734_s2 + $0x34] ss:$8 sps:$4 sm:$0xff]  }
 0x718   :  { %2918 = vmatpush1.bf16.msra.mxu1 %v12697_v46  ;;  %v12922_v46 = vld [vmem:[%s14734_s2 + $0x30] ss:$8 sps:$4 sm:$0xff]  }
 0x719   :  { %2919 = vmatprep.subr.bf16.mxu1 %v12706_v47  ;;  %v12928_v47 = vld [vmem:[%s14734_s2 + $0x44] ss:$8 sps:$4 sm:$0xff]  }
 0x71c   :  { %2920 = vmatpush1.bf16.msra.mxu1 %v12711_v48  ;;  %v12934_v48 = vld [vmem:[%s14734_s2 + $0x40] ss:$8 sps:$4 sm:$0xff]  }
 0x71d   :  { %2921 = vmatprep.subr.bf16.mxu1 %v12720_v1  ;;  %v12940_v1 = vld [vmem:[%s14734_s2 + $0x54] ss:$8 sps:$4 sm:$0xff]  }
 0x720   :  { %2922 = vmatpush1.bf16.msra.mxu1 %v12725_v2  ;;  %v12946_v2 = vld [vmem:[%s14734_s2 + $0x50] ss:$8 sps:$4 sm:$0xff]  }
 0x721   :  { %2923 = vmatprep.subr.bf16.mxu1 %v12734_v3  ;;  %v12952_v3 = vld [vmem:[%s14734_s2 + $0x64] ss:$8 sps:$4 sm:$0xff]  }
 0x724   :  { %2924 = vmatpush1.bf16.msra.mxu1 %v12739_v4  ;;  %v12958_v4 = vld [vmem:[%s14734_s2 + $0x60] ss:$8 sps:$4 sm:$0xff]  }
 0x725   :  { %3485 = vmatprep.subr.bf16.mxu1 %v12885_v39 }
 0x7ba   :  { %v2335_v20 = vpop.f32.mrb[12].mxu1 }
 0x7bb   :  { %v2337_v24 = vpop.f32.mrb[13].mxu1 }
 0x7bc   :  { %v2344_v25 = vcombine.low %v2335_v20, %v2337_v24  ;;  %v2339_v26 = vpop.f32.mrb[14].mxu1  ;;  %v13085_v20 = vld [vmem:[%s14734_s2 + $0xe4] ss:$8 sps:$4 sm:$0xff]   ;;  %v13090_v24 = vld [vmem:[%s14734_s2 + $0xe0] ss:$8 sps:$4 sm:$0xff]  }
 0x7bd   :  { %v2340_v28 = vpop.f32.mrb[15].mxu1  ;;  %v13104_v26 = vld [vmem:[%s14734_s2 + $0xf0] ss:$8 sps:$4 sm:$0xff]  }
 0x7be   :  { %v2351_v29 = vrot.slane %v2344_v25, %v12419_v43  ;;  %v13099_v25 = vld [vmem:[%s14734_s2 + $0xf4] ss:$8 sps:$4 sm:$0xff]  }
 0x7c0   :  { %v2353_v30 = vadd.f32 %v10655_v27, %v2351_v29 }
 0x7c2   :  { %12050 = vtanh.f32 %v2353_v30 }
 0x7cc   :  { %v12051_v31 = vpop.eup %12050 }
 0x7cd   :  { %v2363_v32 = vrot.slane %v12051_v31, %v12419_v43  ;;  %2355 = vst [vmem:[#allocation2] sm:$0xf] %v12051_v31  ;;  %v10727_v31 = vld [vmem:[%s14732_s0 + $0x24] sm:$0xf] }
 0x7cf   :  { %v2364_v33 = vcombine.high %v2363_v32, %v2363_v32 }
 0x7d1   :  { %v10689_v34 = vpack.c.bf16 %v2364_v33, %v2363_v32 }
 0x7d3   :  { %v2378_v35 = vrot.slane %v10689_v34, %v12426_v57 }
 0x7d4   :  { %v10692_v49 = vld.sshfl [vmem:[#allocation2] sm:$0x33 pattern:$0x76325410] }
 0x7d5   :  { %11669 = vst.sshfl [vmem:[%s14735_s3 + $0xe] sm:$0x5 pattern:$0x73625140] %v2378_v35  ;;  %v2400_v50 = vcombine.high %v10692_v49, %v10692_v49  ;;  %v2403_v37 = vpack.c.bf16 %v10692_v49, %v10692_v49 }
 0x7d7   :  { %v2404_v36 = vpack.c.bf16 %v2400_v50, %v2400_v50 }
 0x7d9   :  { %2629 = vmatprep.mubr.bf16.mxu0 %v2404_v36 }
 0x7da   :  { %2630 = vmatmul.mubr.bf16.vlgmr.msra.gmra.mrb[16].mxu0 %v2403_v37 }
 0x7db   :  { %3190 = vmatpush1.bf16.msra.mxu0 %v12880_v38 }
 0x7dc   :  { %3191 = vmatprep.subr.bf16.mxu0 %v12890_v40 }
 0x7df   :  { %3192 = vmatpush1.bf16.msra.mxu0 %v12898_v41 }
 0x7e0   :  { %3193 = vmatprep.subr.bf16.mxu0 %v12904_v42 }
 0x7e3   :  { %3194 = vmatpush1.bf16.msra.mxu0 %v12910_v44 }
 0x7e4   :  { %3195 = vmatprep.subr.bf16.mxu0 %v12916_v45 }
 0x7e7   :  { %3196 = vmatpush1.bf16.msra.mxu0 %v12922_v46 }
 0x7e8   :  { %3197 = vmatprep.subr.bf16.mxu0 %v12928_v47 }
 0x7eb   :  { %3198 = vmatpush1.bf16.msra.mxu0 %v12934_v48 }
 0x7ec   :  { %3199 = vmatprep.subr.bf16.mxu0 %v12940_v1 }
 0x7ef   :  { %3200 = vmatpush1.bf16.msra.mxu0 %v12946_v2 }
 0x7f0   :  { %3201 = vmatprep.subr.bf16.mxu0 %v12952_v3 }
 0x7f3   :  { %3202 = vmatpush1.bf16.msra.mxu0 %v12958_v4 }
 0x7f4   :  { %3203 = vmatprep.subr.bf16.mxu0 %v12964_v59 }
 0x7f7   :  { %3204 = vmatpush1.bf16.msra.mxu0 %v12970_v60 }
 0x7f8   :  { %3205 = vmatprep.subr.bf16.mxu0 %v13001_v13 }
 0x7fb   :  { %3206 = vmatpush1.bf16.msra.mxu0 %v13006_v15 }
 0x7fc   :  { %3207 = vmatprep.subr.bf16.mxu0 %v13015_v16 }
 0x7ff   :  { %3208 = vmatpush1.bf16.msra.mxu0 %v13020_v17 }
 0x800   :  { %3209 = vmatprep.subr.bf16.mxu0 %v13029_v18 }
 0x803   :  { %3210 = vmatpush1.bf16.msra.mxu0 %v13034_v51 }
 0x804   :  { %3211 = vmatprep.subr.bf16.mxu0 %v13043_v52 }
 0x807   :  { %3212 = vmatpush1.bf16.msra.mxu0 %v13048_v53 }
 0x808   :  { %3213 = vmatprep.subr.bf16.mxu0 %v13057_v54 }
 0x80b   :  { %3214 = vmatpush1.bf16.msra.mxu0 %v13062_v55 }
 0x80c   :  { %3215 = vmatprep.subr.bf16.mxu0 %v13071_v56 }
 0x80f   :  { %3216 = vmatpush1.bf16.msra.mxu0 %v13076_v58 }
 0x810   :  { %3217 = vmatprep.subr.bf16.mxu0 %v13085_v20 }
 0x813   :  { %3218 = vmatpush1.bf16.msra.mxu0 %v13090_v24 }
 0x814   :  { %3219 = vmatprep.subr.bf16.mxu0 %v13099_v25 }
 0x817   :  { %3220 = vmatpush1.bf16.msra.mxu0 %v13104_v26 }
 0x818   :  { %3781 = vmatprep.subr.bf16.mxu0 %v12885_v39 }
 0x8ad   :  { %v2631_v61 = vpop.f32.mrb[16].mxu0 }
 0x8ae   :  { %v2633_v62 = vpop.f32.mrb[17].mxu0 }
 0x8af   :  { %v2640_v63 = vcombine.low %v2631_v61, %v2633_v62  ;;  %v2635_v0 = vpop.f32.mrb[18].mxu0 }
 0x8b0   :  { %v2636_v19 = vpop.f32.mrb[19].mxu0 }
 0x8b1   :  { %v2647_v21 = vrot.slane %v2640_v63, %v12419_v43 }
 0x8b3   :  { %v2649_v23 = vadd.f32 %v10691_v14, %v2647_v21 }
 0x8b5   :  { %12052 = vtanh.f32 %v2649_v23 }
 0x8bf   :  { %v12053_v22 = vpop.eup %12052 }
 0x8c0   :  { %v2659_v5 = vrot.slane %v12053_v22, %v12419_v43  ;;  %2651 = vst [vmem:[#allocation2] sm:$0xf] %v12053_v22  ;;  %v10763_v22 = vld [vmem:[%s14732_s0 + $0x28] sm:$0xf] }
 0x8c2   :  { %v2660_v6 = vcombine.high %v2659_v5, %v2659_v5 }
 0x8c4   :  { %v10725_v7 = vpack.c.bf16 %v2660_v6, %v2659_v5 }
 0x8c6   :  { %v2674_v8 = vrot.slane %v10725_v7, %v12426_v57 }
 0x8c7   :  { %v10728_v9 = vld.sshfl [vmem:[#allocation2] sm:$0x33 pattern:$0x76325410] }
 0x8c8   :  { %11670 = vst.sshfl [vmem:[%s14735_s3 + $0x10] sm:$0x5 pattern:$0x73625140] %v2674_v8  ;;  %v2696_v10 = vcombine.high %v10728_v9, %v10728_v9  ;;  %v2699_v12 = vpack.c.bf16 %v10728_v9, %v10728_v9 }
 0x8ca   :  { %v2700_v11 = vpack.c.bf16 %v2696_v10, %v2696_v10 }
 0x8cc   :  { %2925 = vmatprep.mubr.bf16.mxu1 %v2700_v11 }
 0x8cd   :  { %2926 = vmatmul.mubr.bf16.vlgmr.msra.gmra.mrb[16].mxu1 %v2699_v12 }
 0x8ce   :  { %3486 = vmatpush1.bf16.msra.mxu1 %v12880_v38 }
 0x8cf   :  { %3487 = vmatprep.subr.bf16.mxu1 %v12890_v40 }
 0x8d2   :  { %3488 = vmatpush1.bf16.msra.mxu1 %v12898_v41 }
 0x8d3   :  { %3489 = vmatprep.subr.bf16.mxu1 %v12904_v42 }
 0x8d6   :  { %3490 = vmatpush1.bf16.msra.mxu1 %v12910_v44 }
 0x8d7   :  { %3491 = vmatprep.subr.bf16.mxu1 %v12916_v45 }
 0x8da   :  { %3492 = vmatpush1.bf16.msra.mxu1 %v12922_v46 }
 0x8db   :  { %3493 = vmatprep.subr.bf16.mxu1 %v12928_v47 }
 0x8de   :  { %3494 = vmatpush1.bf16.msra.mxu1 %v12934_v48 }
 0x8df   :  { %3495 = vmatprep.subr.bf16.mxu1 %v12940_v1 }
 0x8e2   :  { %3496 = vmatpush1.bf16.msra.mxu1 %v12946_v2 }
 0x8e3   :  { %3497 = vmatprep.subr.bf16.mxu1 %v12952_v3 }
 0x8e6   :  { %3498 = vmatpush1.bf16.msra.mxu1 %v12958_v4 }
 0x8e7   :  { %3499 = vmatprep.subr.bf16.mxu1 %v12964_v59 }
 0x8ea   :  { %3500 = vmatpush1.bf16.msra.mxu1 %v12970_v60 }
 0x8eb   :  { %3501 = vmatprep.subr.bf16.mxu1 %v13001_v13 }
 0x8ee   :  { %3502 = vmatpush1.bf16.msra.mxu1 %v13006_v15 }
 0x8ef   :  { %3503 = vmatprep.subr.bf16.mxu1 %v13015_v16 }
 0x8f2   :  { %3504 = vmatpush1.bf16.msra.mxu1 %v13020_v17 }
 0x8f3   :  { %3505 = vmatprep.subr.bf16.mxu1 %v13029_v18 }
 0x8f6   :  { %3506 = vmatpush1.bf16.msra.mxu1 %v13034_v51 }
 0x8f7   :  { %3507 = vmatprep.subr.bf16.mxu1 %v13043_v52 }
 0x8fa   :  { %3508 = vmatpush1.bf16.msra.mxu1 %v13048_v53 }
 0x8fb   :  { %3509 = vmatprep.subr.bf16.mxu1 %v13057_v54 }
 0x8fe   :  { %3510 = vmatpush1.bf16.msra.mxu1 %v13062_v55 }
 0x8ff   :  { %3511 = vmatprep.subr.bf16.mxu1 %v13071_v56 }
 0x902   :  { %3512 = vmatpush1.bf16.msra.mxu1 %v13076_v58 }
 0x903   :  { %3513 = vmatprep.subr.bf16.mxu1 %v13085_v20 }
 0x906   :  { %3514 = vmatpush1.bf16.msra.mxu1 %v13090_v24 }
 0x907   :  { %3515 = vmatprep.subr.bf16.mxu1 %v13099_v25 }
 0x90a   :  { %3516 = vmatpush1.bf16.msra.mxu1 %v13104_v26 }
 0x90b   :  { %4077 = vmatprep.subr.bf16.mxu1 %v12885_v39 }
 0x9a0   :  { %v2927_v27 = vpop.f32.mrb[16].mxu1 }
 0x9a1   :  { %v2929_v28 = vpop.f32.mrb[17].mxu1 }
 0x9a2   :  { %v2936_v29 = vcombine.low %v2927_v27, %v2929_v28  ;;  %v2931_v30 = vpop.f32.mrb[18].mxu1 }
 0x9a3   :  { %v2932_v32 = vpop.f32.mrb[19].mxu1 }
 0x9a4   :  { %v2943_v33 = vrot.slane %v2936_v29, %v12419_v43 }
 0x9a6   :  { %v2945_v34 = vadd.f32 %v10727_v31, %v2943_v33 }
 0x9a8   :  { %12054 = vtanh.f32 %v2945_v34  ;;  %v10799_v34 = vld [vmem:[%s14732_s0 + $0x2c] sm:$0xf] }
 0x9b2   :  { %v12055_v35 = vpop.eup %12054 }
 0x9b3   :  { %v2955_v49 = vrot.slane %v12055_v35, %v12419_v43  ;;  %2947 = vst [vmem:[#allocation2] sm:$0xf] %v12055_v35 }
 0x9b5   :  { %v2956_v50 = vcombine.high %v2955_v49, %v2955_v49 }
 0x9b7   :  { %v10761_v36 = vpack.c.bf16 %v2956_v50, %v2955_v49 }
 0x9b9   :  { %v2970_v37 = vrot.slane %v10761_v36, %v12426_v57 }
 0x9ba   :  { %v10764_v61 = vld.sshfl [vmem:[#allocation2] sm:$0x33 pattern:$0x76325410] }
 0x9bb   :  { %11671 = vst.sshfl [vmem:[%s14735_s3 + $0x12] sm:$0x5 pattern:$0x73625140] %v2970_v37  ;;  %v2992_v62 = vcombine.high %v10764_v61, %v10764_v61  ;;  %v2995_v0 = vpack.c.bf16 %v10764_v61, %v10764_v61 }
 0x9bd   :  { %v2996_v63 = vpack.c.bf16 %v2992_v62, %v2992_v62 }
 0x9bf   :  { %3221 = vmatprep.mubr.bf16.mxu0 %v2996_v63 }
 0x9c0   :  { %3222 = vmatmul.mubr.bf16.vlgmr.msra.gmra.mrb[20].mxu0 %v2995_v0 }
 0x9c1   :  { %3782 = vmatpush1.bf16.msra.mxu0 %v12880_v38 }
 0x9c2   :  { %3783 = vmatprep.subr.bf16.mxu0 %v12890_v40 }
 0x9c5   :  { %3784 = vmatpush1.bf16.msra.mxu0 %v12898_v41 }
 0x9c6   :  { %3785 = vmatprep.subr.bf16.mxu0 %v12904_v42 }
 0x9c9   :  { %3786 = vmatpush1.bf16.msra.mxu0 %v12910_v44 }
 0x9ca   :  { %3787 = vmatprep.subr.bf16.mxu0 %v12916_v45 }
 0x9cd   :  { %3788 = vmatpush1.bf16.msra.mxu0 %v12922_v46 }
 0x9ce   :  { %3789 = vmatprep.subr.bf16.mxu0 %v12928_v47 }
 0x9d1   :  { %3790 = vmatpush1.bf16.msra.mxu0 %v12934_v48 }
 0x9d2   :  { %3791 = vmatprep.subr.bf16.mxu0 %v12940_v1 }
 0x9d5   :  { %3792 = vmatpush1.bf16.msra.mxu0 %v12946_v2 }
 0x9d6   :  { %3793 = vmatprep.subr.bf16.mxu0 %v12952_v3 }
 0x9d9   :  { %3794 = vmatpush1.bf16.msra.mxu0 %v12958_v4 }
 0x9da   :  { %3795 = vmatprep.subr.bf16.mxu0 %v12964_v59 }
 0x9dd   :  { %3796 = vmatpush1.bf16.msra.mxu0 %v12970_v60 }
 0x9de   :  { %3797 = vmatprep.subr.bf16.mxu0 %v13001_v13 }
 0x9e1   :  { %3798 = vmatpush1.bf16.msra.mxu0 %v13006_v15 }
 0x9e2   :  { %3799 = vmatprep.subr.bf16.mxu0 %v13015_v16 }
 0x9e5   :  { %3800 = vmatpush1.bf16.msra.mxu0 %v13020_v17 }
 0x9e6   :  { %3801 = vmatprep.subr.bf16.mxu0 %v13029_v18 }
 0x9e9   :  { %3802 = vmatpush1.bf16.msra.mxu0 %v13034_v51 }
 0x9ea   :  { %3803 = vmatprep.subr.bf16.mxu0 %v13043_v52 }
 0x9ed   :  { %3804 = vmatpush1.bf16.msra.mxu0 %v13048_v53 }
 0x9ee   :  { %3805 = vmatprep.subr.bf16.mxu0 %v13057_v54 }
 0x9f1   :  { %3806 = vmatpush1.bf16.msra.mxu0 %v13062_v55 }
 0x9f2   :  { %3807 = vmatprep.subr.bf16.mxu0 %v13071_v56 }
 0x9f5   :  { %3808 = vmatpush1.bf16.msra.mxu0 %v13076_v58 }
 0x9f6   :  { %3809 = vmatprep.subr.bf16.mxu0 %v13085_v20 }
 0x9f9   :  { %3810 = vmatpush1.bf16.msra.mxu0 %v13090_v24 }
 0x9fa   :  { %3811 = vmatprep.subr.bf16.mxu0 %v13099_v25 }
 0x9fd   :  { %3812 = vmatpush1.bf16.msra.mxu0 %v13104_v26 }
 0x9fe   :  { %4373 = vmatprep.subr.bf16.mxu0 %v12885_v39 }
 0xa93   :  { %v3223_v14 = vpop.f32.mrb[20].mxu0 }
 0xa94   :  { %v3225_v19 = vpop.f32.mrb[21].mxu0 }
 0xa95   :  { %v3232_v21 = vcombine.low %v3223_v14, %v3225_v19  ;;  %v3227_v23 = vpop.f32.mrb[22].mxu0 }
 0xa96   :  { %v3228_v5 = vpop.f32.mrb[23].mxu0  ;;  %v13329_v23 = vld [vmem:[%s14734_s2 + $0x74] ss:$8 sps:$4 sm:$0xff]  }
 0xa97   :  { %v3239_v6 = vrot.slane %v3232_v21, %v12419_v43 }
 0xa99   :  { %v3241_v7 = vadd.f32 %v10763_v22, %v3239_v6  ;;  %v13335_v22 = vld [vmem:[%s14734_s2 + $0x70] ss:$8 sps:$4 sm:$0xff]  }
 0xa9b   :  { %12056 = vtanh.f32 %v3241_v7 }
 0xaa5   :  { %v12057_v8 = vpop.eup %12056 }
 0xaa6   :  { %v3251_v9 = vrot.slane %v12057_v8, %v12419_v43  ;;  %3243 = vst [vmem:[#allocation2] sm:$0xf] %v12057_v8 }
 0xaa8   :  { %v3252_v10 = vcombine.high %v3251_v9, %v3251_v9 }
 0xaaa   :  { %v10797_v11 = vpack.c.bf16 %v3252_v10, %v3251_v9  ;;  %v10871_v9 = vld [vmem:[%s14732_s0 + $0x34] sm:$0xf] }
 0xaac   :  { %v3266_v39 = vrot.slane %v10797_v11, %v12426_v57 }
 0xaad   :  { %v10800_v12 = vld.sshfl [vmem:[#allocation2] sm:$0x33 pattern:$0x76325410] }
 0xaae   :  { %11672 = vst.sshfl [vmem:[%s14735_s3 + $0x14] sm:$0x5 pattern:$0x73625140] %v3266_v39  ;;  %v3288_v27 = vcombine.high %v10800_v12, %v10800_v12  ;;  %v3291_v29 = vpack.c.bf16 %v10800_v12, %v10800_v12 }
 0xab0   :  { %v3292_v28 = vpack.c.bf16 %v3288_v27, %v3288_v27 }
 0xab2   :  { %3517 = vmatprep.mubr.bf16.mxu1 %v3292_v28 }
 0xab3   :  { %3518 = vmatmul.mubr.bf16.vlgmr.msra.gmra.mrb[20].mxu1 %v3291_v29 }
 0xab4   :  { %4078 = vmatpush1.bf16.msra.mxu1 %v12880_v38 }
 0xab5   :  { %4079 = vmatprep.subr.bf16.mxu1 %v12890_v40 }
 0xab8   :  { %4080 = vmatpush1.bf16.msra.mxu1 %v12898_v41 }
 0xab9   :  { %4081 = vmatprep.subr.bf16.mxu1 %v12904_v42 }
 0xabc   :  { %4082 = vmatpush1.bf16.msra.mxu1 %v12910_v44 }
 0xabd   :  { %4083 = vmatprep.subr.bf16.mxu1 %v12916_v45 }
 0xac0   :  { %4084 = vmatpush1.bf16.msra.mxu1 %v12922_v46 }
 0xac1   :  { %4085 = vmatprep.subr.bf16.mxu1 %v12928_v47 }
 0xac4   :  { %4086 = vmatpush1.bf16.msra.mxu1 %v12934_v48 }
 0xac5   :  { %4087 = vmatprep.subr.bf16.mxu1 %v12940_v1 }
 0xac8   :  { %4088 = vmatpush1.bf16.msra.mxu1 %v12946_v2 }
 0xac9   :  { %4089 = vmatprep.subr.bf16.mxu1 %v12952_v3 }
 0xacc   :  { %4090 = vmatpush1.bf16.msra.mxu1 %v12958_v4 }
 0xacd   :  { %4091 = vmatprep.subr.bf16.mxu1 %v12964_v59 }
 0xad0   :  { %4092 = vmatpush1.bf16.msra.mxu1 %v12970_v60 }
 0xad1   :  { %4093 = vmatprep.subr.bf16.mxu1 %v13001_v13 }
 0xad4   :  { %4094 = vmatpush1.bf16.msra.mxu1 %v13006_v15 }
 0xad5   :  { %4095 = vmatprep.subr.bf16.mxu1 %v13015_v16 }
 0xad8   :  { %4096 = vmatpush1.bf16.msra.mxu1 %v13020_v17 }
 0xad9   :  { %4097 = vmatprep.subr.bf16.mxu1 %v13029_v18 }
 0xadc   :  { %4098 = vmatpush1.bf16.msra.mxu1 %v13034_v51 }
 0xadd   :  { %4099 = vmatprep.subr.bf16.mxu1 %v13043_v52 }
 0xae0   :  { %4100 = vmatpush1.bf16.msra.mxu1 %v13048_v53 }
 0xae1   :  { %4101 = vmatprep.subr.bf16.mxu1 %v13057_v54 }
 0xae4   :  { %4102 = vmatpush1.bf16.msra.mxu1 %v13062_v55 }
 0xae5   :  { %4103 = vmatprep.subr.bf16.mxu1 %v13071_v56 }
 0xae8   :  { %4104 = vmatpush1.bf16.msra.mxu1 %v13076_v58 }
 0xae9   :  { %4105 = vmatprep.subr.bf16.mxu1 %v13085_v20 }
 0xaec   :  { %4106 = vmatpush1.bf16.msra.mxu1 %v13090_v24 }
 0xaed   :  { %4107 = vmatprep.subr.bf16.mxu1 %v13099_v25 }
 0xaf0   :  { %4108 = vmatpush1.bf16.msra.mxu1 %v13104_v26 }
 0xb86   :  { %v3519_v30 = vpop.f32.mrb[20].mxu1 }
 0xb87   :  { %v3521_v31 = vpop.f32.mrb[21].mxu1 }
 0xb88   :  { %v3528_v32 = vcombine.low %v3519_v30, %v3521_v31  ;;  %v3523_v33 = vpop.f32.mrb[22].mxu1 }
 0xb89   :  { %v3524_v35 = vpop.f32.mrb[23].mxu1 }
 0xb8a   :  { %v3535_v49 = vrot.slane %v3528_v32, %v12419_v43  ;;  %v13366_v35 = vld [vmem:[%s14734_s2 + $0x84] ss:$8 sps:$4 sm:$0xff]  }
 0xb8c   :  { %v3537_v50 = vadd.f32 %v10799_v34, %v3535_v49  ;;  %v13371_v49 = vld [vmem:[%s14734_s2 + $0x80] ss:$8 sps:$4 sm:$0xff]  }
 0xb8e   :  { %12058 = vtanh.f32 %v3537_v50  ;;  %v13380_v50 = vld [vmem:[%s14734_s2 + $0x94] ss:$8 sps:$4 sm:$0xff]  }
 0xb98   :  { %v12059_v36 = vpop.eup %12058 }
 0xb99   :  { %v3547_v37 = vrot.slane %v12059_v36, %v12419_v43  ;;  %3539 = vst [vmem:[#allocation2] sm:$0xf] %v12059_v36  ;;  %v13385_v36 = vld [vmem:[%s14734_s2 + $0x90] ss:$8 sps:$4 sm:$0xff]  }
 0xb9b   :  { %v3548_v61 = vcombine.high %v3547_v37, %v3547_v37 }
 0xb9d   :  { %v10833_v62 = vpack.c.bf16 %v3548_v61, %v3547_v37  ;;  %v13394_v37 = vld [vmem:[%s14734_s2 + $0xa4] ss:$8 sps:$4 sm:$0xff]   ;;  %v13399_v61 = vld [vmem:[%s14734_s2 + $0xa0] ss:$8 sps:$4 sm:$0xff]  }
 0xb9f   :  { %v3562_v63 = vrot.slane %v10833_v62, %v12426_v57  ;;  %v13408_v62 = vld [vmem:[%s14734_s2 + $0xb4] ss:$8 sps:$4 sm:$0xff]  }
 0xba0   :  { %v10836_v0 = vld.sshfl [vmem:[#allocation2] sm:$0x33 pattern:$0x76325410] }
 0xba1   :  { %11673 = vst.sshfl [vmem:[%s14735_s3 + $0x16] sm:$0x5 pattern:$0x73625140] %v3562_v63  ;;  %v3584_v14 = vcombine.high %v10836_v0, %v10836_v0  ;;  %v3587_v21 = vpack.c.bf16 %v10836_v0, %v10836_v0  ;;  %v13413_v63 = vld [vmem:[%s14734_s2 + $0xb0] ss:$8 sps:$4 sm:$0xff]  }
 0xba2   :  { %v13422_v0 = vld [vmem:[%s14734_s2 + $0xc4] ss:$8 sps:$4 sm:$0xff]  }
 0xba3   :  { %v3588_v19 = vpack.c.bf16 %v3584_v14, %v3584_v14  ;;  %v13427_v14 = vld [vmem:[%s14734_s2 + $0xc0] ss:$8 sps:$4 sm:$0xff]  }
 0xba5   :  { %3813 = vmatprep.mubr.bf16.mxu0 %v3588_v19  ;;  %v13436_v19 = vld [vmem:[%s14734_s2 + $0xd4] ss:$8 sps:$4 sm:$0xff]  }
 0xba6   :  { %3814 = vmatmul.mubr.bf16.vlgmr.msra.gmra.mrb[24].mxu0 %v3587_v21  ;;  %v13441_v21 = vld [vmem:[%s14734_s2 + $0xd0] ss:$8 sps:$4 sm:$0xff]  }
 0xba7   :  { %4374 = vmatpush1.bf16.msra.mxu0 %v12880_v38 }
 0xba8   :  { %4375 = vmatprep.subr.bf16.mxu0 %v12890_v40 }
 0xbab   :  { %4376 = vmatpush1.bf16.msra.mxu0 %v12898_v41 }
 0xbac   :  { %4377 = vmatprep.subr.bf16.mxu0 %v12904_v42 }
 0xbaf   :  { %4378 = vmatpush1.bf16.msra.mxu0 %v12910_v44  ;;  %v10835_v44 = vld [vmem:[%s14732_s0 + $0x30] sm:$0xf] }
 0xbb0   :  { %4379 = vmatprep.subr.bf16.mxu0 %v12916_v45 }
 0xbb3   :  { %4380 = vmatpush1.bf16.msra.mxu0 %v12922_v46 }
 0xbb4   :  { %4381 = vmatprep.subr.bf16.mxu0 %v12928_v47 }
 0xbb7   :  { %4382 = vmatpush1.bf16.msra.mxu0 %v12934_v48 }
 0xbb8   :  { %4383 = vmatprep.subr.bf16.mxu0 %v12940_v1 }
 0xbbb   :  { %4384 = vmatpush1.bf16.msra.mxu0 %v12946_v2 }
 0xbbc   :  { %4385 = vmatprep.subr.bf16.mxu0 %v12952_v3 }
 0xbbf   :  { %4386 = vmatpush1.bf16.msra.mxu0 %v12958_v4 }
 0xbc0   :  { %4387 = vmatprep.subr.bf16.mxu0 %v12964_v59 }
 0xbc3   :  { %4388 = vmatpush1.bf16.msra.mxu0 %v12970_v60 }
 0xbc4   :  { %4389 = vmatprep.subr.bf16.mxu0 %v13001_v13 }
 0xbc7   :  { %4390 = vmatpush1.bf16.msra.mxu0 %v13006_v15 }
 0xbc8   :  { %4391 = vmatprep.subr.bf16.mxu0 %v13015_v16  ;;  %v13245_v16 = vld [vmem:[%s14734_s2] ss:$8 sps:$4 sm:$0xff]  }
 0xbcb   :  { %4392 = vmatpush1.bf16.msra.mxu0 %v13020_v17  ;;  %v13250_v17 = vld [vmem:[%s14734_s2 + $0x4] ss:$8 sps:$4 sm:$0xff]  }
 0xbcc   :  { %4393 = vmatprep.subr.bf16.mxu0 %v13029_v18  ;;  %v13255_v18 = vld [vmem:[%s14734_s2 + $0x14] ss:$8 sps:$4 sm:$0xff]   ;;  %4669 = vmatprep.subr.bf16.mxu1 %v13250_v17 }
 0xbcf   :  { %4394 = vmatpush1.bf16.msra.mxu0 %v13034_v51  ;;  %v13263_v51 = vld [vmem:[%s14734_s2 + $0x10] ss:$8 sps:$4 sm:$0xff]  }
 0xbd0   :  { %4395 = vmatprep.subr.bf16.mxu0 %v13043_v52  ;;  %v13269_v52 = vld [vmem:[%s14734_s2 + $0x24] ss:$8 sps:$4 sm:$0xff]  }
 0xbd3   :  { %4396 = vmatpush1.bf16.msra.mxu0 %v13048_v53  ;;  %v13275_v53 = vld [vmem:[%s14734_s2 + $0x20] ss:$8 sps:$4 sm:$0xff]  }
 0xbd4   :  { %4397 = vmatprep.subr.bf16.mxu0 %v13057_v54  ;;  %v13281_v54 = vld [vmem:[%s14734_s2 + $0x34] ss:$8 sps:$4 sm:$0xff]  }
 0xbd7   :  { %4398 = vmatpush1.bf16.msra.mxu0 %v13062_v55  ;;  %v13287_v55 = vld [vmem:[%s14734_s2 + $0x30] ss:$8 sps:$4 sm:$0xff]  }
 0xbd8   :  { %4399 = vmatprep.subr.bf16.mxu0 %v13071_v56  ;;  %v13293_v56 = vld [vmem:[%s14734_s2 + $0x44] ss:$8 sps:$4 sm:$0xff]  }
 0xbdb   :  { %4400 = vmatpush1.bf16.msra.mxu0 %v13076_v58  ;;  %v13299_v58 = vld [vmem:[%s14734_s2 + $0x40] ss:$8 sps:$4 sm:$0xff]  }
 0xbdc   :  { %4401 = vmatprep.subr.bf16.mxu0 %v13085_v20  ;;  %v13305_v20 = vld [vmem:[%s14734_s2 + $0x54] ss:$8 sps:$4 sm:$0xff]  }
 0xbdf   :  { %4402 = vmatpush1.bf16.msra.mxu0 %v13090_v24  ;;  %v13311_v24 = vld [vmem:[%s14734_s2 + $0x50] ss:$8 sps:$4 sm:$0xff]  }
 0xbe0   :  { %4403 = vmatprep.subr.bf16.mxu0 %v13099_v25  ;;  %v13317_v25 = vld [vmem:[%s14734_s2 + $0x64] ss:$8 sps:$4 sm:$0xff]  }
 0xbe3   :  { %4404 = vmatpush1.bf16.msra.mxu0 %v13104_v26  ;;  %v13323_v26 = vld [vmem:[%s14734_s2 + $0x60] ss:$8 sps:$4 sm:$0xff]  }
 0xbe4   :  { %4965 = vmatprep.subr.bf16.mxu0 %v13250_v17 }
 0xc79   :  { %v3815_v38 = vpop.f32.mrb[24].mxu0 }
 0xc7a   :  { %v3817_v40 = vpop.f32.mrb[25].mxu0 }
 0xc7b   :  { %v3824_v41 = vcombine.low %v3815_v38, %v3817_v40  ;;  %v3819_v42 = vpop.f32.mrb[26].mxu0  ;;  %v13450_v38 = vld [vmem:[%s14734_s2 + $0xe4] ss:$8 sps:$4 sm:$0xff]   ;;  %v13455_v40 = vld [vmem:[%s14734_s2 + $0xe0] ss:$8 sps:$4 sm:$0xff]  }
 0xc7c   :  { %v3820_v45 = vpop.f32.mrb[27].mxu0  ;;  %v13469_v42 = vld [vmem:[%s14734_s2 + $0xf0] ss:$8 sps:$4 sm:$0xff]  }
 0xc7d   :  { %v3831_v46 = vrot.slane %v3824_v41, %v12419_v43  ;;  %v13464_v41 = vld [vmem:[%s14734_s2 + $0xf4] ss:$8 sps:$4 sm:$0xff]  }
 0xc7f   :  { %v3833_v47 = vadd.f32 %v10835_v44, %v3831_v46 }
 0xc81   :  { %12060 = vtanh.f32 %v3833_v47 }
 0xc8b   :  { %v12061_v48 = vpop.eup %12060 }
 0xc8c   :  { %v3843_v1 = vrot.slane %v12061_v48, %v12419_v43  ;;  %3835 = vst [vmem:[#allocation2] sm:$0xf] %v12061_v48  ;;  %v10907_v48 = vld [vmem:[%s14732_s0 + $0x38] sm:$0xf] }
 0xc8e   :  { %v3844_v2 = vcombine.high %v3843_v1, %v3843_v1 }
 0xc90   :  { %v10869_v3 = vpack.c.bf16 %v3844_v2, %v3843_v1 }
 0xc92   :  { %v3858_v4 = vrot.slane %v10869_v3, %v12426_v57 }
 0xc93   :  { %v10872_v59 = vld.sshfl [vmem:[#allocation2] sm:$0x33 pattern:$0x76325410] }
 0xc94   :  { %11674 = vst.sshfl [vmem:[%s14735_s3 + $0x18] sm:$0x5 pattern:$0x73625140] %v3858_v4  ;;  %v3880_v60 = vcombine.high %v10872_v59, %v10872_v59  ;;  %v3883_v15 = vpack.c.bf16 %v10872_v59, %v10872_v59 }
 0xc96   :  { %v3884_v13 = vpack.c.bf16 %v3880_v60, %v3880_v60 }
 0xc98   :  { %4109 = vmatprep.mubr.bf16.mxu1 %v3884_v13 }
 0xc99   :  { %4110 = vmatmul.mubr.bf16.vlgmr.msra.gmra.mrb[24].mxu1 %v3883_v15 }
 0xc9a   :  { %4670 = vmatpush1.bf16.msra.mxu1 %v13245_v16 }
 0xc9b   :  { %4671 = vmatprep.subr.bf16.mxu1 %v13255_v18 }
 0xc9e   :  { %4672 = vmatpush1.bf16.msra.mxu1 %v13263_v51 }
 0xc9f   :  { %4673 = vmatprep.subr.bf16.mxu1 %v13269_v52 }
 0xca2   :  { %4674 = vmatpush1.bf16.msra.mxu1 %v13275_v53 }
 0xca3   :  { %4675 = vmatprep.subr.bf16.mxu1 %v13281_v54 }
 0xca6   :  { %4676 = vmatpush1.bf16.msra.mxu1 %v13287_v55 }
 0xca7   :  { %4677 = vmatprep.subr.bf16.mxu1 %v13293_v56 }
 0xcaa   :  { %4678 = vmatpush1.bf16.msra.mxu1 %v13299_v58 }
 0xcab   :  { %4679 = vmatprep.subr.bf16.mxu1 %v13305_v20 }
 0xcae   :  { %4680 = vmatpush1.bf16.msra.mxu1 %v13311_v24 }
 0xcaf   :  { %4681 = vmatprep.subr.bf16.mxu1 %v13317_v25 }
 0xcb2   :  { %4682 = vmatpush1.bf16.msra.mxu1 %v13323_v26 }
 0xcb3   :  { %4683 = vmatprep.subr.bf16.mxu1 %v13329_v23 }
 0xcb6   :  { %4684 = vmatpush1.bf16.msra.mxu1 %v13335_v22 }
 0xcb7   :  { %4685 = vmatprep.subr.bf16.mxu1 %v13366_v35 }
 0xcba   :  { %4686 = vmatpush1.bf16.msra.mxu1 %v13371_v49 }
 0xcbb   :  { %4687 = vmatprep.subr.bf16.mxu1 %v13380_v50 }
 0xcbe   :  { %4688 = vmatpush1.bf16.msra.mxu1 %v13385_v36 }
 0xcbf   :  { %4689 = vmatprep.subr.bf16.mxu1 %v13394_v37 }
 0xcc2   :  { %4690 = vmatpush1.bf16.msra.mxu1 %v13399_v61 }
 0xcc3   :  { %4691 = vmatprep.subr.bf16.mxu1 %v13408_v62 }
 0xcc6   :  { %4692 = vmatpush1.bf16.msra.mxu1 %v13413_v63 }
 0xcc7   :  { %4693 = vmatprep.subr.bf16.mxu1 %v13422_v0 }
 0xcca   :  { %4694 = vmatpush1.bf16.msra.mxu1 %v13427_v14 }
 0xccb   :  { %4695 = vmatprep.subr.bf16.mxu1 %v13436_v19 }
 0xcce   :  { %4696 = vmatpush1.bf16.msra.mxu1 %v13441_v21 }
 0xccf   :  { %4697 = vmatprep.subr.bf16.mxu1 %v13450_v38 }
 0xcd2   :  { %4698 = vmatpush1.bf16.msra.mxu1 %v13455_v40 }
 0xcd3   :  { %4699 = vmatprep.subr.bf16.mxu1 %v13464_v41 }
 0xcd6   :  { %4700 = vmatpush1.bf16.msra.mxu1 %v13469_v42 }
 0xcd7   :  { %5261 = vmatprep.subr.bf16.mxu1 %v13250_v17 }
 0xd6c   :  { %v4111_v5 = vpop.f32.mrb[24].mxu1 }
 0xd6d   :  { %v4113_v6 = vpop.f32.mrb[25].mxu1 }
 0xd6e   :  { %v4120_v7 = vcombine.low %v4111_v5, %v4113_v6  ;;  %v4115_v8 = vpop.f32.mrb[26].mxu1 }
 0xd6f   :  { %v4116_v10 = vpop.f32.mrb[27].mxu1 }
 0xd70   :  { %v4127_v11 = vrot.slane %v4120_v7, %v12419_v43 }
 0xd72   :  { %v4129_v39 = vadd.f32 %v10871_v9, %v4127_v11 }
 0xd74   :  { %12062 = vtanh.f32 %v4129_v39 }
 0xd7e   :  { %v12063_v12 = vpop.eup %12062 }
 0xd7f   :  { %v4139_v27 = vrot.slane %v12063_v12, %v12419_v43  ;;  %4131 = vst [vmem:[#allocation2] sm:$0xf] %v12063_v12  ;;  %v10943_v12 = vld [vmem:[%s14732_s0 + $0x3c] sm:$0xf] }
 0xd81   :  { %v4140_v28 = vcombine.high %v4139_v27, %v4139_v27 }
 0xd83   :  { %v10905_v29 = vpack.c.bf16 %v4140_v28, %v4139_v27 }
 0xd85   :  { %v4154_v30 = vrot.slane %v10905_v29, %v12426_v57 }
 0xd86   :  { %v10908_v31 = vld.sshfl [vmem:[#allocation2] sm:$0x33 pattern:$0x76325410] }
 0xd87   :  { %11675 = vst.sshfl [vmem:[%s14735_s3 + $0x1a] sm:$0x5 pattern:$0x73625140] %v4154_v30  ;;  %v4176_v32 = vcombine.high %v10908_v31, %v10908_v31  ;;  %v4179_v34 = vpack.c.bf16 %v10908_v31, %v10908_v31 }
 0xd89   :  { %v4180_v33 = vpack.c.bf16 %v4176_v32, %v4176_v32 }
 0xd8b   :  { %4405 = vmatprep.mubr.bf16.mxu0 %v4180_v33 }
 0xd8c   :  { %4406 = vmatmul.mubr.bf16.vlgmr.msra.gmra.mrb[28].mxu0 %v4179_v34 }
 0xd8d   :  { %4966 = vmatpush1.bf16.msra.mxu0 %v13245_v16 }
 0xd8e   :  { %4967 = vmatprep.subr.bf16.mxu0 %v13255_v18 }
 0xd91   :  { %4968 = vmatpush1.bf16.msra.mxu0 %v13263_v51 }
 0xd92   :  { %4969 = vmatprep.subr.bf16.mxu0 %v13269_v52 }
 0xd95   :  { %4970 = vmatpush1.bf16.msra.mxu0 %v13275_v53 }
 0xd96   :  { %4971 = vmatprep.subr.bf16.mxu0 %v13281_v54 }
 0xd99   :  { %4972 = vmatpush1.bf16.msra.mxu0 %v13287_v55 }
 0xd9a   :  { %4973 = vmatprep.subr.bf16.mxu0 %v13293_v56 }
 0xd9d   :  { %4974 = vmatpush1.bf16.msra.mxu0 %v13299_v58 }
 0xd9e   :  { %4975 = vmatprep.subr.bf16.mxu0 %v13305_v20 }
 0xda1   :  { %4976 = vmatpush1.bf16.msra.mxu0 %v13311_v24 }
 0xda2   :  { %4977 = vmatprep.subr.bf16.mxu0 %v13317_v25 }
 0xda5   :  { %4978 = vmatpush1.bf16.msra.mxu0 %v13323_v26 }
 0xda6   :  { %4979 = vmatprep.subr.bf16.mxu0 %v13329_v23 }
 0xda9   :  { %4980 = vmatpush1.bf16.msra.mxu0 %v13335_v22 }
 0xdaa   :  { %4981 = vmatprep.subr.bf16.mxu0 %v13366_v35 }
 0xdad   :  { %4982 = vmatpush1.bf16.msra.mxu0 %v13371_v49 }
 0xdae   :  { %4983 = vmatprep.subr.bf16.mxu0 %v13380_v50 }
 0xdb1   :  { %4984 = vmatpush1.bf16.msra.mxu0 %v13385_v36 }
 0xdb2   :  { %4985 = vmatprep.subr.bf16.mxu0 %v13394_v37 }
 0xdb5   :  { %4986 = vmatpush1.bf16.msra.mxu0 %v13399_v61 }
 0xdb6   :  { %4987 = vmatprep.subr.bf16.mxu0 %v13408_v62 }
 0xdb9   :  { %4988 = vmatpush1.bf16.msra.mxu0 %v13413_v63 }
 0xdba   :  { %4989 = vmatprep.subr.bf16.mxu0 %v13422_v0 }
 0xdbd   :  { %4990 = vmatpush1.bf16.msra.mxu0 %v13427_v14 }
 0xdbe   :  { %4991 = vmatprep.subr.bf16.mxu0 %v13436_v19 }
 0xdc1   :  { %4992 = vmatpush1.bf16.msra.mxu0 %v13441_v21 }
 0xdc2   :  { %4993 = vmatprep.subr.bf16.mxu0 %v13450_v38 }
 0xdc5   :  { %4994 = vmatpush1.bf16.msra.mxu0 %v13455_v40 }
 0xdc6   :  { %4995 = vmatprep.subr.bf16.mxu0 %v13464_v41 }
 0xdc9   :  { %4996 = vmatpush1.bf16.msra.mxu0 %v13469_v42 }
 0xdca   :  { %5557 = vmatprep.subr.bf16.mxu0 %v13250_v17 }
 0xe5f   :  { %v4407_v44 = vpop.f32.mrb[28].mxu0 }
 0xe60   :  { %v4409_v45 = vpop.f32.mrb[29].mxu0 }
 0xe61   :  { %v4416_v46 = vcombine.low %v4407_v44, %v4409_v45  ;;  %v4411_v47 = vpop.f32.mrb[30].mxu0 }
 0xe62   :  { %v4412_v1 = vpop.f32.mrb[31].mxu0 }
 0xe63   :  { %v4423_v2 = vrot.slane %v4416_v46, %v12419_v43 }
 0xe65   :  { %v4425_v3 = vadd.f32 %v10907_v48, %v4423_v2 }
 0xe67   :  { %12064 = vtanh.f32 %v4425_v3  ;;  %v10979_v3 = vld [vmem:[%s14732_s0 + $0x40] sm:$0xf] }
 0xe71   :  { %v12065_v4 = vpop.eup %12064 }
 0xe72   :  { %v4435_v59 = vrot.slane %v12065_v4, %v12419_v43  ;;  %4427 = vst [vmem:[#allocation2] sm:$0xf] %v12065_v4 }
 0xe74   :  { %v4436_v60 = vcombine.high %v4435_v59, %v4435_v59 }
 0xe76   :  { %v10941_v13 = vpack.c.bf16 %v4436_v60, %v4435_v59 }
 0xe78   :  { %v4450_v15 = vrot.slane %v10941_v13, %v12426_v57 }
 0xe79   :  { %v10944_v5 = vld.sshfl [vmem:[#allocation2] sm:$0x33 pattern:$0x76325410] }
 0xe7a   :  { %11676 = vst.sshfl [vmem:[%s14735_s3 + $0x1c] sm:$0x5 pattern:$0x73625140] %v4450_v15  ;;  %v4472_v6 = vcombine.high %v10944_v5, %v10944_v5  ;;  %v4475_v8 = vpack.c.bf16 %v10944_v5, %v10944_v5 }
 0xe7c   :  { %v4476_v7 = vpack.c.bf16 %v4472_v6, %v4472_v6 }
 0xe7e   :  { %4701 = vmatprep.mubr.bf16.mxu1 %v4476_v7 }
 0xe7f   :  { %4702 = vmatmul.mubr.bf16.vlgmr.msra.gmra.mrb[28].mxu1 %v4475_v8 }
 0xe80   :  { %5262 = vmatpush1.bf16.msra.mxu1 %v13245_v16 }
 0xe81   :  { %5263 = vmatprep.subr.bf16.mxu1 %v13255_v18 }
 0xe84   :  { %5264 = vmatpush1.bf16.msra.mxu1 %v13263_v51 }
 0xe85   :  { %5265 = vmatprep.subr.bf16.mxu1 %v13269_v52 }
 0xe88   :  { %5266 = vmatpush1.bf16.msra.mxu1 %v13275_v53 }
 0xe89   :  { %5267 = vmatprep.subr.bf16.mxu1 %v13281_v54 }
 0xe8c   :  { %5268 = vmatpush1.bf16.msra.mxu1 %v13287_v55 }
 0xe8d   :  { %5269 = vmatprep.subr.bf16.mxu1 %v13293_v56 }
 0xe90   :  { %5270 = vmatpush1.bf16.msra.mxu1 %v13299_v58 }
 0xe91   :  { %5271 = vmatprep.subr.bf16.mxu1 %v13305_v20 }
 0xe94   :  { %5272 = vmatpush1.bf16.msra.mxu1 %v13311_v24 }
 0xe95   :  { %5273 = vmatprep.subr.bf16.mxu1 %v13317_v25 }
 0xe98   :  { %5274 = vmatpush1.bf16.msra.mxu1 %v13323_v26 }
 0xe99   :  { %5275 = vmatprep.subr.bf16.mxu1 %v13329_v23 }
 0xe9c   :  { %5276 = vmatpush1.bf16.msra.mxu1 %v13335_v22 }
 0xe9d   :  { %5277 = vmatprep.subr.bf16.mxu1 %v13366_v35 }
 0xea0   :  { %5278 = vmatpush1.bf16.msra.mxu1 %v13371_v49 }
 0xea1   :  { %5279 = vmatprep.subr.bf16.mxu1 %v13380_v50 }
 0xea4   :  { %5280 = vmatpush1.bf16.msra.mxu1 %v13385_v36 }
 0xea5   :  { %5281 = vmatprep.subr.bf16.mxu1 %v13394_v37 }
 0xea8   :  { %5282 = vmatpush1.bf16.msra.mxu1 %v13399_v61 }
 0xea9   :  { %5283 = vmatprep.subr.bf16.mxu1 %v13408_v62 }
 0xeac   :  { %5284 = vmatpush1.bf16.msra.mxu1 %v13413_v63 }
 0xead   :  { %5285 = vmatprep.subr.bf16.mxu1 %v13422_v0 }
 0xeb0   :  { %5286 = vmatpush1.bf16.msra.mxu1 %v13427_v14 }
 0xeb1   :  { %5287 = vmatprep.subr.bf16.mxu1 %v13436_v19 }
 0xeb4   :  { %5288 = vmatpush1.bf16.msra.mxu1 %v13441_v21 }
 0xeb5   :  { %5289 = vmatprep.subr.bf16.mxu1 %v13450_v38 }
 0xeb8   :  { %5290 = vmatpush1.bf16.msra.mxu1 %v13455_v40 }
 0xeb9   :  { %5291 = vmatprep.subr.bf16.mxu1 %v13464_v41 }
 0xebc   :  { %5292 = vmatpush1.bf16.msra.mxu1 %v13469_v42 }
 0xebd   :  { %5853 = vmatprep.subr.bf16.mxu1 %v13250_v17 }
 0xf52   :  { %v4703_v9 = vpop.f32.mrb[28].mxu1 }
 0xf53   :  { %v4705_v10 = vpop.f32.mrb[29].mxu1 }
 0xf54   :  { %v4712_v11 = vcombine.low %v4703_v9, %v4705_v10  ;;  %v4707_v39 = vpop.f32.mrb[30].mxu1 }
 0xf55   :  { %v4708_v27 = vpop.f32.mrb[31].mxu1  ;;  %v13694_v39 = vld [vmem:[%s14734_s2 + $0x74] ss:$8 sps:$4 sm:$0xff]  }
 0xf56   :  { %v4719_v28 = vrot.slane %v4712_v11, %v12419_v43 }
 0xf58   :  { %v4721_v29 = vadd.f32 %v10943_v12, %v4719_v28  ;;  %v13700_v12 = vld [vmem:[%s14734_s2 + $0x70] ss:$8 sps:$4 sm:$0xff]  }
 0xf5a   :  { %12066 = vtanh.f32 %v4721_v29 }
 0xf64   :  { %v12067_v30 = vpop.eup %12066 }
 0xf65   :  { %v4731_v31 = vrot.slane %v12067_v30, %v12419_v43  ;;  %4723 = vst [vmem:[#allocation2] sm:$0xf] %v12067_v30 }
 0xf67   :  { %v4732_v32 = vcombine.high %v4731_v31, %v4731_v31 }
 0xf69   :  { %v10977_v33 = vpack.c.bf16 %v4732_v32, %v4731_v31  ;;  %v11051_v31 = vld [vmem:[%s14732_s0 + $0x48] sm:$0xf] }
 0xf6b   :  { %v4746_v17 = vrot.slane %v10977_v33, %v12426_v57 }
 0xf6c   :  { %v10980_v34 = vld.sshfl [vmem:[#allocation2] sm:$0x33 pattern:$0x76325410] }
 0xf6d   :  { %11677 = vst.sshfl [vmem:[%s14735_s3 + $0x1e] sm:$0x5 pattern:$0x73625140] %v4746_v17  ;;  %v4768_v44 = vcombine.high %v10980_v34, %v10980_v34  ;;  %v4771_v46 = vpack.c.bf16 %v10980_v34, %v10980_v34 }
 0xf6f   :  { %v4772_v45 = vpack.c.bf16 %v4768_v44, %v4768_v44 }
 0xf71   :  { %4997 = vmatprep.mubr.bf16.mxu0 %v4772_v45 }
 0xf72   :  { %4998 = vmatmul.mubr.bf16.vlgmr.msra.gmra.mrb[32].mxu0 %v4771_v46 }
 0xf73   :  { %5558 = vmatpush1.bf16.msra.mxu0 %v13245_v16 }
 0xf74   :  { %5559 = vmatprep.subr.bf16.mxu0 %v13255_v18 }
 0xf77   :  { %5560 = vmatpush1.bf16.msra.mxu0 %v13263_v51 }
 0xf78   :  { %5561 = vmatprep.subr.bf16.mxu0 %v13269_v52 }
 0xf7b   :  { %5562 = vmatpush1.bf16.msra.mxu0 %v13275_v53 }
 0xf7c   :  { %5563 = vmatprep.subr.bf16.mxu0 %v13281_v54 }
 0xf7f   :  { %5564 = vmatpush1.bf16.msra.mxu0 %v13287_v55 }
 0xf80   :  { %5565 = vmatprep.subr.bf16.mxu0 %v13293_v56 }
 0xf83   :  { %5566 = vmatpush1.bf16.msra.mxu0 %v13299_v58 }
 0xf84   :  { %5567 = vmatprep.subr.bf16.mxu0 %v13305_v20 }
 0xf87   :  { %5568 = vmatpush1.bf16.msra.mxu0 %v13311_v24 }
 0xf88   :  { %5569 = vmatprep.subr.bf16.mxu0 %v13317_v25 }
 0xf8b   :  { %5570 = vmatpush1.bf16.msra.mxu0 %v13323_v26 }
 0xf8c   :  { %5571 = vmatprep.subr.bf16.mxu0 %v13329_v23 }
 0xf8f   :  { %5572 = vmatpush1.bf16.msra.mxu0 %v13335_v22 }
 0xf90   :  { %5573 = vmatprep.subr.bf16.mxu0 %v13366_v35 }
 0xf93   :  { %5574 = vmatpush1.bf16.msra.mxu0 %v13371_v49 }
 0xf94   :  { %5575 = vmatprep.subr.bf16.mxu0 %v13380_v50 }
 0xf97   :  { %5576 = vmatpush1.bf16.msra.mxu0 %v13385_v36 }
 0xf98   :  { %5577 = vmatprep.subr.bf16.mxu0 %v13394_v37 }
 0xf9b   :  { %5578 = vmatpush1.bf16.msra.mxu0 %v13399_v61 }
 0xf9c   :  { %5579 = vmatprep.subr.bf16.mxu0 %v13408_v62 }
 0xf9f   :  { %5580 = vmatpush1.bf16.msra.mxu0 %v13413_v63 }
 0xfa0   :  { %5581 = vmatprep.subr.bf16.mxu0 %v13422_v0 }
 0xfa3   :  { %5582 = vmatpush1.bf16.msra.mxu0 %v13427_v14 }
 0xfa4   :  { %5583 = vmatprep.subr.bf16.mxu0 %v13436_v19 }
 0xfa7   :  { %5584 = vmatpush1.bf16.msra.mxu0 %v13441_v21 }
 0xfa8   :  { %5585 = vmatprep.subr.bf16.mxu0 %v13450_v38 }
 0xfab   :  { %5586 = vmatpush1.bf16.msra.mxu0 %v13455_v40 }
 0xfac   :  { %5587 = vmatprep.subr.bf16.mxu0 %v13464_v41 }
 0xfaf   :  { %5588 = vmatpush1.bf16.msra.mxu0 %v13469_v42 }
0x1045   :  { %v4999_v47 = vpop.f32.mrb[32].mxu0 }
0x1046   :  { %v5001_v48 = vpop.f32.mrb[33].mxu0 }
0x1047   :  { %v5008_v1 = vcombine.low %v4999_v47, %v5001_v48  ;;  %v5003_v2 = vpop.f32.mrb[34].mxu0 }
0x1048   :  { %v5004_v4 = vpop.f32.mrb[35].mxu0 }
0x1049   :  { %v5015_v59 = vrot.slane %v5008_v1, %v12419_v43  ;;  %v13731_v4 = vld [vmem:[%s14734_s2 + $0x84] ss:$8 sps:$4 sm:$0xff]  }
0x104b   :  { %v5017_v60 = vadd.f32 %v10979_v3, %v5015_v59  ;;  %v13736_v59 = vld [vmem:[%s14734_s2 + $0x80] ss:$8 sps:$4 sm:$0xff]  }
0x104d   :  { %12068 = vtanh.f32 %v5017_v60  ;;  %v13745_v60 = vld [vmem:[%s14734_s2 + $0x94] ss:$8 sps:$4 sm:$0xff]  }
0x1057   :  { %v12069_v13 = vpop.eup %12068 }
0x1058   :  { %v5027_v15 = vrot.slane %v12069_v13, %v12419_v43  ;;  %5019 = vst [vmem:[#allocation2] sm:$0xf] %v12069_v13  ;;  %v13750_v13 = vld [vmem:[%s14734_s2 + $0x90] ss:$8 sps:$4 sm:$0xff]  }
0x105a   :  { %v5028_v5 = vcombine.high %v5027_v15, %v5027_v15 }
0x105c   :  { %v11013_v6 = vpack.c.bf16 %v5028_v5, %v5027_v15  ;;  %v13759_v15 = vld [vmem:[%s14734_s2 + $0xa4] ss:$8 sps:$4 sm:$0xff]   ;;  %v13764_v5 = vld [vmem:[%s14734_s2 + $0xa0] ss:$8 sps:$4 sm:$0xff]  }
0x105e   :  { %v5042_v7 = vrot.slane %v11013_v6, %v12426_v57  ;;  %v13773_v6 = vld [vmem:[%s14734_s2 + $0xb4] ss:$8 sps:$4 sm:$0xff]  }
0x105f   :  { %v11016_v8 = vld.sshfl [vmem:[#allocation2] sm:$0x33 pattern:$0x76325410] }
0x1060   :  { %11678 = vst.sshfl [vmem:[%s14735_s3 + $0x20] sm:$0x5 pattern:$0x73625140] %v5042_v7  ;;  %v5064_v9 = vcombine.high %v11016_v8, %v11016_v8  ;;  %v5067_v11 = vpack.c.bf16 %v11016_v8, %v11016_v8  ;;  %v13778_v7 = vld [vmem:[%s14734_s2 + $0xb0] ss:$8 sps:$4 sm:$0xff]  }
0x1061   :  { %v13787_v8 = vld [vmem:[%s14734_s2 + $0xc4] ss:$8 sps:$4 sm:$0xff]  }
0x1062   :  { %v5068_v10 = vpack.c.bf16 %v5064_v9, %v5064_v9  ;;  %v13792_v9 = vld [vmem:[%s14734_s2 + $0xc0] ss:$8 sps:$4 sm:$0xff]  }
0x1064   :  { %5293 = vmatprep.mubr.bf16.mxu1 %v5068_v10  ;;  %v13801_v10 = vld [vmem:[%s14734_s2 + $0xd4] ss:$8 sps:$4 sm:$0xff]  }
0x1065   :  { %5294 = vmatmul.mubr.bf16.vlgmr.msra.gmra.mrb[32].mxu1 %v5067_v11  ;;  %v13806_v11 = vld [vmem:[%s14734_s2 + $0xd0] ss:$8 sps:$4 sm:$0xff]  }
0x1066   :  { %5854 = vmatpush1.bf16.msra.mxu1 %v13245_v16 }
0x1067   :  { %5855 = vmatprep.subr.bf16.mxu1 %v13255_v18 }
0x106a   :  { %5856 = vmatpush1.bf16.msra.mxu1 %v13263_v51 }
0x106b   :  { %5857 = vmatprep.subr.bf16.mxu1 %v13269_v52 }
0x106e   :  { %5858 = vmatpush1.bf16.msra.mxu1 %v13275_v53  ;;  %v11015_v53 = vld [vmem:[%s14732_s0 + $0x44] sm:$0xf] }
0x106f   :  { %5859 = vmatprep.subr.bf16.mxu1 %v13281_v54 }
0x1072   :  { %5860 = vmatpush1.bf16.msra.mxu1 %v13287_v55 }
0x1073   :  { %5861 = vmatprep.subr.bf16.mxu1 %v13293_v56 }
0x1076   :  { %5862 = vmatpush1.bf16.msra.mxu1 %v13299_v58 }
0x1077   :  { %5863 = vmatprep.subr.bf16.mxu1 %v13305_v20 }
0x107a   :  { %5864 = vmatpush1.bf16.msra.mxu1 %v13311_v24 }
0x107b   :  { %5865 = vmatprep.subr.bf16.mxu1 %v13317_v25 }
0x107e   :  { %5866 = vmatpush1.bf16.msra.mxu1 %v13323_v26 }
0x107f   :  { %5867 = vmatprep.subr.bf16.mxu1 %v13329_v23 }
0x1082   :  { %5868 = vmatpush1.bf16.msra.mxu1 %v13335_v22 }
0x1083   :  { %5869 = vmatprep.subr.bf16.mxu1 %v13366_v35 }
0x1086   :  { %5870 = vmatpush1.bf16.msra.mxu1 %v13371_v49 }
0x1087   :  { %5871 = vmatprep.subr.bf16.mxu1 %v13380_v50  ;;  %v13610_v50 = vld [vmem:[%s14734_s2] ss:$8 sps:$4 sm:$0xff]  }
0x108a   :  { %5872 = vmatpush1.bf16.msra.mxu1 %v13385_v36  ;;  %v13615_v36 = vld [vmem:[%s14734_s2 + $0x4] ss:$8 sps:$4 sm:$0xff]  }
0x108b   :  { %5873 = vmatprep.subr.bf16.mxu1 %v13394_v37  ;;  %v13620_v37 = vld [vmem:[%s14734_s2 + $0x14] ss:$8 sps:$4 sm:$0xff]   ;;  %6149 = vmatprep.subr.bf16.mxu0 %v13615_v36 }
0x108e   :  { %5874 = vmatpush1.bf16.msra.mxu1 %v13399_v61  ;;  %v13628_v61 = vld [vmem:[%s14734_s2 + $0x10] ss:$8 sps:$4 sm:$0xff]  }
0x108f   :  { %5875 = vmatprep.subr.bf16.mxu1 %v13408_v62  ;;  %v13634_v62 = vld [vmem:[%s14734_s2 + $0x24] ss:$8 sps:$4 sm:$0xff]  }
0x1092   :  { %5876 = vmatpush1.bf16.msra.mxu1 %v13413_v63  ;;  %v13640_v63 = vld [vmem:[%s14734_s2 + $0x20] ss:$8 sps:$4 sm:$0xff]  }
0x1093   :  { %5877 = vmatprep.subr.bf16.mxu1 %v13422_v0  ;;  %v13646_v0 = vld [vmem:[%s14734_s2 + $0x34] ss:$8 sps:$4 sm:$0xff]  }
0x1096   :  { %5878 = vmatpush1.bf16.msra.mxu1 %v13427_v14  ;;  %v13652_v14 = vld [vmem:[%s14734_s2 + $0x30] ss:$8 sps:$4 sm:$0xff]  }
0x1097   :  { %5879 = vmatprep.subr.bf16.mxu1 %v13436_v19  ;;  %v13658_v19 = vld [vmem:[%s14734_s2 + $0x44] ss:$8 sps:$4 sm:$0xff]  }
0x109a   :  { %5880 = vmatpush1.bf16.msra.mxu1 %v13441_v21  ;;  %v13664_v21 = vld [vmem:[%s14734_s2 + $0x40] ss:$8 sps:$4 sm:$0xff]  }
0x109b   :  { %5881 = vmatprep.subr.bf16.mxu1 %v13450_v38  ;;  %v13670_v38 = vld [vmem:[%s14734_s2 + $0x54] ss:$8 sps:$4 sm:$0xff]  }
0x109e   :  { %5882 = vmatpush1.bf16.msra.mxu1 %v13455_v40  ;;  %v13676_v40 = vld [vmem:[%s14734_s2 + $0x50] ss:$8 sps:$4 sm:$0xff]  }
0x109f   :  { %5883 = vmatprep.subr.bf16.mxu1 %v13464_v41  ;;  %v13682_v41 = vld [vmem:[%s14734_s2 + $0x64] ss:$8 sps:$4 sm:$0xff]  }
0x10a2   :  { %5884 = vmatpush1.bf16.msra.mxu1 %v13469_v42  ;;  %v13688_v42 = vld [vmem:[%s14734_s2 + $0x60] ss:$8 sps:$4 sm:$0xff]  }
0x10a3   :  { %6445 = vmatprep.subr.bf16.mxu1 %v13615_v36 }
0x1138   :  { %v5295_v16 = vpop.f32.mrb[32].mxu1 }
0x1139   :  { %v5297_v18 = vpop.f32.mrb[33].mxu1 }
0x113a   :  { %v5304_v51 = vcombine.low %v5295_v16, %v5297_v18  ;;  %v5299_v52 = vpop.f32.mrb[34].mxu1  ;;  %v13815_v16 = vld [vmem:[%s14734_s2 + $0xe4] ss:$8 sps:$4 sm:$0xff]   ;;  %v13820_v18 = vld [vmem:[%s14734_s2 + $0xe0] ss:$8 sps:$4 sm:$0xff]  }
0x113b   :  { %v5300_v54 = vpop.f32.mrb[35].mxu1  ;;  %v13834_v52 = vld [vmem:[%s14734_s2 + $0xf0] ss:$8 sps:$4 sm:$0xff]  }
0x113c   :  { %v5311_v55 = vrot.slane %v5304_v51, %v12419_v43  ;;  %v13829_v51 = vld [vmem:[%s14734_s2 + $0xf4] ss:$8 sps:$4 sm:$0xff]  }
0x113e   :  { %v5313_v56 = vadd.f32 %v11015_v53, %v5311_v55 }
0x1140   :  { %12070 = vtanh.f32 %v5313_v56 }
0x114a   :  { %v12071_v58 = vpop.eup %12070 }
0x114b   :  { %v5323_v20 = vrot.slane %v12071_v58, %v12419_v43  ;;  %5315 = vst [vmem:[#allocation2] sm:$0xf] %v12071_v58  ;;  %v11087_v58 = vld [vmem:[%s14732_s0 + $0x4c] sm:$0xf] }
0x114d   :  { %v5324_v24 = vcombine.high %v5323_v20, %v5323_v20 }
0x114f   :  { %v11049_v25 = vpack.c.bf16 %v5324_v24, %v5323_v20 }
0x1151   :  { %v5338_v26 = vrot.slane %v11049_v25, %v12426_v57 }
0x1152   :  { %v11052_v23 = vld.sshfl [vmem:[#allocation2] sm:$0x33 pattern:$0x76325410] }
0x1153   :  { %11679 = vst.sshfl [vmem:[%s14735_s3 + $0x22] sm:$0x5 pattern:$0x73625140] %v5338_v26  ;;  %v5360_v22 = vcombine.high %v11052_v23, %v11052_v23  ;;  %v5363_v49 = vpack.c.bf16 %v11052_v23, %v11052_v23 }
0x1155   :  { %v5364_v35 = vpack.c.bf16 %v5360_v22, %v5360_v22 }
0x1157   :  { %5589 = vmatprep.mubr.bf16.mxu0 %v5364_v35 }
0x1158   :  { %5590 = vmatmul.mubr.bf16.vlgmr.msra.gmra.mrb[36].mxu0 %v5363_v49 }
0x1159   :  { %6150 = vmatpush1.bf16.msra.mxu0 %v13610_v50 }
0x115a   :  { %6151 = vmatprep.subr.bf16.mxu0 %v13620_v37 }
0x115d   :  { %6152 = vmatpush1.bf16.msra.mxu0 %v13628_v61 }
0x115e   :  { %6153 = vmatprep.subr.bf16.mxu0 %v13634_v62 }
0x1161   :  { %6154 = vmatpush1.bf16.msra.mxu0 %v13640_v63 }
0x1162   :  { %6155 = vmatprep.subr.bf16.mxu0 %v13646_v0 }
0x1165   :  { %6156 = vmatpush1.bf16.msra.mxu0 %v13652_v14 }
0x1166   :  { %6157 = vmatprep.subr.bf16.mxu0 %v13658_v19 }
0x1169   :  { %6158 = vmatpush1.bf16.msra.mxu0 %v13664_v21 }
0x116a   :  { %6159 = vmatprep.subr.bf16.mxu0 %v13670_v38 }
0x116d   :  { %6160 = vmatpush1.bf16.msra.mxu0 %v13676_v40 }
0x116e   :  { %6161 = vmatprep.subr.bf16.mxu0 %v13682_v41 }
0x1171   :  { %6162 = vmatpush1.bf16.msra.mxu0 %v13688_v42 }
0x1172   :  { %6163 = vmatprep.subr.bf16.mxu0 %v13694_v39 }
0x1175   :  { %6164 = vmatpush1.bf16.msra.mxu0 %v13700_v12 }
0x1176   :  { %6165 = vmatprep.subr.bf16.mxu0 %v13731_v4 }
0x1179   :  { %6166 = vmatpush1.bf16.msra.mxu0 %v13736_v59 }
0x117a   :  { %6167 = vmatprep.subr.bf16.mxu0 %v13745_v60 }
0x117d   :  { %6168 = vmatpush1.bf16.msra.mxu0 %v13750_v13 }
0x117e   :  { %6169 = vmatprep.subr.bf16.mxu0 %v13759_v15 }
0x1181   :  { %6170 = vmatpush1.bf16.msra.mxu0 %v13764_v5 }
0x1182   :  { %6171 = vmatprep.subr.bf16.mxu0 %v13773_v6 }
0x1185   :  { %6172 = vmatpush1.bf16.msra.mxu0 %v13778_v7 }
0x1186   :  { %6173 = vmatprep.subr.bf16.mxu0 %v13787_v8 }
0x1189   :  { %6174 = vmatpush1.bf16.msra.mxu0 %v13792_v9 }
0x118a   :  { %6175 = vmatprep.subr.bf16.mxu0 %v13801_v10 }
0x118d   :  { %6176 = vmatpush1.bf16.msra.mxu0 %v13806_v11 }
0x118e   :  { %6177 = vmatprep.subr.bf16.mxu0 %v13815_v16 }
0x1191   :  { %6178 = vmatpush1.bf16.msra.mxu0 %v13820_v18 }
0x1192   :  { %6179 = vmatprep.subr.bf16.mxu0 %v13829_v51 }
0x1195   :  { %6180 = vmatpush1.bf16.msra.mxu0 %v13834_v52 }
0x1196   :  { %6741 = vmatprep.subr.bf16.mxu0 %v13615_v36 }
0x122b   :  { %v5591_v27 = vpop.f32.mrb[36].mxu0 }
0x122c   :  { %v5593_v28 = vpop.f32.mrb[37].mxu0 }
0x122d   :  { %v5600_v29 = vcombine.low %v5591_v27, %v5593_v28  ;;  %v5595_v30 = vpop.f32.mrb[38].mxu0 }
0x122e   :  { %v5596_v32 = vpop.f32.mrb[39].mxu0 }
0x122f   :  { %v5607_v33 = vrot.slane %v5600_v29, %v12419_v43 }
0x1231   :  { %v5609_v17 = vadd.f32 %v11051_v31, %v5607_v33 }
0x1233   :  { %12072 = vtanh.f32 %v5609_v17 }
0x123d   :  { %v12073_v34 = vpop.eup %12072 }
0x123e   :  { %v5619_v44 = vrot.slane %v12073_v34, %v12419_v43  ;;  %5611 = vst [vmem:[#allocation2] sm:$0xf] %v12073_v34  ;;  %v11123_v34 = vld [vmem:[%s14732_s0 + $0x50] sm:$0xf] }
0x1240   :  { %v5620_v45 = vcombine.high %v5619_v44, %v5619_v44 }
0x1242   :  { %v11085_v46 = vpack.c.bf16 %v5620_v45, %v5619_v44 }
0x1244   :  { %v5634_v47 = vrot.slane %v11085_v46, %v12426_v57 }
0x1245   :  { %v11088_v48 = vld.sshfl [vmem:[#allocation2] sm:$0x33 pattern:$0x76325410] }
0x1246   :  { %11680 = vst.sshfl [vmem:[%s14735_s3 + $0x24] sm:$0x5 pattern:$0x73625140] %v5634_v47  ;;  %v5656_v1 = vcombine.high %v11088_v48, %v11088_v48  ;;  %v5659_v3 = vpack.c.bf16 %v11088_v48, %v11088_v48 }
0x1248   :  { %v5660_v2 = vpack.c.bf16 %v5656_v1, %v5656_v1 }
0x124a   :  { %5885 = vmatprep.mubr.bf16.mxu1 %v5660_v2 }
0x124b   :  { %5886 = vmatmul.mubr.bf16.vlgmr.msra.gmra.mrb[36].mxu1 %v5659_v3 }
0x124c   :  { %6446 = vmatpush1.bf16.msra.mxu1 %v13610_v50 }
0x124d   :  { %6447 = vmatprep.subr.bf16.mxu1 %v13620_v37 }
0x1250   :  { %6448 = vmatpush1.bf16.msra.mxu1 %v13628_v61 }
0x1251   :  { %6449 = vmatprep.subr.bf16.mxu1 %v13634_v62 }
0x1254   :  { %6450 = vmatpush1.bf16.msra.mxu1 %v13640_v63 }
0x1255   :  { %6451 = vmatprep.subr.bf16.mxu1 %v13646_v0 }
0x1258   :  { %6452 = vmatpush1.bf16.msra.mxu1 %v13652_v14 }
0x1259   :  { %6453 = vmatprep.subr.bf16.mxu1 %v13658_v19 }
0x125c   :  { %6454 = vmatpush1.bf16.msra.mxu1 %v13664_v21 }
0x125d   :  { %6455 = vmatprep.subr.bf16.mxu1 %v13670_v38 }
0x1260   :  { %6456 = vmatpush1.bf16.msra.mxu1 %v13676_v40 }
0x1261   :  { %6457 = vmatprep.subr.bf16.mxu1 %v13682_v41 }
0x1264   :  { %6458 = vmatpush1.bf16.msra.mxu1 %v13688_v42 }
0x1265   :  { %6459 = vmatprep.subr.bf16.mxu1 %v13694_v39 }
0x1268   :  { %6460 = vmatpush1.bf16.msra.mxu1 %v13700_v12 }
0x1269   :  { %6461 = vmatprep.subr.bf16.mxu1 %v13731_v4 }
0x126c   :  { %6462 = vmatpush1.bf16.msra.mxu1 %v13736_v59 }
0x126d   :  { %6463 = vmatprep.subr.bf16.mxu1 %v13745_v60 }
0x1270   :  { %6464 = vmatpush1.bf16.msra.mxu1 %v13750_v13 }
0x1271   :  { %6465 = vmatprep.subr.bf16.mxu1 %v13759_v15 }
0x1274   :  { %6466 = vmatpush1.bf16.msra.mxu1 %v13764_v5 }
0x1275   :  { %6467 = vmatprep.subr.bf16.mxu1 %v13773_v6 }
0x1278   :  { %6468 = vmatpush1.bf16.msra.mxu1 %v13778_v7 }
0x1279   :  { %6469 = vmatprep.subr.bf16.mxu1 %v13787_v8 }
0x127c   :  { %6470 = vmatpush1.bf16.msra.mxu1 %v13792_v9 }
0x127d   :  { %6471 = vmatprep.subr.bf16.mxu1 %v13801_v10 }
0x1280   :  { %6472 = vmatpush1.bf16.msra.mxu1 %v13806_v11 }
0x1281   :  { %6473 = vmatprep.subr.bf16.mxu1 %v13815_v16 }
0x1284   :  { %6474 = vmatpush1.bf16.msra.mxu1 %v13820_v18 }
0x1285   :  { %6475 = vmatprep.subr.bf16.mxu1 %v13829_v51 }
0x1288   :  { %6476 = vmatpush1.bf16.msra.mxu1 %v13834_v52 }
0x1289   :  { %7037 = vmatprep.subr.bf16.mxu1 %v13615_v36 }
0x131e   :  { %v5887_v53 = vpop.f32.mrb[36].mxu1 }
0x131f   :  { %v5889_v54 = vpop.f32.mrb[37].mxu1 }
0x1320   :  { %v5896_v55 = vcombine.low %v5887_v53, %v5889_v54  ;;  %v5891_v56 = vpop.f32.mrb[38].mxu1 }
0x1321   :  { %v5892_v20 = vpop.f32.mrb[39].mxu1 }
0x1322   :  { %v5903_v24 = vrot.slane %v5896_v55, %v12419_v43 }
0x1324   :  { %v5905_v25 = vadd.f32 %v11087_v58, %v5903_v24 }
0x1326   :  { %12074 = vtanh.f32 %v5905_v25  ;;  %v11159_v25 = vld [vmem:[%s14732_s0 + $0x54] sm:$0xf] }
0x1330   :  { %v12075_v26 = vpop.eup %12074 }
0x1331   :  { %v5915_v23 = vrot.slane %v12075_v26, %v12419_v43  ;;  %5907 = vst [vmem:[#allocation2] sm:$0xf] %v12075_v26 }
0x1333   :  { %v5916_v22 = vcombine.high %v5915_v23, %v5915_v23 }
0x1335   :  { %v11121_v35 = vpack.c.bf16 %v5916_v22, %v5915_v23 }
0x1337   :  { %v5930_v49 = vrot.slane %v11121_v35, %v12426_v57 }
0x1338   :  { %v11124_v27 = vld.sshfl [vmem:[#allocation2] sm:$0x33 pattern:$0x76325410] }
0x1339   :  { %11681 = vst.sshfl [vmem:[%s14735_s3 + $0x26] sm:$0x5 pattern:$0x73625140] %v5930_v49  ;;  %v5952_v28 = vcombine.high %v11124_v27, %v11124_v27  ;;  %v5955_v30 = vpack.c.bf16 %v11124_v27, %v11124_v27 }
0x133b   :  { %v5956_v29 = vpack.c.bf16 %v5952_v28, %v5952_v28 }
0x133d   :  { %6181 = vmatprep.mubr.bf16.mxu0 %v5956_v29 }
0x133e   :  { %6182 = vmatmul.mubr.bf16.vlgmr.msra.gmra.mrb[40].mxu0 %v5955_v30 }
0x133f   :  { %6742 = vmatpush1.bf16.msra.mxu0 %v13610_v50 }
0x1340   :  { %6743 = vmatprep.subr.bf16.mxu0 %v13620_v37 }
0x1343   :  { %6744 = vmatpush1.bf16.msra.mxu0 %v13628_v61 }
0x1344   :  { %6745 = vmatprep.subr.bf16.mxu0 %v13634_v62 }
0x1347   :  { %6746 = vmatpush1.bf16.msra.mxu0 %v13640_v63 }
0x1348   :  { %6747 = vmatprep.subr.bf16.mxu0 %v13646_v0 }
0x134b   :  { %6748 = vmatpush1.bf16.msra.mxu0 %v13652_v14 }
0x134c   :  { %6749 = vmatprep.subr.bf16.mxu0 %v13658_v19 }
0x134f   :  { %6750 = vmatpush1.bf16.msra.mxu0 %v13664_v21 }
0x1350   :  { %6751 = vmatprep.subr.bf16.mxu0 %v13670_v38 }
0x1353   :  { %6752 = vmatpush1.bf16.msra.mxu0 %v13676_v40 }
0x1354   :  { %6753 = vmatprep.subr.bf16.mxu0 %v13682_v41 }
0x1357   :  { %6754 = vmatpush1.bf16.msra.mxu0 %v13688_v42 }
0x1358   :  { %6755 = vmatprep.subr.bf16.mxu0 %v13694_v39 }
0x135b   :  { %6756 = vmatpush1.bf16.msra.mxu0 %v13700_v12 }
0x135c   :  { %6757 = vmatprep.subr.bf16.mxu0 %v13731_v4 }
0x135f   :  { %6758 = vmatpush1.bf16.msra.mxu0 %v13736_v59 }
0x1360   :  { %6759 = vmatprep.subr.bf16.mxu0 %v13745_v60 }
0x1363   :  { %6760 = vmatpush1.bf16.msra.mxu0 %v13750_v13 }
0x1364   :  { %6761 = vmatprep.subr.bf16.mxu0 %v13759_v15 }
0x1367   :  { %6762 = vmatpush1.bf16.msra.mxu0 %v13764_v5 }
0x1368   :  { %6763 = vmatprep.subr.bf16.mxu0 %v13773_v6 }
0x136b   :  { %6764 = vmatpush1.bf16.msra.mxu0 %v13778_v7 }
0x136c   :  { %6765 = vmatprep.subr.bf16.mxu0 %v13787_v8 }
0x136f   :  { %6766 = vmatpush1.bf16.msra.mxu0 %v13792_v9 }
0x1370   :  { %6767 = vmatprep.subr.bf16.mxu0 %v13801_v10 }
0x1373   :  { %6768 = vmatpush1.bf16.msra.mxu0 %v13806_v11 }
0x1374   :  { %6769 = vmatprep.subr.bf16.mxu0 %v13815_v16 }
0x1377   :  { %6770 = vmatpush1.bf16.msra.mxu0 %v13820_v18 }
0x1378   :  { %6771 = vmatprep.subr.bf16.mxu0 %v13829_v51 }
0x137b   :  { %6772 = vmatpush1.bf16.msra.mxu0 %v13834_v52 }
0x137c   :  { %7333 = vmatprep.subr.bf16.mxu0 %v13615_v36 }
0x1411   :  { %v6183_v31 = vpop.f32.mrb[40].mxu0 }
0x1412   :  { %v6185_v32 = vpop.f32.mrb[41].mxu0 }
0x1413   :  { %v6192_v33 = vcombine.low %v6183_v31, %v6185_v32  ;;  %v6187_v17 = vpop.f32.mrb[42].mxu0 }
0x1414   :  { %v6188_v44 = vpop.f32.mrb[43].mxu0  ;;  %v14059_v17 = vld [vmem:[%s14734_s2 + $0x74] ss:$8 sps:$4 sm:$0xff]  }
0x1415   :  { %v6199_v45 = vrot.slane %v6192_v33, %v12419_v43 }
0x1417   :  { %v6201_v46 = vadd.f32 %v11123_v34, %v6199_v45  ;;  %v14065_v34 = vld [vmem:[%s14734_s2 + $0x70] ss:$8 sps:$4 sm:$0xff]  }
0x1419   :  { %12076 = vtanh.f32 %v6201_v46 }
0x1423   :  { %v12077_v47 = vpop.eup %12076 }
0x1424   :  { %v6211_v48 = vrot.slane %v12077_v47, %v12419_v43  ;;  %6203 = vst [vmem:[#allocation2] sm:$0xf] %v12077_v47 }
0x1426   :  { %v6212_v1 = vcombine.high %v6211_v48, %v6211_v48 }
0x1428   :  { %v11157_v2 = vpack.c.bf16 %v6212_v1, %v6211_v48  ;;  %v11231_v48 = vld [vmem:[%s14732_s0 + $0x5c] sm:$0xf] }
0x142a   :  { %v6226_v36 = vrot.slane %v11157_v2, %v12426_v57 }
0x142b   :  { %v11160_v3 = vld.sshfl [vmem:[#allocation2] sm:$0x33 pattern:$0x76325410] }
0x142c   :  { %11682 = vst.sshfl [vmem:[%s14735_s3 + $0x28] sm:$0x5 pattern:$0x73625140] %v6226_v36  ;;  %v6248_v53 = vcombine.high %v11160_v3, %v11160_v3  ;;  %v6251_v55 = vpack.c.bf16 %v11160_v3, %v11160_v3 }
0x142e   :  { %v6252_v54 = vpack.c.bf16 %v6248_v53, %v6248_v53 }
0x1430   :  { %6477 = vmatprep.mubr.bf16.mxu1 %v6252_v54 }
0x1431   :  { %6478 = vmatmul.mubr.bf16.vlgmr.msra.gmra.mrb[40].mxu1 %v6251_v55 }
0x1432   :  { %7038 = vmatpush1.bf16.msra.mxu1 %v13610_v50 }
0x1433   :  { %7039 = vmatprep.subr.bf16.mxu1 %v13620_v37 }
0x1436   :  { %7040 = vmatpush1.bf16.msra.mxu1 %v13628_v61 }
0x1437   :  { %7041 = vmatprep.subr.bf16.mxu1 %v13634_v62 }
0x143a   :  { %7042 = vmatpush1.bf16.msra.mxu1 %v13640_v63 }
0x143b   :  { %7043 = vmatprep.subr.bf16.mxu1 %v13646_v0 }
0x143e   :  { %7044 = vmatpush1.bf16.msra.mxu1 %v13652_v14 }
0x143f   :  { %7045 = vmatprep.subr.bf16.mxu1 %v13658_v19 }
0x1442   :  { %7046 = vmatpush1.bf16.msra.mxu1 %v13664_v21 }
0x1443   :  { %7047 = vmatprep.subr.bf16.mxu1 %v13670_v38 }
0x1446   :  { %7048 = vmatpush1.bf16.msra.mxu1 %v13676_v40 }
0x1447   :  { %7049 = vmatprep.subr.bf16.mxu1 %v13682_v41 }
0x144a   :  { %7050 = vmatpush1.bf16.msra.mxu1 %v13688_v42 }
0x144b   :  { %7051 = vmatprep.subr.bf16.mxu1 %v13694_v39 }
0x144e   :  { %7052 = vmatpush1.bf16.msra.mxu1 %v13700_v12 }
0x144f   :  { %7053 = vmatprep.subr.bf16.mxu1 %v13731_v4 }
0x1452   :  { %7054 = vmatpush1.bf16.msra.mxu1 %v13736_v59 }
0x1453   :  { %7055 = vmatprep.subr.bf16.mxu1 %v13745_v60 }
0x1456   :  { %7056 = vmatpush1.bf16.msra.mxu1 %v13750_v13 }
0x1457   :  { %7057 = vmatprep.subr.bf16.mxu1 %v13759_v15 }
0x145a   :  { %7058 = vmatpush1.bf16.msra.mxu1 %v13764_v5 }
0x145b   :  { %7059 = vmatprep.subr.bf16.mxu1 %v13773_v6 }
0x145e   :  { %7060 = vmatpush1.bf16.msra.mxu1 %v13778_v7 }
0x145f   :  { %7061 = vmatprep.subr.bf16.mxu1 %v13787_v8 }
0x1462   :  { %7062 = vmatpush1.bf16.msra.mxu1 %v13792_v9 }
0x1463   :  { %7063 = vmatprep.subr.bf16.mxu1 %v13801_v10 }
0x1466   :  { %7064 = vmatpush1.bf16.msra.mxu1 %v13806_v11 }
0x1467   :  { %7065 = vmatprep.subr.bf16.mxu1 %v13815_v16 }
0x146a   :  { %7066 = vmatpush1.bf16.msra.mxu1 %v13820_v18 }
0x146b   :  { %7067 = vmatprep.subr.bf16.mxu1 %v13829_v51 }
0x146e   :  { %7068 = vmatpush1.bf16.msra.mxu1 %v13834_v52 }
0x1504   :  { %v6479_v56 = vpop.f32.mrb[40].mxu1 }
0x1505   :  { %v6481_v58 = vpop.f32.mrb[41].mxu1 }
0x1506   :  { %v6488_v20 = vcombine.low %v6479_v56, %v6481_v58  ;;  %v6483_v24 = vpop.f32.mrb[42].mxu1 }
0x1507   :  { %v6484_v26 = vpop.f32.mrb[43].mxu1 }
0x1508   :  { %v6495_v23 = vrot.slane %v6488_v20, %v12419_v43  ;;  %v14096_v26 = vld [vmem:[%s14734_s2 + $0x84] ss:$8 sps:$4 sm:$0xff]  }
0x150a   :  { %v6497_v22 = vadd.f32 %v11159_v25, %v6495_v23  ;;  %v14101_v23 = vld [vmem:[%s14734_s2 + $0x80] ss:$8 sps:$4 sm:$0xff]  }
0x150c   :  { %12078 = vtanh.f32 %v6497_v22  ;;  %v14110_v22 = vld [vmem:[%s14734_s2 + $0x94] ss:$8 sps:$4 sm:$0xff]  }
0x1516   :  { %v12079_v35 = vpop.eup %12078 }
0x1517   :  { %v6507_v49 = vrot.slane %v12079_v35, %v12419_v43  ;;  %6499 = vst [vmem:[#allocation2] sm:$0xf] %v12079_v35  ;;  %v14115_v35 = vld [vmem:[%s14734_s2 + $0x90] ss:$8 sps:$4 sm:$0xff]  }
0x1519   :  { %v6508_v27 = vcombine.high %v6507_v49, %v6507_v49 }
0x151b   :  { %v11193_v28 = vpack.c.bf16 %v6508_v27, %v6507_v49  ;;  %v14124_v49 = vld [vmem:[%s14734_s2 + $0xa4] ss:$8 sps:$4 sm:$0xff]   ;;  %v14129_v27 = vld [vmem:[%s14734_s2 + $0xa0] ss:$8 sps:$4 sm:$0xff]  }
0x151d   :  { %v6522_v29 = vrot.slane %v11193_v28, %v12426_v57  ;;  %v14138_v28 = vld [vmem:[%s14734_s2 + $0xb4] ss:$8 sps:$4 sm:$0xff]  }
0x151e   :  { %v11196_v30 = vld.sshfl [vmem:[#allocation2] sm:$0x33 pattern:$0x76325410] }
0x151f   :  { %11683 = vst.sshfl [vmem:[%s14735_s3 + $0x2a] sm:$0x5 pattern:$0x73625140] %v6522_v29  ;;  %v6544_v31 = vcombine.high %v11196_v30, %v11196_v30  ;;  %v6547_v33 = vpack.c.bf16 %v11196_v30, %v11196_v30  ;;  %v14143_v29 = vld [vmem:[%s14734_s2 + $0xb0] ss:$8 sps:$4 sm:$0xff]  }
0x1520   :  { %v14152_v30 = vld [vmem:[%s14734_s2 + $0xc4] ss:$8 sps:$4 sm:$0xff]  }
0x1521   :  { %v6548_v32 = vpack.c.bf16 %v6544_v31, %v6544_v31  ;;  %v14157_v31 = vld [vmem:[%s14734_s2 + $0xc0] ss:$8 sps:$4 sm:$0xff]  }
0x1523   :  { %6773 = vmatprep.mubr.bf16.mxu0 %v6548_v32  ;;  %v14166_v32 = vld [vmem:[%s14734_s2 + $0xd4] ss:$8 sps:$4 sm:$0xff]  }
0x1524   :  { %6774 = vmatmul.mubr.bf16.vlgmr.msra.gmra.mrb[44].mxu0 %v6547_v33  ;;  %v14171_v33 = vld [vmem:[%s14734_s2 + $0xd0] ss:$8 sps:$4 sm:$0xff]  }
0x1525   :  { %7334 = vmatpush1.bf16.msra.mxu0 %v13610_v50 }
0x1526   :  { %7335 = vmatprep.subr.bf16.mxu0 %v13620_v37 }
0x1529   :  { %7336 = vmatpush1.bf16.msra.mxu0 %v13628_v61 }
0x152a   :  { %7337 = vmatprep.subr.bf16.mxu0 %v13634_v62 }
0x152d   :  { %7338 = vmatpush1.bf16.msra.mxu0 %v13640_v63  ;;  %v11195_v63 = vld [vmem:[%s14732_s0 + $0x58] sm:$0xf] }
0x152e   :  { %7339 = vmatprep.subr.bf16.mxu0 %v13646_v0 }
0x1531   :  { %7340 = vmatpush1.bf16.msra.mxu0 %v13652_v14 }
0x1532   :  { %7341 = vmatprep.subr.bf16.mxu0 %v13658_v19 }
0x1535   :  { %7342 = vmatpush1.bf16.msra.mxu0 %v13664_v21 }
0x1536   :  { %7343 = vmatprep.subr.bf16.mxu0 %v13670_v38 }
0x1539   :  { %7344 = vmatpush1.bf16.msra.mxu0 %v13676_v40 }
0x153a   :  { %7345 = vmatprep.subr.bf16.mxu0 %v13682_v41 }
0x153d   :  { %7346 = vmatpush1.bf16.msra.mxu0 %v13688_v42 }
0x153e   :  { %7347 = vmatprep.subr.bf16.mxu0 %v13694_v39 }
0x1541   :  { %7348 = vmatpush1.bf16.msra.mxu0 %v13700_v12 }
0x1542   :  { %7349 = vmatprep.subr.bf16.mxu0 %v13731_v4 }
0x1545   :  { %7350 = vmatpush1.bf16.msra.mxu0 %v13736_v59 }
0x1546   :  { %7351 = vmatprep.subr.bf16.mxu0 %v13745_v60  ;;  %v13975_v60 = vld [vmem:[%s14734_s2] ss:$8 sps:$4 sm:$0xff]  }
0x1549   :  { %7352 = vmatpush1.bf16.msra.mxu0 %v13750_v13  ;;  %v13980_v13 = vld [vmem:[%s14734_s2 + $0x4] ss:$8 sps:$4 sm:$0xff]  }
0x154a   :  { %7353 = vmatprep.subr.bf16.mxu0 %v13759_v15  ;;  %v13985_v15 = vld [vmem:[%s14734_s2 + $0x14] ss:$8 sps:$4 sm:$0xff]   ;;  %7629 = vmatprep.subr.bf16.mxu1 %v13980_v13 }
0x154d   :  { %7354 = vmatpush1.bf16.msra.mxu0 %v13764_v5  ;;  %v13993_v5 = vld [vmem:[%s14734_s2 + $0x10] ss:$8 sps:$4 sm:$0xff]  }
0x154e   :  { %7355 = vmatprep.subr.bf16.mxu0 %v13773_v6  ;;  %v13999_v6 = vld [vmem:[%s14734_s2 + $0x24] ss:$8 sps:$4 sm:$0xff]  }
0x1551   :  { %7356 = vmatpush1.bf16.msra.mxu0 %v13778_v7  ;;  %v14005_v7 = vld [vmem:[%s14734_s2 + $0x20] ss:$8 sps:$4 sm:$0xff]  }
0x1552   :  { %7357 = vmatprep.subr.bf16.mxu0 %v13787_v8  ;;  %v14011_v8 = vld [vmem:[%s14734_s2 + $0x34] ss:$8 sps:$4 sm:$0xff]  }
0x1555   :  { %7358 = vmatpush1.bf16.msra.mxu0 %v13792_v9  ;;  %v14017_v9 = vld [vmem:[%s14734_s2 + $0x30] ss:$8 sps:$4 sm:$0xff]  }
0x1556   :  { %7359 = vmatprep.subr.bf16.mxu0 %v13801_v10  ;;  %v14023_v10 = vld [vmem:[%s14734_s2 + $0x44] ss:$8 sps:$4 sm:$0xff]  }
0x1559   :  { %7360 = vmatpush1.bf16.msra.mxu0 %v13806_v11  ;;  %v14029_v11 = vld [vmem:[%s14734_s2 + $0x40] ss:$8 sps:$4 sm:$0xff]  }
0x155a   :  { %7361 = vmatprep.subr.bf16.mxu0 %v13815_v16  ;;  %v14035_v16 = vld [vmem:[%s14734_s2 + $0x54] ss:$8 sps:$4 sm:$0xff]  }
0x155d   :  { %7362 = vmatpush1.bf16.msra.mxu0 %v13820_v18  ;;  %v14041_v18 = vld [vmem:[%s14734_s2 + $0x50] ss:$8 sps:$4 sm:$0xff]  }
0x155e   :  { %7363 = vmatprep.subr.bf16.mxu0 %v13829_v51  ;;  %v14047_v51 = vld [vmem:[%s14734_s2 + $0x64] ss:$8 sps:$4 sm:$0xff]  }
0x1561   :  { %7364 = vmatpush1.bf16.msra.mxu0 %v13834_v52  ;;  %v14053_v52 = vld [vmem:[%s14734_s2 + $0x60] ss:$8 sps:$4 sm:$0xff]  }
0x1562   :  { %7925 = vmatprep.subr.bf16.mxu0 %v13980_v13 }
0x15f7   :  { %v6775_v50 = vpop.f32.mrb[44].mxu0 }
0x15f8   :  { %v6777_v37 = vpop.f32.mrb[45].mxu0 }
0x15f9   :  { %v6784_v61 = vcombine.low %v6775_v50, %v6777_v37  ;;  %v6779_v62 = vpop.f32.mrb[46].mxu0  ;;  %v14180_v50 = vld [vmem:[%s14734_s2 + $0xe4] ss:$8 sps:$4 sm:$0xff]   ;;  %v14185_v37 = vld [vmem:[%s14734_s2 + $0xe0] ss:$8 sps:$4 sm:$0xff]  }
0x15fa   :  { %v6780_v0 = vpop.f32.mrb[47].mxu0  ;;  %v14199_v62 = vld [vmem:[%s14734_s2 + $0xf0] ss:$8 sps:$4 sm:$0xff]  }
0x15fb   :  { %v6791_v14 = vrot.slane %v6784_v61, %v12419_v43  ;;  %v14194_v61 = vld [vmem:[%s14734_s2 + $0xf4] ss:$8 sps:$4 sm:$0xff]  }
0x15fd   :  { %v6793_v19 = vadd.f32 %v11195_v63, %v6791_v14 }
0x15ff   :  { %12080 = vtanh.f32 %v6793_v19 }
0x1609   :  { %v12081_v21 = vpop.eup %12080 }
0x160a   :  { %v6803_v38 = vrot.slane %v12081_v21, %v12419_v43  ;;  %6795 = vst [vmem:[#allocation2] sm:$0xf] %v12081_v21  ;;  %v11267_v21 = vld [vmem:[%s14732_s0 + $0x60] sm:$0xf] }
0x160c   :  { %v6804_v40 = vcombine.high %v6803_v38, %v6803_v38 }
0x160e   :  { %v11229_v41 = vpack.c.bf16 %v6804_v40, %v6803_v38 }
0x1610   :  { %v6818_v42 = vrot.slane %v11229_v41, %v12426_v57 }
0x1611   :  { %v11232_v39 = vld.sshfl [vmem:[#allocation2] sm:$0x33 pattern:$0x76325410] }
0x1612   :  { %11684 = vst.sshfl [vmem:[%s14735_s3 + $0x2c] sm:$0x5 pattern:$0x73625140] %v6818_v42  ;;  %v6840_v12 = vcombine.high %v11232_v39, %v11232_v39  ;;  %v6843_v59 = vpack.c.bf16 %v11232_v39, %v11232_v39 }
0x1614   :  { %v6844_v4 = vpack.c.bf16 %v6840_v12, %v6840_v12 }
0x1616   :  { %7069 = vmatprep.mubr.bf16.mxu1 %v6844_v4 }
0x1617   :  { %7070 = vmatmul.mubr.bf16.vlgmr.msra.gmra.mrb[44].mxu1 %v6843_v59 }
0x1618   :  { %7630 = vmatpush1.bf16.msra.mxu1 %v13975_v60 }
0x1619   :  { %7631 = vmatprep.subr.bf16.mxu1 %v13985_v15 }
0x161c   :  { %7632 = vmatpush1.bf16.msra.mxu1 %v13993_v5 }
0x161d   :  { %7633 = vmatprep.subr.bf16.mxu1 %v13999_v6 }
0x1620   :  { %7634 = vmatpush1.bf16.msra.mxu1 %v14005_v7 }
0x1621   :  { %7635 = vmatprep.subr.bf16.mxu1 %v14011_v8 }
0x1624   :  { %7636 = vmatpush1.bf16.msra.mxu1 %v14017_v9 }
0x1625   :  { %7637 = vmatprep.subr.bf16.mxu1 %v14023_v10 }
0x1628   :  { %7638 = vmatpush1.bf16.msra.mxu1 %v14029_v11 }
0x1629   :  { %7639 = vmatprep.subr.bf16.mxu1 %v14035_v16 }
0x162c   :  { %7640 = vmatpush1.bf16.msra.mxu1 %v14041_v18 }
0x162d   :  { %7641 = vmatprep.subr.bf16.mxu1 %v14047_v51 }
0x1630   :  { %7642 = vmatpush1.bf16.msra.mxu1 %v14053_v52 }
0x1631   :  { %7643 = vmatprep.subr.bf16.mxu1 %v14059_v17 }
0x1634   :  { %7644 = vmatpush1.bf16.msra.mxu1 %v14065_v34 }
0x1635   :  { %7645 = vmatprep.subr.bf16.mxu1 %v14096_v26 }
0x1638   :  { %7646 = vmatpush1.bf16.msra.mxu1 %v14101_v23 }
0x1639   :  { %7647 = vmatprep.subr.bf16.mxu1 %v14110_v22 }
0x163c   :  { %7648 = vmatpush1.bf16.msra.mxu1 %v14115_v35 }
0x163d   :  { %7649 = vmatprep.subr.bf16.mxu1 %v14124_v49 }
0x1640   :  { %7650 = vmatpush1.bf16.msra.mxu1 %v14129_v27 }
0x1641   :  { %7651 = vmatprep.subr.bf16.mxu1 %v14138_v28 }
0x1644   :  { %7652 = vmatpush1.bf16.msra.mxu1 %v14143_v29 }
0x1645   :  { %7653 = vmatprep.subr.bf16.mxu1 %v14152_v30 }
0x1648   :  { %7654 = vmatpush1.bf16.msra.mxu1 %v14157_v31 }
0x1649   :  { %7655 = vmatprep.subr.bf16.mxu1 %v14166_v32 }
0x164c   :  { %7656 = vmatpush1.bf16.msra.mxu1 %v14171_v33 }
0x164d   :  { %7657 = vmatprep.subr.bf16.mxu1 %v14180_v50 }
0x1650   :  { %7658 = vmatpush1.bf16.msra.mxu1 %v14185_v37 }
0x1651   :  { %7659 = vmatprep.subr.bf16.mxu1 %v14194_v61 }
0x1654   :  { %7660 = vmatpush1.bf16.msra.mxu1 %v14199_v62 }
0x1655   :  { %8221 = vmatprep.subr.bf16.mxu1 %v13980_v13 }
0x16ea   :  { %v7071_v44 = vpop.f32.mrb[44].mxu1 }
0x16eb   :  { %v7073_v45 = vpop.f32.mrb[45].mxu1 }
0x16ec   :  { %v7080_v46 = vcombine.low %v7071_v44, %v7073_v45  ;;  %v7075_v47 = vpop.f32.mrb[46].mxu1 }
0x16ed   :  { %v7076_v1 = vpop.f32.mrb[47].mxu1 }
0x16ee   :  { %v7087_v2 = vrot.slane %v7080_v46, %v12419_v43 }
0x16f0   :  { %v7089_v36 = vadd.f32 %v11231_v48, %v7087_v2 }
0x16f2   :  { %12082 = vtanh.f32 %v7089_v36 }
0x16fc   :  { %v12083_v3 = vpop.eup %12082 }
0x16fd   :  { %v7099_v53 = vrot.slane %v12083_v3, %v12419_v43  ;;  %7091 = vst [vmem:[#allocation2] sm:$0xf] %v12083_v3  ;;  %v11303_v3 = vld [vmem:[%s14732_s0 + $0x64] sm:$0xf] }
0x16ff   :  { %v7100_v54 = vcombine.high %v7099_v53, %v7099_v53 }
0x1701   :  { %v11265_v55 = vpack.c.bf16 %v7100_v54, %v7099_v53 }
0x1703   :  { %v7114_v56 = vrot.slane %v11265_v55, %v12426_v57 }
0x1704   :  { %v11268_v58 = vld.sshfl [vmem:[#allocation2] sm:$0x33 pattern:$0x76325410] }
0x1705   :  { %11685 = vst.sshfl [vmem:[%s14735_s3 + $0x2e] sm:$0x5 pattern:$0x73625140] %v7114_v56  ;;  %v7136_v20 = vcombine.high %v11268_v58, %v11268_v58  ;;  %v7139_v25 = vpack.c.bf16 %v11268_v58, %v11268_v58 }
0x1707   :  { %v7140_v24 = vpack.c.bf16 %v7136_v20, %v7136_v20 }
0x1709   :  { %7365 = vmatprep.mubr.bf16.mxu0 %v7140_v24 }
0x170a   :  { %7366 = vmatmul.mubr.bf16.vlgmr.msra.gmra.mrb[48].mxu0 %v7139_v25 }
0x170b   :  { %7926 = vmatpush1.bf16.msra.mxu0 %v13975_v60 }
0x170c   :  { %7927 = vmatprep.subr.bf16.mxu0 %v13985_v15 }
0x170f   :  { %7928 = vmatpush1.bf16.msra.mxu0 %v13993_v5 }
0x1710   :  { %7929 = vmatprep.subr.bf16.mxu0 %v13999_v6 }
0x1713   :  { %7930 = vmatpush1.bf16.msra.mxu0 %v14005_v7 }
0x1714   :  { %7931 = vmatprep.subr.bf16.mxu0 %v14011_v8 }
0x1717   :  { %7932 = vmatpush1.bf16.msra.mxu0 %v14017_v9 }
0x1718   :  { %7933 = vmatprep.subr.bf16.mxu0 %v14023_v10 }
0x171b   :  { %7934 = vmatpush1.bf16.msra.mxu0 %v14029_v11 }
0x171c   :  { %7935 = vmatprep.subr.bf16.mxu0 %v14035_v16 }
0x171f   :  { %7936 = vmatpush1.bf16.msra.mxu0 %v14041_v18 }
0x1720   :  { %7937 = vmatprep.subr.bf16.mxu0 %v14047_v51 }
0x1723   :  { %7938 = vmatpush1.bf16.msra.mxu0 %v14053_v52 }
0x1724   :  { %7939 = vmatprep.subr.bf16.mxu0 %v14059_v17 }
0x1727   :  { %7940 = vmatpush1.bf16.msra.mxu0 %v14065_v34 }
0x1728   :  { %7941 = vmatprep.subr.bf16.mxu0 %v14096_v26 }
0x172b   :  { %7942 = vmatpush1.bf16.msra.mxu0 %v14101_v23 }
0x172c   :  { %7943 = vmatprep.subr.bf16.mxu0 %v14110_v22 }
0x172f   :  { %7944 = vmatpush1.bf16.msra.mxu0 %v14115_v35 }
0x1730   :  { %7945 = vmatprep.subr.bf16.mxu0 %v14124_v49 }
0x1733   :  { %7946 = vmatpush1.bf16.msra.mxu0 %v14129_v27 }
0x1734   :  { %7947 = vmatprep.subr.bf16.mxu0 %v14138_v28 }
0x1737   :  { %7948 = vmatpush1.bf16.msra.mxu0 %v14143_v29 }
0x1738   :  { %7949 = vmatprep.subr.bf16.mxu0 %v14152_v30 }
0x173b   :  { %7950 = vmatpush1.bf16.msra.mxu0 %v14157_v31 }
0x173c   :  { %7951 = vmatprep.subr.bf16.mxu0 %v14166_v32 }
0x173f   :  { %7952 = vmatpush1.bf16.msra.mxu0 %v14171_v33 }
0x1740   :  { %7953 = vmatprep.subr.bf16.mxu0 %v14180_v50 }
0x1743   :  { %7954 = vmatpush1.bf16.msra.mxu0 %v14185_v37 }
0x1744   :  { %7955 = vmatprep.subr.bf16.mxu0 %v14194_v61 }
0x1747   :  { %7956 = vmatpush1.bf16.msra.mxu0 %v14199_v62 }
0x1748   :  { %8517 = vmatprep.subr.bf16.mxu0 %v13980_v13 }
0x17dd   :  { %v7367_v63 = vpop.f32.mrb[48].mxu0 }
0x17de   :  { %v7369_v0 = vpop.f32.mrb[49].mxu0 }
0x17df   :  { %v7376_v14 = vcombine.low %v7367_v63, %v7369_v0  ;;  %v7371_v19 = vpop.f32.mrb[50].mxu0 }
0x17e0   :  { %v7372_v38 = vpop.f32.mrb[51].mxu0 }
0x17e1   :  { %v7383_v40 = vrot.slane %v7376_v14, %v12419_v43 }
0x17e3   :  { %v7385_v41 = vadd.f32 %v11267_v21, %v7383_v40 }
0x17e5   :  { %12084 = vtanh.f32 %v7385_v41  ;;  %v11339_v41 = vld [vmem:[%s14732_s0 + $0x68] sm:$0xf] }
0x17ef   :  { %v12085_v42 = vpop.eup %12084 }
0x17f0   :  { %v7395_v39 = vrot.slane %v12085_v42, %v12419_v43  ;;  %7387 = vst [vmem:[#allocation2] sm:$0xf] %v12085_v42 }
0x17f2   :  { %v7396_v12 = vcombine.high %v7395_v39, %v7395_v39 }
0x17f4   :  { %v11301_v4 = vpack.c.bf16 %v7396_v12, %v7395_v39 }
0x17f6   :  { %v7410_v59 = vrot.slane %v11301_v4, %v12426_v57 }
0x17f7   :  { %v11304_v44 = vld.sshfl [vmem:[#allocation2] sm:$0x33 pattern:$0x76325410] }
0x17f8   :  { %11686 = vst.sshfl [vmem:[%s14735_s3 + $0x30] sm:$0x5 pattern:$0x73625140] %v7410_v59  ;;  %v7432_v45 = vcombine.high %v11304_v44, %v11304_v44  ;;  %v7435_v47 = vpack.c.bf16 %v11304_v44, %v11304_v44 }
0x17fa   :  { %v7436_v46 = vpack.c.bf16 %v7432_v45, %v7432_v45 }
0x17fc   :  { %7661 = vmatprep.mubr.bf16.mxu1 %v7436_v46 }
0x17fd   :  { %7662 = vmatmul.mubr.bf16.vlgmr.msra.gmra.mrb[48].mxu1 %v7435_v47 }
0x17fe   :  { %8222 = vmatpush1.bf16.msra.mxu1 %v13975_v60 }
0x17ff   :  { %8223 = vmatprep.subr.bf16.mxu1 %v13985_v15 }
0x1802   :  { %8224 = vmatpush1.bf16.msra.mxu1 %v13993_v5 }
0x1803   :  { %8225 = vmatprep.subr.bf16.mxu1 %v13999_v6 }
0x1806   :  { %8226 = vmatpush1.bf16.msra.mxu1 %v14005_v7 }
0x1807   :  { %8227 = vmatprep.subr.bf16.mxu1 %v14011_v8 }
0x180a   :  { %8228 = vmatpush1.bf16.msra.mxu1 %v14017_v9 }
0x180b   :  { %8229 = vmatprep.subr.bf16.mxu1 %v14023_v10 }
0x180e   :  { %8230 = vmatpush1.bf16.msra.mxu1 %v14029_v11 }
0x180f   :  { %8231 = vmatprep.subr.bf16.mxu1 %v14035_v16 }
0x1812   :  { %8232 = vmatpush1.bf16.msra.mxu1 %v14041_v18 }
0x1813   :  { %8233 = vmatprep.subr.bf16.mxu1 %v14047_v51 }
0x1816   :  { %8234 = vmatpush1.bf16.msra.mxu1 %v14053_v52 }
0x1817   :  { %8235 = vmatprep.subr.bf16.mxu1 %v14059_v17 }
0x181a   :  { %8236 = vmatpush1.bf16.msra.mxu1 %v14065_v34 }
0x181b   :  { %8237 = vmatprep.subr.bf16.mxu1 %v14096_v26 }
0x181e   :  { %8238 = vmatpush1.bf16.msra.mxu1 %v14101_v23 }
0x181f   :  { %8239 = vmatprep.subr.bf16.mxu1 %v14110_v22 }
0x1822   :  { %8240 = vmatpush1.bf16.msra.mxu1 %v14115_v35 }
0x1823   :  { %8241 = vmatprep.subr.bf16.mxu1 %v14124_v49 }
0x1826   :  { %8242 = vmatpush1.bf16.msra.mxu1 %v14129_v27 }
0x1827   :  { %8243 = vmatprep.subr.bf16.mxu1 %v14138_v28 }
0x182a   :  { %8244 = vmatpush1.bf16.msra.mxu1 %v14143_v29 }
0x182b   :  { %8245 = vmatprep.subr.bf16.mxu1 %v14152_v30 }
0x182e   :  { %8246 = vmatpush1.bf16.msra.mxu1 %v14157_v31 }
0x182f   :  { %8247 = vmatprep.subr.bf16.mxu1 %v14166_v32 }
0x1832   :  { %8248 = vmatpush1.bf16.msra.mxu1 %v14171_v33 }
0x1833   :  { %8249 = vmatprep.subr.bf16.mxu1 %v14180_v50 }
0x1836   :  { %8250 = vmatpush1.bf16.msra.mxu1 %v14185_v37 }
0x1837   :  { %8251 = vmatprep.subr.bf16.mxu1 %v14194_v61 }
0x183a   :  { %8252 = vmatpush1.bf16.msra.mxu1 %v14199_v62 }
0x183b   :  { %8813 = vmatprep.subr.bf16.mxu1 %v13980_v13 }
0x18d0   :  { %v7663_v48 = vpop.f32.mrb[48].mxu1 }
0x18d1   :  { %v7665_v1 = vpop.f32.mrb[49].mxu1 }
0x18d2   :  { %v7672_v2 = vcombine.low %v7663_v48, %v7665_v1  ;;  %v7667_v36 = vpop.f32.mrb[50].mxu1 }
0x18d3   :  { %v7668_v53 = vpop.f32.mrb[51].mxu1  ;;  %v14424_v36 = vld [vmem:[%s14734_s2 + $0x74] ss:$8 sps:$4 sm:$0xff]  }
0x18d4   :  { %v7679_v54 = vrot.slane %v7672_v2, %v12419_v43 }
0x18d6   :  { %v7681_v55 = vadd.f32 %v11303_v3, %v7679_v54  ;;  %v14430_v3 = vld [vmem:[%s14734_s2 + $0x70] ss:$8 sps:$4 sm:$0xff]  }
0x18d8   :  { %12086 = vtanh.f32 %v7681_v55 }
0x18e2   :  { %v12087_v56 = vpop.eup %12086 }
0x18e3   :  { %v7691_v58 = vrot.slane %v12087_v56, %v12419_v43  ;;  %7683 = vst [vmem:[#allocation2] sm:$0xf] %v12087_v56 }
0x18e5   :  { %v7692_v20 = vcombine.high %v7691_v58, %v7691_v58 }
0x18e7   :  { %v11337_v24 = vpack.c.bf16 %v7692_v20, %v7691_v58  ;;  %v11411_v58 = vld [vmem:[%s14732_s0 + $0x70] sm:$0xf] }
0x18e9   :  { %v7706_v13 = vrot.slane %v11337_v24, %v12426_v57 }
0x18ea   :  { %v11340_v25 = vld.sshfl [vmem:[#allocation2] sm:$0x33 pattern:$0x76325410] }
0x18eb   :  { %11687 = vst.sshfl [vmem:[%s14735_s3 + $0x32] sm:$0x5 pattern:$0x73625140] %v7706_v13  ;;  %v7728_v63 = vcombine.high %v11340_v25, %v11340_v25  ;;  %v7731_v14 = vpack.c.bf16 %v11340_v25, %v11340_v25 }
0x18ed   :  { %v7732_v0 = vpack.c.bf16 %v7728_v63, %v7728_v63 }
0x18ef   :  { %7957 = vmatprep.mubr.bf16.mxu0 %v7732_v0 }
0x18f0   :  { %7958 = vmatmul.mubr.bf16.vlgmr.msra.gmra.mrb[52].mxu0 %v7731_v14 }
0x18f1   :  { %8518 = vmatpush1.bf16.msra.mxu0 %v13975_v60 }
0x18f2   :  { %8519 = vmatprep.subr.bf16.mxu0 %v13985_v15 }
0x18f5   :  { %8520 = vmatpush1.bf16.msra.mxu0 %v13993_v5 }
0x18f6   :  { %8521 = vmatprep.subr.bf16.mxu0 %v13999_v6 }
0x18f9   :  { %8522 = vmatpush1.bf16.msra.mxu0 %v14005_v7 }
0x18fa   :  { %8523 = vmatprep.subr.bf16.mxu0 %v14011_v8 }
0x18fd   :  { %8524 = vmatpush1.bf16.msra.mxu0 %v14017_v9 }
0x18fe   :  { %8525 = vmatprep.subr.bf16.mxu0 %v14023_v10 }
0x1901   :  { %8526 = vmatpush1.bf16.msra.mxu0 %v14029_v11 }
0x1902   :  { %8527 = vmatprep.subr.bf16.mxu0 %v14035_v16 }
0x1905   :  { %8528 = vmatpush1.bf16.msra.mxu0 %v14041_v18 }
0x1906   :  { %8529 = vmatprep.subr.bf16.mxu0 %v14047_v51 }
0x1909   :  { %8530 = vmatpush1.bf16.msra.mxu0 %v14053_v52 }
0x190a   :  { %8531 = vmatprep.subr.bf16.mxu0 %v14059_v17 }
0x190d   :  { %8532 = vmatpush1.bf16.msra.mxu0 %v14065_v34 }
0x190e   :  { %8533 = vmatprep.subr.bf16.mxu0 %v14096_v26 }
0x1911   :  { %8534 = vmatpush1.bf16.msra.mxu0 %v14101_v23 }
0x1912   :  { %8535 = vmatprep.subr.bf16.mxu0 %v14110_v22 }
0x1915   :  { %8536 = vmatpush1.bf16.msra.mxu0 %v14115_v35 }
0x1916   :  { %8537 = vmatprep.subr.bf16.mxu0 %v14124_v49 }
0x1919   :  { %8538 = vmatpush1.bf16.msra.mxu0 %v14129_v27 }
0x191a   :  { %8539 = vmatprep.subr.bf16.mxu0 %v14138_v28 }
0x191d   :  { %8540 = vmatpush1.bf16.msra.mxu0 %v14143_v29 }
0x191e   :  { %8541 = vmatprep.subr.bf16.mxu0 %v14152_v30 }
0x1921   :  { %8542 = vmatpush1.bf16.msra.mxu0 %v14157_v31 }
0x1922   :  { %8543 = vmatprep.subr.bf16.mxu0 %v14166_v32 }
0x1925   :  { %8544 = vmatpush1.bf16.msra.mxu0 %v14171_v33 }
0x1926   :  { %8545 = vmatprep.subr.bf16.mxu0 %v14180_v50 }
0x1929   :  { %8546 = vmatpush1.bf16.msra.mxu0 %v14185_v37 }
0x192a   :  { %8547 = vmatprep.subr.bf16.mxu0 %v14194_v61 }
0x192d   :  { %8548 = vmatpush1.bf16.msra.mxu0 %v14199_v62 }
0x19c3   :  { %v7959_v19 = vpop.f32.mrb[52].mxu0 }
0x19c4   :  { %v7961_v21 = vpop.f32.mrb[53].mxu0 }
0x19c5   :  { %v7968_v38 = vcombine.low %v7959_v19, %v7961_v21  ;;  %v7963_v40 = vpop.f32.mrb[54].mxu0 }
0x19c6   :  { %v7964_v42 = vpop.f32.mrb[55].mxu0 }
0x19c7   :  { %v7975_v39 = vrot.slane %v7968_v38, %v12419_v43  ;;  %v14461_v42 = vld [vmem:[%s14734_s2 + $0x84] ss:$8 sps:$4 sm:$0xff]  }
0x19c9   :  { %v7977_v12 = vadd.f32 %v11339_v41, %v7975_v39  ;;  %v14466_v39 = vld [vmem:[%s14734_s2 + $0x80] ss:$8 sps:$4 sm:$0xff]  }
0x19cb   :  { %12088 = vtanh.f32 %v7977_v12  ;;  %v14475_v12 = vld [vmem:[%s14734_s2 + $0x94] ss:$8 sps:$4 sm:$0xff]  }
0x19d5   :  { %v12089_v4 = vpop.eup %12088 }
0x19d6   :  { %v7987_v59 = vrot.slane %v12089_v4, %v12419_v43  ;;  %7979 = vst [vmem:[#allocation2] sm:$0xf] %v12089_v4  ;;  %v14480_v4 = vld [vmem:[%s14734_s2 + $0x90] ss:$8 sps:$4 sm:$0xff]  }
0x19d8   :  { %v7988_v44 = vcombine.high %v7987_v59, %v7987_v59 }
0x19da   :  { %v11373_v45 = vpack.c.bf16 %v7988_v44, %v7987_v59  ;;  %v14489_v59 = vld [vmem:[%s14734_s2 + $0xa4] ss:$8 sps:$4 sm:$0xff]   ;;  %v14494_v44 = vld [vmem:[%s14734_s2 + $0xa0] ss:$8 sps:$4 sm:$0xff]  }
0x19dc   :  { %v8002_v46 = vrot.slane %v11373_v45, %v12426_v57  ;;  %v14503_v45 = vld [vmem:[%s14734_s2 + $0xb4] ss:$8 sps:$4 sm:$0xff]  }
0x19dd   :  { %v11376_v47 = vld.sshfl [vmem:[#allocation2] sm:$0x33 pattern:$0x76325410] }
0x19de   :  { %11688 = vst.sshfl [vmem:[%s14735_s3 + $0x34] sm:$0x5 pattern:$0x73625140] %v8002_v46  ;;  %v8024_v48 = vcombine.high %v11376_v47, %v11376_v47  ;;  %v8027_v2 = vpack.c.bf16 %v11376_v47, %v11376_v47  ;;  %v14508_v46 = vld [vmem:[%s14734_s2 + $0xb0] ss:$8 sps:$4 sm:$0xff]  }
0x19df   :  { %v14517_v47 = vld [vmem:[%s14734_s2 + $0xc4] ss:$8 sps:$4 sm:$0xff]  }
0x19e0   :  { %v8028_v1 = vpack.c.bf16 %v8024_v48, %v8024_v48  ;;  %v14522_v48 = vld [vmem:[%s14734_s2 + $0xc0] ss:$8 sps:$4 sm:$0xff]  }
0x19e2   :  { %8253 = vmatprep.mubr.bf16.mxu1 %v8028_v1  ;;  %v14531_v1 = vld [vmem:[%s14734_s2 + $0xd4] ss:$8 sps:$4 sm:$0xff]  }
0x19e3   :  { %8254 = vmatmul.mubr.bf16.vlgmr.msra.gmra.mrb[52].mxu1 %v8027_v2  ;;  %v14536_v2 = vld [vmem:[%s14734_s2 + $0xd0] ss:$8 sps:$4 sm:$0xff]  }
0x19e4   :  { %8814 = vmatpush1.bf16.msra.mxu1 %v13975_v60 }
0x19e5   :  { %8815 = vmatprep.subr.bf16.mxu1 %v13985_v15 }
0x19e8   :  { %8816 = vmatpush1.bf16.msra.mxu1 %v13993_v5 }
0x19e9   :  { %8817 = vmatprep.subr.bf16.mxu1 %v13999_v6 }
0x19ec   :  { %8818 = vmatpush1.bf16.msra.mxu1 %v14005_v7  ;;  %v11375_v7 = vld [vmem:[%s14732_s0 + $0x6c] sm:$0xf] }
0x19ed   :  { %8819 = vmatprep.subr.bf16.mxu1 %v14011_v8 }
0x19f0   :  { %8820 = vmatpush1.bf16.msra.mxu1 %v14017_v9 }
0x19f1   :  { %8821 = vmatprep.subr.bf16.mxu1 %v14023_v10 }
0x19f4   :  { %8822 = vmatpush1.bf16.msra.mxu1 %v14029_v11 }
0x19f5   :  { %8823 = vmatprep.subr.bf16.mxu1 %v14035_v16 }
0x19f8   :  { %8824 = vmatpush1.bf16.msra.mxu1 %v14041_v18 }
0x19f9   :  { %8825 = vmatprep.subr.bf16.mxu1 %v14047_v51 }
0x19fc   :  { %8826 = vmatpush1.bf16.msra.mxu1 %v14053_v52 }
0x19fd   :  { %8827 = vmatprep.subr.bf16.mxu1 %v14059_v17 }
0x1a00   :  { %8828 = vmatpush1.bf16.msra.mxu1 %v14065_v34 }
0x1a01   :  { %8829 = vmatprep.subr.bf16.mxu1 %v14096_v26 }
0x1a04   :  { %8830 = vmatpush1.bf16.msra.mxu1 %v14101_v23 }
0x1a05   :  { %8831 = vmatprep.subr.bf16.mxu1 %v14110_v22  ;;  %v14340_v22 = vld [vmem:[%s14734_s2] ss:$8 sps:$4 sm:$0xff]  }
0x1a08   :  { %8832 = vmatpush1.bf16.msra.mxu1 %v14115_v35  ;;  %v14345_v35 = vld [vmem:[%s14734_s2 + $0x4] ss:$8 sps:$4 sm:$0xff]  }
0x1a09   :  { %8833 = vmatprep.subr.bf16.mxu1 %v14124_v49  ;;  %v14350_v49 = vld [vmem:[%s14734_s2 + $0x14] ss:$8 sps:$4 sm:$0xff]   ;;  %9109 = vmatprep.subr.bf16.mxu0 %v14345_v35 }
0x1a0c   :  { %8834 = vmatpush1.bf16.msra.mxu1 %v14129_v27  ;;  %v14358_v27 = vld [vmem:[%s14734_s2 + $0x10] ss:$8 sps:$4 sm:$0xff]  }
0x1a0d   :  { %8835 = vmatprep.subr.bf16.mxu1 %v14138_v28  ;;  %v14364_v28 = vld [vmem:[%s14734_s2 + $0x24] ss:$8 sps:$4 sm:$0xff]  }
0x1a10   :  { %8836 = vmatpush1.bf16.msra.mxu1 %v14143_v29  ;;  %v14370_v29 = vld [vmem:[%s14734_s2 + $0x20] ss:$8 sps:$4 sm:$0xff]  }
0x1a11   :  { %8837 = vmatprep.subr.bf16.mxu1 %v14152_v30  ;;  %v14376_v30 = vld [vmem:[%s14734_s2 + $0x34] ss:$8 sps:$4 sm:$0xff]  }
0x1a14   :  { %8838 = vmatpush1.bf16.msra.mxu1 %v14157_v31  ;;  %v14382_v31 = vld [vmem:[%s14734_s2 + $0x30] ss:$8 sps:$4 sm:$0xff]  }
0x1a15   :  { %8839 = vmatprep.subr.bf16.mxu1 %v14166_v32  ;;  %v14388_v32 = vld [vmem:[%s14734_s2 + $0x44] ss:$8 sps:$4 sm:$0xff]  }
0x1a18   :  { %8840 = vmatpush1.bf16.msra.mxu1 %v14171_v33  ;;  %v14394_v33 = vld [vmem:[%s14734_s2 + $0x40] ss:$8 sps:$4 sm:$0xff]  }
0x1a19   :  { %8841 = vmatprep.subr.bf16.mxu1 %v14180_v50  ;;  %v14400_v50 = vld [vmem:[%s14734_s2 + $0x54] ss:$8 sps:$4 sm:$0xff]  }
0x1a1c   :  { %8842 = vmatpush1.bf16.msra.mxu1 %v14185_v37  ;;  %v14406_v37 = vld [vmem:[%s14734_s2 + $0x50] ss:$8 sps:$4 sm:$0xff]  }
0x1a1d   :  { %8843 = vmatprep.subr.bf16.mxu1 %v14194_v61  ;;  %v14412_v61 = vld [vmem:[%s14734_s2 + $0x64] ss:$8 sps:$4 sm:$0xff]  }
0x1a20   :  { %8844 = vmatpush1.bf16.msra.mxu1 %v14199_v62  ;;  %v14418_v62 = vld [vmem:[%s14734_s2 + $0x60] ss:$8 sps:$4 sm:$0xff]  }
0x1a21   :  { %9405 = vmatprep.subr.bf16.mxu1 %v14345_v35 }
0x1ab6   :  { %v8255_v60 = vpop.f32.mrb[52].mxu1 }
0x1ab7   :  { %v8257_v15 = vpop.f32.mrb[53].mxu1 }
0x1ab8   :  { %v8264_v5 = vcombine.low %v8255_v60, %v8257_v15  ;;  %v8259_v6 = vpop.f32.mrb[54].mxu1  ;;  %v14545_v60 = vld [vmem:[%s14734_s2 + $0xe4] ss:$8 sps:$4 sm:$0xff]   ;;  %v14550_v15 = vld [vmem:[%s14734_s2 + $0xe0] ss:$8 sps:$4 sm:$0xff]  }
0x1ab9   :  { %v8260_v8 = vpop.f32.mrb[55].mxu1  ;;  %v14564_v6 = vld [vmem:[%s14734_s2 + $0xf0] ss:$8 sps:$4 sm:$0xff]  }
0x1aba   :  { %v8271_v9 = vrot.slane %v8264_v5, %v12419_v43  ;;  %v14559_v5 = vld [vmem:[%s14734_s2 + $0xf4] ss:$8 sps:$4 sm:$0xff]  }
0x1abc   :  { %v8273_v10 = vadd.f32 %v11375_v7, %v8271_v9 }
0x1abe   :  { %12090 = vtanh.f32 %v8273_v10 }
0x1ac8   :  { %v12091_v11 = vpop.eup %12090 }
0x1ac9   :  { %v8283_v16 = vrot.slane %v12091_v11, %v12419_v43  ;;  %8275 = vst [vmem:[#allocation2] sm:$0xf] %v12091_v11  ;;  %v11447_v11 = vld [vmem:[%s14732_s0 + $0x74] sm:$0xf] }
0x1acb   :  { %v8284_v18 = vcombine.high %v8283_v16, %v8283_v16 }
0x1acd   :  { %v11409_v51 = vpack.c.bf16 %v8284_v18, %v8283_v16 }
0x1acf   :  { %v8298_v52 = vrot.slane %v11409_v51, %v12426_v57 }
0x1ad0   :  { %v11412_v17 = vld.sshfl [vmem:[#allocation2] sm:$0x33 pattern:$0x76325410] }
0x1ad1   :  { %11689 = vst.sshfl [vmem:[%s14735_s3 + $0x36] sm:$0x5 pattern:$0x73625140] %v8298_v52  ;;  %v8320_v34 = vcombine.high %v11412_v17, %v11412_v17  ;;  %v8323_v23 = vpack.c.bf16 %v11412_v17, %v11412_v17 }
0x1ad3   :  { %v8324_v26 = vpack.c.bf16 %v8320_v34, %v8320_v34 }
0x1ad5   :  { %8549 = vmatprep.mubr.bf16.mxu0 %v8324_v26 }
0x1ad6   :  { %8550 = vmatmul.mubr.bf16.vlgmr.msra.gmra.mrb[56].mxu0 %v8323_v23 }
0x1ad7   :  { %9110 = vmatpush1.bf16.msra.mxu0 %v14340_v22 }
0x1ad8   :  { %9111 = vmatprep.subr.bf16.mxu0 %v14350_v49 }
0x1adb   :  { %9112 = vmatpush1.bf16.msra.mxu0 %v14358_v27 }
0x1adc   :  { %9113 = vmatprep.subr.bf16.mxu0 %v14364_v28 }
0x1adf   :  { %9114 = vmatpush1.bf16.msra.mxu0 %v14370_v29 }
0x1ae0   :  { %9115 = vmatprep.subr.bf16.mxu0 %v14376_v30 }
0x1ae3   :  { %9116 = vmatpush1.bf16.msra.mxu0 %v14382_v31 }
0x1ae4   :  { %9117 = vmatprep.subr.bf16.mxu0 %v14388_v32 }
0x1ae7   :  { %9118 = vmatpush1.bf16.msra.mxu0 %v14394_v33 }
0x1ae8   :  { %9119 = vmatprep.subr.bf16.mxu0 %v14400_v50 }
0x1aeb   :  { %9120 = vmatpush1.bf16.msra.mxu0 %v14406_v37 }
0x1aec   :  { %9121 = vmatprep.subr.bf16.mxu0 %v14412_v61 }
0x1aef   :  { %9122 = vmatpush1.bf16.msra.mxu0 %v14418_v62 }
0x1af0   :  { %9123 = vmatprep.subr.bf16.mxu0 %v14424_v36 }
0x1af3   :  { %9124 = vmatpush1.bf16.msra.mxu0 %v14430_v3 }
0x1af4   :  { %9125 = vmatprep.subr.bf16.mxu0 %v14461_v42 }
0x1af7   :  { %9126 = vmatpush1.bf16.msra.mxu0 %v14466_v39 }
0x1af8   :  { %9127 = vmatprep.subr.bf16.mxu0 %v14475_v12 }
0x1afb   :  { %9128 = vmatpush1.bf16.msra.mxu0 %v14480_v4 }
0x1afc   :  { %9129 = vmatprep.subr.bf16.mxu0 %v14489_v59 }
0x1aff   :  { %9130 = vmatpush1.bf16.msra.mxu0 %v14494_v44 }
0x1b00   :  { %9131 = vmatprep.subr.bf16.mxu0 %v14503_v45 }
0x1b03   :  { %9132 = vmatpush1.bf16.msra.mxu0 %v14508_v46 }
0x1b04   :  { %9133 = vmatprep.subr.bf16.mxu0 %v14517_v47 }
0x1b07   :  { %9134 = vmatpush1.bf16.msra.mxu0 %v14522_v48 }
0x1b08   :  { %9135 = vmatprep.subr.bf16.mxu0 %v14531_v1 }
0x1b0b   :  { %9136 = vmatpush1.bf16.msra.mxu0 %v14536_v2 }
0x1b0c   :  { %9137 = vmatprep.subr.bf16.mxu0 %v14545_v60 }
0x1b0f   :  { %9138 = vmatpush1.bf16.msra.mxu0 %v14550_v15 }
0x1b10   :  { %9139 = vmatprep.subr.bf16.mxu0 %v14559_v5 }
0x1b13   :  { %9140 = vmatpush1.bf16.msra.mxu0 %v14564_v6 }
0x1b14   :  { %9701 = vmatprep.subr.bf16.mxu0 %v14345_v35 }
0x1ba9   :  { %v8551_v53 = vpop.f32.mrb[56].mxu0 }
0x1baa   :  { %v8553_v54 = vpop.f32.mrb[57].mxu0 }
0x1bab   :  { %v8560_v55 = vcombine.low %v8551_v53, %v8553_v54  ;;  %v8555_v56 = vpop.f32.mrb[58].mxu0 }
0x1bac   :  { %v8556_v20 = vpop.f32.mrb[59].mxu0 }
0x1bad   :  { %v8567_v24 = vrot.slane %v8560_v55, %v12419_v43 }
0x1baf   :  { %v8569_v13 = vadd.f32 %v11411_v58, %v8567_v24 }
0x1bb1   :  { %12092 = vtanh.f32 %v8569_v13 }
0x1bbb   :  { %v12093_v25 = vpop.eup %12092 }
0x1bbc   :  { %v8579_v63 = vrot.slane %v12093_v25, %v12419_v43  ;;  %8571 = vst [vmem:[#allocation2] sm:$0xf] %v12093_v25  ;;  %v11483_v25 = vld [vmem:[%s14732_s0 + $0x78] sm:$0xf] }
0x1bbe   :  { %v8580_v0 = vcombine.high %v8579_v63, %v8579_v63 }
0x1bc0   :  { %v11445_v14 = vpack.c.bf16 %v8580_v0, %v8579_v63 }
0x1bc2   :  { %v8594_v19 = vrot.slane %v11445_v14, %v12426_v57 }
0x1bc3   :  { %v11448_v21 = vld.sshfl [vmem:[#allocation2] sm:$0x33 pattern:$0x76325410] }
0x1bc4   :  { %11690 = vst.sshfl [vmem:[%s14735_s3 + $0x38] sm:$0x5 pattern:$0x73625140] %v8594_v19  ;;  %v8616_v38 = vcombine.high %v11448_v21, %v11448_v21  ;;  %v8619_v41 = vpack.c.bf16 %v11448_v21, %v11448_v21 }
0x1bc6   :  { %v8620_v40 = vpack.c.bf16 %v8616_v38, %v8616_v38 }
0x1bc8   :  { %8845 = vmatprep.mubr.bf16.mxu1 %v8620_v40 }
0x1bc9   :  { %8846 = vmatmul.mubr.bf16.vlgmr.msra.gmra.mrb[56].mxu1 %v8619_v41 }
0x1bca   :  { %9406 = vmatpush1.bf16.msra.mxu1 %v14340_v22 }
0x1bcb   :  { %9407 = vmatprep.subr.bf16.mxu1 %v14350_v49 }
0x1bce   :  { %9408 = vmatpush1.bf16.msra.mxu1 %v14358_v27 }
0x1bcf   :  { %9409 = vmatprep.subr.bf16.mxu1 %v14364_v28 }
0x1bd2   :  { %9410 = vmatpush1.bf16.msra.mxu1 %v14370_v29 }
0x1bd3   :  { %9411 = vmatprep.subr.bf16.mxu1 %v14376_v30 }
0x1bd6   :  { %9412 = vmatpush1.bf16.msra.mxu1 %v14382_v31 }
0x1bd7   :  { %9413 = vmatprep.subr.bf16.mxu1 %v14388_v32 }
0x1bda   :  { %9414 = vmatpush1.bf16.msra.mxu1 %v14394_v33 }
0x1bdb   :  { %9415 = vmatprep.subr.bf16.mxu1 %v14400_v50 }
0x1bde   :  { %9416 = vmatpush1.bf16.msra.mxu1 %v14406_v37 }
0x1bdf   :  { %9417 = vmatprep.subr.bf16.mxu1 %v14412_v61 }
0x1be2   :  { %9418 = vmatpush1.bf16.msra.mxu1 %v14418_v62 }
0x1be3   :  { %9419 = vmatprep.subr.bf16.mxu1 %v14424_v36 }
0x1be6   :  { %9420 = vmatpush1.bf16.msra.mxu1 %v14430_v3 }
0x1be7   :  { %9421 = vmatprep.subr.bf16.mxu1 %v14461_v42 }
0x1bea   :  { %9422 = vmatpush1.bf16.msra.mxu1 %v14466_v39 }
0x1beb   :  { %9423 = vmatprep.subr.bf16.mxu1 %v14475_v12 }
0x1bee   :  { %9424 = vmatpush1.bf16.msra.mxu1 %v14480_v4 }
0x1bef   :  { %9425 = vmatprep.subr.bf16.mxu1 %v14489_v59 }
0x1bf2   :  { %9426 = vmatpush1.bf16.msra.mxu1 %v14494_v44 }
0x1bf3   :  { %9427 = vmatprep.subr.bf16.mxu1 %v14503_v45 }
0x1bf6   :  { %9428 = vmatpush1.bf16.msra.mxu1 %v14508_v46 }
0x1bf7   :  { %9429 = vmatprep.subr.bf16.mxu1 %v14517_v47 }
0x1bfa   :  { %9430 = vmatpush1.bf16.msra.mxu1 %v14522_v48 }
0x1bfb   :  { %9431 = vmatprep.subr.bf16.mxu1 %v14531_v1 }
0x1bfe   :  { %9432 = vmatpush1.bf16.msra.mxu1 %v14536_v2 }
0x1bff   :  { %9433 = vmatprep.subr.bf16.mxu1 %v14545_v60 }
0x1c02   :  { %9434 = vmatpush1.bf16.msra.mxu1 %v14550_v15 }
0x1c03   :  { %9435 = vmatprep.subr.bf16.mxu1 %v14559_v5 }
0x1c06   :  { %9436 = vmatpush1.bf16.msra.mxu1 %v14564_v6 }
0x1c07   :  { %9997 = vmatprep.subr.bf16.mxu1 %v14345_v35 }
0x1c9c   :  { %v8847_v7 = vpop.f32.mrb[56].mxu1 }
0x1c9d   :  { %v8849_v8 = vpop.f32.mrb[57].mxu1 }
0x1c9e   :  { %v8856_v9 = vcombine.low %v8847_v7, %v8849_v8  ;;  %v8851_v10 = vpop.f32.mrb[58].mxu1 }
0x1c9f   :  { %v8852_v16 = vpop.f32.mrb[59].mxu1 }
0x1ca0   :  { %v8863_v18 = vrot.slane %v8856_v9, %v12419_v43 }
0x1ca2   :  { %v8865_v51 = vadd.f32 %v11447_v11, %v8863_v18 }
0x1ca4   :  { %12094 = vtanh.f32 %v8865_v51  ;;  %v11519_v51 = vld [vmem:[%s14732_s0 + $0x7c] sm:$0xf] }
0x1cae   :  { %v12095_v52 = vpop.eup %12094 }
0x1caf   :  { %v8875_v17 = vrot.slane %v12095_v52, %v12419_v43  ;;  %8867 = vst [vmem:[#allocation2] sm:$0xf] %v12095_v52 }
0x1cb1   :  { %v8876_v34 = vcombine.high %v8875_v17, %v8875_v17 }
0x1cb3   :  { %v11481_v26 = vpack.c.bf16 %v8876_v34, %v8875_v17 }
0x1cb5   :  { %v8890_v23 = vrot.slane %v11481_v26, %v12426_v57 }
0x1cb6   :  { %v11484_v53 = vld.sshfl [vmem:[#allocation2] sm:$0x33 pattern:$0x76325410] }
0x1cb7   :  { %11691 = vst.sshfl [vmem:[%s14735_s3 + $0x3a] sm:$0x5 pattern:$0x73625140] %v8890_v23  ;;  %v8912_v54 = vcombine.high %v11484_v53, %v11484_v53  ;;  %v8915_v56 = vpack.c.bf16 %v11484_v53, %v11484_v53 }
0x1cb9   :  { %v8916_v55 = vpack.c.bf16 %v8912_v54, %v8912_v54 }
0x1cbb   :  { %9141 = vmatprep.mubr.bf16.mxu0 %v8916_v55 }
0x1cbc   :  { %9142 = vmatmul.mubr.bf16.vlgmr.msra.gmra.mrb[60].mxu0 %v8915_v56 }
0x1cbd   :  { %9702 = vmatpush1.bf16.msra.mxu0 %v14340_v22 }
0x1cbe   :  { %9703 = vmatprep.subr.bf16.mxu0 %v14350_v49 }
0x1cc1   :  { %9704 = vmatpush1.bf16.msra.mxu0 %v14358_v27 }
0x1cc2   :  { %9705 = vmatprep.subr.bf16.mxu0 %v14364_v28 }
0x1cc5   :  { %9706 = vmatpush1.bf16.msra.mxu0 %v14370_v29 }
0x1cc6   :  { %9707 = vmatprep.subr.bf16.mxu0 %v14376_v30 }
0x1cc9   :  { %9708 = vmatpush1.bf16.msra.mxu0 %v14382_v31 }
0x1cca   :  { %9709 = vmatprep.subr.bf16.mxu0 %v14388_v32 }
0x1ccd   :  { %9710 = vmatpush1.bf16.msra.mxu0 %v14394_v33 }
0x1cce   :  { %9711 = vmatprep.subr.bf16.mxu0 %v14400_v50 }
0x1cd1   :  { %9712 = vmatpush1.bf16.msra.mxu0 %v14406_v37 }
0x1cd2   :  { %9713 = vmatprep.subr.bf16.mxu0 %v14412_v61 }
0x1cd5   :  { %9714 = vmatpush1.bf16.msra.mxu0 %v14418_v62 }
0x1cd6   :  { %9715 = vmatprep.subr.bf16.mxu0 %v14424_v36 }
0x1cd9   :  { %9716 = vmatpush1.bf16.msra.mxu0 %v14430_v3 }
0x1cda   :  { %9717 = vmatprep.subr.bf16.mxu0 %v14461_v42 }
0x1cdd   :  { %9718 = vmatpush1.bf16.msra.mxu0 %v14466_v39 }
0x1cde   :  { %9719 = vmatprep.subr.bf16.mxu0 %v14475_v12 }
0x1ce1   :  { %9720 = vmatpush1.bf16.msra.mxu0 %v14480_v4 }
0x1ce2   :  { %9721 = vmatprep.subr.bf16.mxu0 %v14489_v59 }
0x1ce5   :  { %9722 = vmatpush1.bf16.msra.mxu0 %v14494_v44 }
0x1ce6   :  { %9723 = vmatprep.subr.bf16.mxu0 %v14503_v45 }
0x1ce9   :  { %9724 = vmatpush1.bf16.msra.mxu0 %v14508_v46 }
0x1cea   :  { %9725 = vmatprep.subr.bf16.mxu0 %v14517_v47 }
0x1ced   :  { %9726 = vmatpush1.bf16.msra.mxu0 %v14522_v48 }
0x1cee   :  { %9727 = vmatprep.subr.bf16.mxu0 %v14531_v1 }
0x1cf1   :  { %9728 = vmatpush1.bf16.msra.mxu0 %v14536_v2 }
0x1cf2   :  { %9729 = vmatprep.subr.bf16.mxu0 %v14545_v60 }
0x1cf5   :  { %9730 = vmatpush1.bf16.msra.mxu0 %v14550_v15 }
0x1cf6   :  { %9731 = vmatprep.subr.bf16.mxu0 %v14559_v5 }
0x1cf9   :  { %9732 = vmatpush1.bf16.msra.mxu0 %v14564_v6 }
0x1cfa   :  { %10293 = vmatprep.subr.bf16.mxu0 %v14345_v35 }
0x1d8f   :  { %v9143_v58 = vpop.f32.mrb[60].mxu0 }
0x1d90   :  { %v9145_v20 = vpop.f32.mrb[61].mxu0 }
0x1d91   :  { %v9152_v24 = vcombine.low %v9143_v58, %v9145_v20  ;;  %v9147_v13 = vpop.f32.mrb[62].mxu0 }
0x1d92   :  { %v9148_v63 = vpop.f32.mrb[63].mxu0 }
0x1d93   :  { %v9159_v0 = vrot.slane %v9152_v24, %v12419_v43 }
0x1d95   :  { %v9161_v14 = vadd.f32 %v11483_v25, %v9159_v0 }
0x1d97   :  { %12096 = vtanh.f32 %v9161_v14 }
0x1da1   :  { %v12097_v19 = vpop.eup %12096 }
0x1da2   :  { %v9171_v21 = vrot.slane %v12097_v19, %v12419_v43  ;;  %9163 = vst [vmem:[#allocation2] sm:$0xf] %v12097_v19 }
0x1da4   :  { %v9172_v38 = vcombine.high %v9171_v21, %v9171_v21 }
0x1da6   :  { %v11517_v40 = vpack.c.bf16 %v9172_v38, %v9171_v21  ;;  %v11627_v38 = vld [vmem:[%s14732_s0 + $0x88] sm:$0xf] }
0x1da8   :  { %v9186_v35 = vrot.slane %v11517_v40, %v12426_v57 }
0x1da9   :  { %v11520_v41 = vld.sshfl [vmem:[#allocation2] sm:$0x33 pattern:$0x76325410] }
0x1daa   :  { %11692 = vst.sshfl [vmem:[%s14735_s3 + $0x3c] sm:$0x5 pattern:$0x73625140] %v9186_v35  ;;  %v9208_v7 = vcombine.high %v11520_v41, %v11520_v41  ;;  %v9211_v9 = vpack.c.bf16 %v11520_v41, %v11520_v41 }
0x1dac   :  { %v9212_v8 = vpack.c.bf16 %v9208_v7, %v9208_v7 }
0x1dae   :  { %9437 = vmatprep.mubr.bf16.mxu1 %v9212_v8 }
0x1daf   :  { %9438 = vmatmul.mubr.bf16.vlgmr.msra.gmra.mrb[60].mxu1 %v9211_v9 }
0x1db0   :  { %9998 = vmatpush1.bf16.msra.mxu1 %v14340_v22 }
0x1db1   :  { %9999 = vmatprep.subr.bf16.mxu1 %v14350_v49 }
0x1db4   :  { %10000 = vmatpush1.bf16.msra.mxu1 %v14358_v27 }
0x1db5   :  { %10001 = vmatprep.subr.bf16.mxu1 %v14364_v28 }
0x1db8   :  { %10002 = vmatpush1.bf16.msra.mxu1 %v14370_v29 }
0x1db9   :  { %10003 = vmatprep.subr.bf16.mxu1 %v14376_v30 }
0x1dbc   :  { %10004 = vmatpush1.bf16.msra.mxu1 %v14382_v31 }
0x1dbd   :  { %10005 = vmatprep.subr.bf16.mxu1 %v14388_v32 }
0x1dc0   :  { %10006 = vmatpush1.bf16.msra.mxu1 %v14394_v33 }
0x1dc1   :  { %10007 = vmatprep.subr.bf16.mxu1 %v14400_v50 }
0x1dc4   :  { %10008 = vmatpush1.bf16.msra.mxu1 %v14406_v37 }
0x1dc5   :  { %10009 = vmatprep.subr.bf16.mxu1 %v14412_v61 }
0x1dc8   :  { %10010 = vmatpush1.bf16.msra.mxu1 %v14418_v62 }
0x1dc9   :  { %10011 = vmatprep.subr.bf16.mxu1 %v14424_v36 }
0x1dcc   :  { %10012 = vmatpush1.bf16.msra.mxu1 %v14430_v3 }
0x1dcd   :  { %10013 = vmatprep.subr.bf16.mxu1 %v14461_v42 }
0x1dd0   :  { %10014 = vmatpush1.bf16.msra.mxu1 %v14466_v39 }
0x1dd1   :  { %10015 = vmatprep.subr.bf16.mxu1 %v14475_v12 }
0x1dd4   :  { %10016 = vmatpush1.bf16.msra.mxu1 %v14480_v4 }
0x1dd5   :  { %10017 = vmatprep.subr.bf16.mxu1 %v14489_v59 }
0x1dd8   :  { %10018 = vmatpush1.bf16.msra.mxu1 %v14494_v44 }
0x1dd9   :  { %10019 = vmatprep.subr.bf16.mxu1 %v14503_v45 }
0x1ddc   :  { %10020 = vmatpush1.bf16.msra.mxu1 %v14508_v46 }
0x1ddd   :  { %10021 = vmatprep.subr.bf16.mxu1 %v14517_v47 }
0x1de0   :  { %10022 = vmatpush1.bf16.msra.mxu1 %v14522_v48 }
0x1de1   :  { %10023 = vmatprep.subr.bf16.mxu1 %v14531_v1 }
0x1de4   :  { %10024 = vmatpush1.bf16.msra.mxu1 %v14536_v2 }
0x1de5   :  { %10025 = vmatprep.subr.bf16.mxu1 %v14545_v60 }
0x1de8   :  { %10026 = vmatpush1.bf16.msra.mxu1 %v14550_v15 }
0x1de9   :  { %10027 = vmatprep.subr.bf16.mxu1 %v14559_v5 }
0x1dec   :  { %10028 = vmatpush1.bf16.msra.mxu1 %v14564_v6 }
0x1e82   :  { %v9439_v10 = vpop.f32.mrb[60].mxu1 }
0x1e83   :  { %v9441_v11 = vpop.f32.mrb[61].mxu1 }
0x1e84   :  { %v9448_v16 = vcombine.low %v9439_v10, %v9441_v11  ;;  %v9443_v18 = vpop.f32.mrb[62].mxu1 }
0x1e85   :  { %v9444_v52 = vpop.f32.mrb[63].mxu1 }
0x1e86   :  { %v9455_v17 = vrot.slane %v9448_v16, %v12419_v43 }
0x1e88   :  { %v9457_v34 = vadd.f32 %v11519_v51, %v9455_v17 }
0x1e8a   :  { %12098 = vtanh.f32 %v9457_v34 }
0x1e94   :  { %v12099_v26 = vpop.eup %12098 }
0x1e95   :  { %v9467_v23 = vrot.slane %v12099_v26, %v12419_v43  ;;  %9459 = vst [vmem:[#allocation2] sm:$0xf] %v12099_v26 }
0x1e97   :  { %v9468_v53 = vcombine.high %v9467_v23, %v9467_v23 }
0x1e99   :  { %v11553_v54 = vpack.c.bf16 %v9468_v53, %v9467_v23 }
0x1e9b   :  { %v9482_v55 = vrot.slane %v11553_v54, %v12426_v57 }
0x1e9c   :  { %v11556_v56 = vld.sshfl [vmem:[#allocation2] sm:$0x33 pattern:$0x76325410] }
0x1e9d   :  { %11693 = vst.sshfl [vmem:[%s14735_s3 + $0x3e] sm:$0x5 pattern:$0x73625140] %v9482_v55  ;;  %v9504_v58 = vcombine.high %v11556_v56, %v11556_v56  ;;  %v9507_v24 = vpack.c.bf16 %v11556_v56, %v11556_v56 }
0x1e9f   :  { %v9508_v20 = vpack.c.bf16 %v9504_v58, %v9504_v58 }
0x1ea1   :  { %9733 = vmatprep.mubr.bf16.mxu0 %v9508_v20 }
0x1ea2   :  { %9734 = vmatmul.mubr.bf16.vlgmr.msra.gmra.mrb[64].mxu0 %v9507_v24 }
0x1ea3   :  { %10294 = vmatpush1.bf16.msra.mxu0 %v14340_v22 }
0x1ea4   :  { %10295 = vmatprep.subr.bf16.mxu0 %v14350_v49 }
0x1ea7   :  { %10296 = vmatpush1.bf16.msra.mxu0 %v14358_v27 }
0x1ea8   :  { %10297 = vmatprep.subr.bf16.mxu0 %v14364_v28 }
0x1eab   :  { %10298 = vmatpush1.bf16.msra.mxu0 %v14370_v29  ;;  %v11555_v29 = vld [vmem:[%s14732_s0 + $0x80] sm:$0xf] }
0x1eac   :  { %10299 = vmatprep.subr.bf16.mxu0 %v14376_v30 }
0x1eaf   :  { %10300 = vmatpush1.bf16.msra.mxu0 %v14382_v31 }
0x1eb0   :  { %10301 = vmatprep.subr.bf16.mxu0 %v14388_v32 }
0x1eb3   :  { %10302 = vmatpush1.bf16.msra.mxu0 %v14394_v33 }
0x1eb4   :  { %10303 = vmatprep.subr.bf16.mxu0 %v14400_v50 }
0x1eb7   :  { %10304 = vmatpush1.bf16.msra.mxu0 %v14406_v37 }
0x1eb8   :  { %10305 = vmatprep.subr.bf16.mxu0 %v14412_v61 }
0x1ebb   :  { %10306 = vmatpush1.bf16.msra.mxu0 %v14418_v62 }
0x1ebc   :  { %10307 = vmatprep.subr.bf16.mxu0 %v14424_v36 }
0x1ebf   :  { %10308 = vmatpush1.bf16.msra.mxu0 %v14430_v3 }
0x1ec0   :  { %10309 = vmatprep.subr.bf16.mxu0 %v14461_v42 }
0x1ec3   :  { %10310 = vmatpush1.bf16.msra.mxu0 %v14466_v39 }
0x1ec4   :  { %10311 = vmatprep.subr.bf16.mxu0 %v14475_v12 }
0x1ec7   :  { %10312 = vmatpush1.bf16.msra.mxu0 %v14480_v4 }
0x1ec8   :  { %10313 = vmatprep.subr.bf16.mxu0 %v14489_v59 }
0x1ecb   :  { %10314 = vmatpush1.bf16.msra.mxu0 %v14494_v44 }
0x1ecc   :  { %10315 = vmatprep.subr.bf16.mxu0 %v14503_v45  ;;  %v11591_v45 = vld [vmem:[%s14732_s0 + $0x84] sm:$0xf]  ;;  %s12106_s0 = scalar_lea.vmem %s10395_s10, 64 }
0x1ecd   :  { %p12107_p0 = scmp.ne.s32.totalorder %s10395_s10, %s12106_s0  ;;  %p12112_p2 = scmp.lt.s32.totalorder %s12106_s0, %s12106_s0 }
0x1ecf   :  { %10316 = vmatpush1.bf16.msra.mxu0 %v14508_v46  ;;  %p12113_p3 = por %p12112_p2, %p12111_p1 }
0x1ed0   :  { %10317 = vmatprep.subr.bf16.mxu0 %v14517_v47 }
0x1ed1   :  { %p12114_p4 = pnand %p12113_p3, %p12107_p0 }
0x1ed3   :  { %10318 = vmatpush1.bf16.msra.mxu0 %v14522_v48 }
0x1ed4   :  { %10319 = vmatprep.subr.bf16.mxu0 %v14531_v1 }
0x1ed7   :  { %10320 = vmatpush1.bf16.msra.mxu0 %v14536_v2 }
0x1ed8   :  { %10321 = vmatprep.subr.bf16.mxu0 %v14545_v60 }
0x1edb   :  { %10322 = vmatpush1.bf16.msra.mxu0 %v14550_v15 }
0x1edc   :  { %10323 = vmatprep.subr.bf16.mxu0 %v14559_v5 }
0x1edf   :  { %10324 = vmatpush1.bf16.msra.mxu0 %v14564_v6 }
0x1f75   :  { %v9735_v22 = vpop.f32.mrb[64].mxu0 }
0x1f76   :  { %v9737_v49 = vpop.f32.mrb[65].mxu0 }
0x1f77   :  { %v9744_v27 = vcombine.low %v9735_v22, %v9737_v49  ;;  %v9739_v28 = vpop.f32.mrb[66].mxu0 }
0x1f78   :  { %v9740_v30 = vpop.f32.mrb[67].mxu0 }
0x1f79   :  { %v9751_v31 = vrot.slane %v9744_v27, %v12419_v43 }
0x1f7b   :  { %v9753_v32 = vadd.f32 %v11555_v29, %v9751_v31 }
0x1f7d   :  { %12100 = vtanh.f32 %v9753_v32 }
0x1f87   :  { %v12101_v33 = vpop.eup %12100 }
0x1f88   :  { %v9763_v50 = vrot.slane %v12101_v33, %v12419_v43  ;;  %9755 = vst [vmem:[#allocation2] sm:$0xf] %v12101_v33 }
0x1f8a   :  { %v9764_v37 = vcombine.high %v9763_v50, %v9763_v50 }
0x1f8c   :  { %v11589_v61 = vpack.c.bf16 %v9764_v37, %v9763_v50 }
0x1f8e   :  { %v9778_v62 = vrot.slane %v11589_v61, %v12426_v57 }
0x1f8f   :  { %v11592_v36 = vld.sshfl [vmem:[#allocation2] sm:$0x33 pattern:$0x76325410] }
0x1f90   :  { %11694 = vst.sshfl [vmem:[%s14735_s3 + $0x40] sm:$0x5 pattern:$0x73625140] %v9778_v62  ;;  %v9800_v3 = vcombine.high %v11592_v36, %v11592_v36  ;;  %v9803_v39 = vpack.c.bf16 %v11592_v36, %v11592_v36 }
0x1f92   :  { %v9804_v42 = vpack.c.bf16 %v9800_v3, %v9800_v3 }
0x1f94   :  { %10029 = vmatprep.mubr.bf16.mxu1 %v9804_v42 }
0x1f95   :  { %10030 = vmatmul.mubr.bf16.vlgmr.msra.gmra.mrb[64].mxu1 %v9803_v39 }
0x2068   :  { %v10031_v12 = vpop.f32.mrb[64].mxu1 }
0x2069   :  { %v10033_v4 = vpop.f32.mrb[65].mxu1 }
0x206a   :  { %v10040_v59 = vcombine.low %v10031_v12, %v10033_v4  ;;  %v10035_v44 = vpop.f32.mrb[66].mxu1 }
0x206b   :  { %v10036_v46 = vpop.f32.mrb[67].mxu1 }
0x206c   :  { %v10047_v47 = vrot.slane %v10040_v59, %v12419_v43 }
0x206e   :  { %v10049_v48 = vadd.f32 %v11591_v45, %v10047_v47 }
0x2070   :  { %12102 = vtanh.f32 %v10049_v48 }
0x207a   :  { %v12103_v1 = vpop.eup %12102 }
0x207b   :  { %v10059_v2 = vrot.slane %v12103_v1, %v12419_v43  ;;  %10051 = vst [vmem:[#allocation2] sm:$0xf] %v12103_v1 }
0x207d   :  { %v10060_v60 = vcombine.high %v10059_v2, %v10059_v2 }
0x207f   :  { %v11625_v15 = vpack.c.bf16 %v10060_v60, %v10059_v2 }
0x2081   :  { %v10074_v5 = vrot.slane %v11625_v15, %v12426_v57 }
0x2082   :  { %v11628_v6 = vld.sshfl [vmem:[#allocation2] sm:$0x33 pattern:$0x76325410] }
0x2083   :  { %11695 = vst.sshfl [vmem:[%s14735_s3 + $0x42] sm:$0x5 pattern:$0x73625140] %v10074_v5  ;;  %v10096_v13 = vcombine.high %v11628_v6, %v11628_v6  ;;  %v10099_v63 = vpack.c.bf16 %v11628_v6, %v11628_v6 }
0x2085   :  { %v10100_v25 = vpack.c.bf16 %v10096_v13, %v10096_v13 }
0x2087   :  { %10325 = vmatprep.mubr.bf16.mxu0 %v10100_v25 }
0x2088   :  { %10326 = vmatmul.mubr.bf16.vlgmr.msra.gmra.mrb[68].mxu0 %v10099_v63 }
0x215b   :  { %v10327_v0 = vpop.f32.mrb[68].mxu0 }
0x215c   :  { %v10329_v14 = vpop.f32.mrb[69].mxu0 }
0x215d   :  { %v10336_v19 = vcombine.low %v10327_v0, %v10329_v14  ;;  %v10331_v21 = vpop.f32.mrb[70].mxu0 }
0x215e   :  { %v10332_v40 = vpop.f32.mrb[71].mxu0 }
0x215f   :  { %v10343_v35 = vrot.slane %v10336_v19, %v12419_v43 }
0x2161   :  { %v10345_v41 = vadd.f32 %v11627_v38, %v10343_v35 }
0x2163   :  { %12104 = vtanh.f32 %v10345_v41 }
0x216d   :  { %v12105_v7 = vpop.eup %12104 }
0x216e   :  { %v10355_v8 = vrot.slane %v12105_v7, %v12419_v43  ;;  %10347 = vst [vmem:[#allocation2] sm:$0xf] %v12105_v7 }
0x2170   :  { %v10356_v9 = vcombine.high %v10355_v8, %v10355_v8 }
0x2172   :  { %v11661_v10 = vpack.c.bf16 %v10356_v9, %v10355_v8 }
0x2174   :  { %v10370_v11 = vrot.slane %v11661_v10, %v12426_v57 }
0x2175   :  { %v10384_v16 = vld [vmem:[#allocation2] sm:$0xf] }
0x2176   :  { %11696 = vst.sshfl [vmem:[%s14735_s3 + $0x44] sm:$0x5 pattern:$0x73625140] %v10370_v11  ;;  %10385 = vst [vmem:[#allocation3] sm:$0xf] %v10384_v16 }
0x2177   :  { %12117 = shalt.err (!%p12114_p4)
}
0x2178   :  { %s12118_s15 = scalar_lea.hbm %s14736_s4, 64 }
0x2179   :  { %p12119_p5 = scmp.ne.s32.totalorder %s14736_s4, %s12118_s15  ;;  %p12122_p6 = scmp.lt.u32.totalorder %s12118_s15, %s14736_s4 }
0x217b   :  { %p12124_p7 = pnand %p12122_p6, %p12119_p5 }
0x217d   :  { %12127 = shalt.err (!%p12124_p7)
}
0x217e   :  { %10397 = dma.vmem_to_hbm [thread:$0]  %s10395_s10, 64, %s14736_s4, [#allocation4]  }
0x217f   :  { %12128 = dma.done.wait [#allocation4], 64  }
0x2180   :  { %12129 = vsyncadd [#allocation4], 4294967232 }
0x2181   :  { %10403 = vsyncpa [#allocation4], 1 }

</bundles_post_ra>
